<compile_context>
chip_gen: v7x
topology: tpu7x:2x2x1
jax: 0.10.0
libtpu: 0.0.40
codegen_flags: <defaults>
</compile_context>

<pallas_src>
import functools

import numpy as np
import jax
import jax.numpy as jnp
from jax import lax
from jax.experimental import pallas as pl
from jax.experimental.pallas import tpu as pltpu


UNROLL = 8          # partial unroll of the serial recurrence loop
TT_MAX = 128        # upper bound on timesteps per grid chunk


def _round_up(n, m):
    return ((n + m - 1) // m) * m


def _vmem_limit_bytes():
    """Per-generation scoped-VMEM limit: ~3/4 of physical VMEM, capped at
    96 MiB (v5e/v6e: 128 MiB -> 96 MiB; v7x: 64 MiB -> 48 MiB)."""
    try:
        phys = int(pltpu.get_tpu_info().vmem_capacity_bytes)
    except Exception:
        phys = 64 * 1024 * 1024          # conservative fallback (v7x-sized)
    return int(min(96 * 1024 * 1024, (phys * 3) // 4))


def _pick_tt(T, B_p, C_p, D_p, vmem_limit):
    """Largest Tt whose per-chunk footprint (double-buffered x/mask/ys,
    single-buffered gx scratch and weights) stays well under the VMEM cap."""
    G = 4 * C_p
    budget = int(vmem_limit * 0.6)
    best = 8
    for tt in (8, 16, 32, 64, TT_MAX):
        use = 4 * (2 * tt * B_p * D_p      # x chunk (double buffered)
                   + 2 * tt * B_p * 1      # mask chunk
                   + 2 * tt * B_p * C_p    # ys output chunk
                   + tt * B_p * G          # gx scratch (single buffer)
                   + D_p * G + C_p * G     # W_ih, W_hh (Buffered(1))
                   + 2 * B_p * C_p)        # h/c state scratch
        if use <= budget:
            best = tt
    return min(best, _round_up(max(T, 1), 8))


def _bspec(shape, index_map, *, single_buffer=False):
    """BlockSpec; grid-invariant operands get 1-deep buffering (no duplicate
    VMEM copy) when the runtime supports pipeline_mode."""
    if single_buffer:
        try:
            return pl.BlockSpec(shape, index_map, pipeline_mode=pl.Buffered(1))
        except Exception:
            pass
    return pl.BlockSpec(shape, index_map)


def _sigmoid(x):
    # exact: sigma(x) = 0.5 * (1 + tanh(x/2)); one EUP op per gate, avoiding
    # a possible exp + divide lowering (divide -> VALU Newton iters on v5e).
    return 0.5 * jnp.tanh(0.5 * x) + 0.5


# ----------------------------------------------------------------------------
# Pallas kernels
# ----------------------------------------------------------------------------
def _blstm_layer_kernel(x_ref, m_ref, wih_ref, whh_ref, b_ref,
                        ys_ref, h_out_ref, c_out_ref,
                        gx_sc, h_sc, c_sc, *, Tt, C):
    """One (direction, T-chunk) grid cell of a bidirectional LSTM layer.

    Grid = (ndir, nT); direction axis "parallel" (megacore), T "arbitrary".
    x_ref:   (Tt, B, D)   layer-input chunk (chunks visited back-to-front for
                          the backward direction via the index_map)
    m_ref:   (Tt, B, 1)   1.0 where t < ilens[b] else 0.0
    wih_ref: (1, D, 4*C)  per-direction input->gate weights
    whh_ref: (1, C, 4*C)  per-direction hidden->gate weights
    b_ref:   (1, 1, 4*C)  per-direction combined bias (b_ih + b_hh)
    ys_ref:  (Tt, B, C)   this direction's half of the (T, B, 2*C) output
    h_out_ref / c_out_ref: (1, B, C) final states (written on last chunk only)
    gx_sc:   (Tt, B, 4*C) chunk gates scratch (never leaves VMEM)
    h_sc / c_sc: (B, C)   recurrent state, persists across T-chunks
    """
    d = pl.program_id(0)
    t = pl.program_id(1)

    @pl.when(t == 0)
    def _():
        h_sc[...] = jnp.zeros_like(h_sc)
        c_sc[...] = jnp.zeros_like(c_sc)

    # --- fused input-gate GEMM for the whole chunk (MXU, off the serial
    #     chain; result stays in VMEM scratch -> no HBM round trip) ----------
    _, B, D = x_ref.shape
    x2 = x_ref[...].reshape(Tt * B, D)
    g = jnp.dot(x2, wih_ref[0], preferred_element_type=jnp.float32) + b_ref[0]
    gx_sc[...] = g.reshape(Tt, B, 4 * C)

    # --- serial recurrence: only h @ W_hh per step ---------------------------
    def step(tl):
        gx = gx_sc[tl]                      # (B, 4*C)
        m = m_ref[tl] > 0.0                 # (B, 1) bool
        h = h_sc[...]
        c = c_sc[...]
        gates = gx + jnp.dot(h, whh_ref[0], preferred_element_type=jnp.float32)

        # PyTorch LSTM gate order: i, f, g, o (each block is C lanes wide)
        i_g = _sigmoid(gates[:, 0 * C:1 * C])
        f_g = _sigmoid(gates[:, 1 * C:2 * C])
        g_g = jnp.tanh(gates[:, 2 * C:3 * C])
        o_g = _sigmoid(gates[:, 3 * C:4 * C])

        c_new = f_g * c + i_g * g_g
        h_new = o_g * jnp.tanh(c_new)

        # packed-sequence semantics: padded steps keep the state, emit zeros
        c_sc[...] = jnp.where(m, c_new, c)
        h_sc[...] = jnp.where(m, h_new, h)
        ys_ref[tl] = jnp.where(m, h_new, 0.0)

    # direction-static time walks (no per-step select on the critical path)
    @pl.when(d == 0)
    def _():
        def body(s, carry):
            step(s)
            return carry
        lax.fori_loop(0, Tt, body, 0, unroll=UNROLL)

    @pl.when(d == 1)
    def _():
        def body(s, carry):
            step(Tt - 1 - s)
            return carry
        lax.fori_loop(0, Tt, body, 0, unroll=UNROLL)

    # final-state writeback only once, on the last T-chunk
    @pl.when(t == pl.num_programs(1) - 1)
    def _():
        h_out_ref[0] = h_sc[...]
        c_out_ref[0] = c_sc[...]


def _proj_kernel(y_ref, w_ref, b_ref, o_ref):
    """tanh(y @ W + b) over one T-chunk of the (T, B, ndir*C) sequence out."""
    Tt, B, K = y_ref.shape
    y2 = y_ref[...].reshape(Tt * B, K)
    p = jnp.tanh(jnp.dot(y2, w_ref[...], preferred_element_type=jnp.float32)
                 + b_ref[...])
    o_ref[...] = p.reshape(Tt, B, p.shape[-1]).astype(o_ref.dtype)


# ----------------------------------------------------------------------------
# pallas_call wrappers
# ----------------------------------------------------------------------------
def blstm_layer(x_tbd, mask, wih, whh, b, Tt, C_p, vmem_limit):
    """Fused (input GEMM + recurrence) bidirectional LSTM layer.

    Both directions write disjoint, lane-aligned C_p halves of the shared
    (T, B, ndir*C_p) output."""
    T_p, B_p, D = x_tbd.shape
    ndir = wih.shape[0]
    G = 4 * C_p
    nT = T_p // Tt

    def _tidx(d, t):
        # forward (d == 0): chunk t ; backward (d == 1): chunk nT-1-t
        return d * (nT - 1 - t) + (1 - d) * t

    kernel = functools.partial(_blstm_layer_kernel, Tt=Tt, C=C_p)
    ys, h_n, c_n = pl.pallas_call(
        kernel,
        out_shape=(
            jax.ShapeDtypeStruct((T_p, B_p, ndir * C_p), jnp.float32),
            jax.ShapeDtypeStruct((ndir, B_p, C_p), jnp.float32),
            jax.ShapeDtypeStruct((ndir, B_p, C_p), jnp.float32),
        ),
        grid_spec=pltpu.PrefetchScalarGridSpec(
            num_scalar_prefetch=0,
            grid=(ndir, nT),
            in_specs=[
                pl.BlockSpec((Tt, B_p, D), lambda d, t: (_tidx(d, t), 0, 0)),
                pl.BlockSpec((Tt, B_p, 1), lambda d, t: (_tidx(d, t), 0, 0)),
                _bspec((1, D, G), lambda d, t: (d, 0, 0), single_buffer=True),
                _bspec((1, C_p, G), lambda d, t: (d, 0, 0), single_buffer=True),
                _bspec((1, 1, G), lambda d, t: (d, 0, 0), single_buffer=True),
            ],
            out_specs=(
                pl.BlockSpec((Tt, B_p, C_p), lambda d, t: (_tidx(d, t), 0, d)),
                pl.BlockSpec((1, B_p, C_p), lambda d, t: (d, 0, 0)),
                pl.BlockSpec((1, B_p, C_p), lambda d, t: (d, 0, 0)),
            ),
            scratch_shapes=[
                pltpu.VMEM((Tt, B_p, G), jnp.float32),   # chunk gates (gx)
                pltpu.VMEM((B_p, C_p), jnp.float32),     # h state
                pltpu.VMEM((B_p, C_p), jnp.float32),     # c state
            ],
        ),
        compiler_params=pltpu.CompilerParams(
            dimension_semantics=("parallel", "arbitrary"),
            vmem_limit_bytes=vmem_limit),
    )(x_tbd, mask, wih, whh, b)
    return ys, h_n, c_n


def proj_tanh(ys, w, b, Tt, vmem_limit):
    """Row-tiled tanh(Linear) over the (T, B, ndir*C) sequence output."""
    T_p, B_p, K = ys.shape
    H = w.shape[1]
    nT = T_p // Tt
    return pl.pallas_call(
        _proj_kernel,
        out_shape=jax.ShapeDtypeStruct((T_p, B_p, H), jnp.float32),
        grid_spec=pltpu.PrefetchScalarGridSpec(
            num_scalar_prefetch=0,
            grid=(nT,),
            in_specs=[
                pl.BlockSpec((Tt, B_p, K), lambda t: (t, 0, 0)),
                _bspec((K, H), lambda t: (0, 0), single_buffer=True),
                _bspec((1, H), lambda t: (0, 0), single_buffer=True),
            ],
            out_specs=pl.BlockSpec((Tt, B_p, H), lambda t: (t, 0, 0)),
        ),
        compiler_params=pltpu.CompilerParams(
            dimension_semantics=("parallel",),
            vmem_limit_bytes=vmem_limit),
    )(ys, w, b)


# ----------------------------------------------------------------------------
# Parameter padding to lane/sublane-aligned, direction-stacked layout
# ----------------------------------------------------------------------------
def _pad_gate_cols(w, cdim, C_p):
    """(..., 4*cdim) -> (..., 4*C_p): each gate block zero-padded to C_p."""
    parts = []
    for k in range(4):
        blk = w[..., k * cdim:(k + 1) * cdim]
        parts.append(jnp.pad(blk, [(0, 0)] * (w.ndim - 1) + [(0, C_p - cdim)]))
    return jnp.concatenate(parts, axis=-1)


def pad_params(params, idim, elayers, cdim, hdim, ndir, D0_p, C_p, H_p):
    G = 4 * C_p
    layers = []
    for l in range(elayers):
        in_size = idim if l == 0 else cdim * ndir
        in_p = D0_p if l == 0 else C_p * ndir
        wih_l, whh_l, b_l = [], [], []
        for d in range(ndir):
            w_ih, w_hh, b = params["lstm"][(l, d)]
            w_ih_c = _pad_gate_cols(w_ih, cdim, C_p)          # (in_size, G)
            w_hh_c = _pad_gate_cols(w_hh, cdim, C_p)          # (cdim, G)
            b_c = _pad_gate_cols(b[None, :], cdim, C_p)       # (1, G)
            if l == 0:
                w_ih_p = jnp.zeros((in_p, G), jnp.float32).at[:in_size].set(w_ih_c)
            else:
                # input rows of layer l>0 live at offsets 0 (fwd) and C_p (rev)
                w_ih_p = jnp.zeros((in_p, G), jnp.float32)
                for dd in range(ndir):
                    w_ih_p = w_ih_p.at[dd * C_p:dd * C_p + cdim].set(
                        w_ih_c[dd * cdim:(dd + 1) * cdim])
            w_hh_p = jnp.zeros((C_p, G), jnp.float32).at[:cdim].set(w_hh_c)
            wih_l.append(w_ih_p)
            whh_l.append(w_hh_p)
            b_l.append(b_c)
        layers.append((jnp.stack(wih_l), jnp.stack(whh_l), jnp.stack(b_l)))

    w_last = params["w_last"]                                 # (ndir*cdim, hdim)
    w_last_p = jnp.zeros((ndir * C_p, H_p), jnp.float32)
    for dd in range(ndir):
        w_last_p = w_last_p.at[dd * C_p:dd * C_p + cdim, :hdim].set(
            w_last[dd * cdim:(dd + 1) * cdim])
    b_last_p = jnp.zeros((1, H_p), jnp.float32).at[0, :hdim].set(params["b_last"])
    return {"layers": layers, "w_last": w_last_p, "b_last": b_last_p}


# ----------------------------------------------------------------------------
# Forward pass (mirrors RNN.forward(xs_pad, ilens, prev_state=None), 'blstm')
# ----------------------------------------------------------------------------
def rnn_forward(xs_pad, ilens, params, *, elayers, cdim, hdim, bidir=True):
    B, T, idim = xs_pad.shape
    ndir = 2 if bidir else 1

    # lane/sublane-aligned padded sizes.  (Callers batching >= 32 utterances
    # per call fill more MXU rows in the recurrence nearly for free.)
    B_p = _round_up(B, 8)
    C_p = _round_up(cdim, 128)
    H_p = _round_up(hdim, 128)
    D0_p = _round_up(idim, 128)

    vmem_limit = _vmem_limit_bytes()
    D_max = max(D0_p, ndir * C_p)
    Tt = _pick_tt(T, B_p, C_p, D_max, vmem_limit)   # timesteps per grid chunk
    T_p = _round_up(T, Tt)

    pparams = pad_params(params, idim, elayers, cdim, hdim, ndir, D0_p, C_p, H_p)

    # time-major, zero-padded input (T_p, B_p, D0_p)
    x = jnp.transpose(xs_pad, (1, 0, 2)).astype(jnp.float32)
    x = jnp.pad(x, ((0, T_p - T), (0, B_p - B), (0, D0_p - idim)))

    ilens_p = jnp.pad(jnp.asarray(ilens, jnp.int32), (0, B_p - B))
    mask = (jnp.arange(T_p, dtype=jnp.int32)[:, None]
            < ilens_p[None, :]).astype(jnp.float32)[:, :, None]      # (T_p,B_p,1)

    layer_in = x
    h_list, c_list = [], []
    for l in range(elayers):
        wih, whh, b = pparams["layers"][l]
        ys, h_n, c_n = blstm_layer(layer_in, mask, wih, whh, b, Tt, C_p, vmem_limit)
        layer_in = ys                                        # (T_p,B_p,ndir*C_p)
        h_list.append(h_n)
        c_list.append(c_n)
        # TODO(synk): inter-layer dropout (training mode) not implemented.

    # final projection + tanh (applied to padded rows too, as in PyTorch)
    proj = proj_tanh(layer_in, pparams["w_last"], pparams["b_last"], Tt, vmem_limit)
    xs_out = jnp.transpose(proj, (1, 0, 2))[:B, :T, :hdim]   # (B, T, hdim)

    h_n = jnp.concatenate(h_list, axis=0)[:, :B, :cdim]      # (elayers*ndir,B,cdim)
    c_n = jnp.concatenate(c_list, axis=0)[:, :B, :cdim]
    return xs_out, ilens, (h_n, c_n)


# ----------------------------------------------------------------------------
# Pure-JAX reference (HIGHEST-precision matmuls so the comparison is tight)
# ----------------------------------------------------------------------------
def _lstm_dir_ref(x, mask, w_ih, w_hh, b, reverse, cdim):
    T, B, _ = x.shape
    prec = lax.Precision.HIGHEST

    def step(carry, inp):
        h, c = carry
        x_t, m = inp
        gates = (jnp.dot(x_t, w_ih, precision=prec)
                 + jnp.dot(h, w_hh, precision=prec) + b)
        i = _sigmoid(gates[:, :cdim])
        f = _sigmoid(gates[:, cdim:2 * cdim])
        g = jnp.tanh(gates[:, 2 * cdim:3 * cdim])
        o = _sigmoid(gates[:, 3 * cdim:])
        c_new = f * c + i * g
        h_new = o * jnp.tanh(c_new)
        h2 = jnp.where(m > 0, h_new, h)
        c2 = jnp.where(m > 0, c_new, c)
        return (h2, c2), m * h_new

    xs = x[::-1] if reverse else x
    ms = mask[::-1] if reverse else mask
    (h_f, c_f), ys = lax.scan(
        step, (jnp.zeros((B, cdim)), jnp.zeros((B, cdim))), (xs, ms))
    if reverse:
        ys = ys[::-1]
    return ys, h_f, c_f


def rnn_forward_ref(xs_pad, ilens, params, *, elayers, cdim, hdim, bidir=True):
    B, T, _ = xs_pad.shape
    ndir = 2 if bidir else 1
    mask = (jnp.arange(T)[:, None] < ilens[None, :]).astype(jnp.float32)[:, :, None]
    layer_in = jnp.transpose(xs_pad, (1, 0, 2)).astype(jnp.float32)
    h_list, c_list = [], []
    for l in range(elayers):
        outs = []
        for d in range(ndir):
            w_ih, w_hh, b = params["lstm"][(l, d)]
            ys, h_f, c_f = _lstm_dir_ref(layer_in, mask, w_ih, w_hh, b, d == 1, cdim)
            outs.append(ys)
            h_list.append(h_f)
            c_list.append(c_f)
        layer_in = jnp.concatenate(outs, axis=-1)
    proj = jnp.tanh(jnp.dot(layer_in.reshape(T * B, -1), params["w_last"],
                            precision=lax.Precision.HIGHEST) + params["b_last"])
    xs_out = jnp.transpose(proj.reshape(T, B, hdim), (1, 0, 2))
    return xs_out, jnp.stack(h_list, 0), jnp.stack(c_list, 0)


# ----------------------------------------------------------------------------
# Deterministic parameter init (matches torch.nn.LSTM / Linear shapes)
# ----------------------------------------------------------------------------
def init_params(key, idim, elayers, cdim, hdim, bidir=True):
    ndir = 2 if bidir else 1
    params = {"lstm": {}}
    k = 1.0 / np.sqrt(cdim)
    keys = jax.random.split(key, elayers * ndir * 4 + 2)
    idx = 0
    for l in range(elayers):
        in_size = idim if l == 0 else cdim * ndir
        for d in range(ndir):
            w_ih = jax.random.uniform(keys[idx], (in_size, 4 * cdim), jnp.float32, -k, k); idx += 1
            w_hh = jax.random.uniform(keys[idx], (cdim, 4 * cdim), jnp.float32, -k, k); idx += 1
            b_ih = jax.random.uniform(keys[idx], (4 * cdim,), jnp.float32, -k, k); idx += 1
            b_hh = jax.random.uniform(keys[idx], (4 * cdim,), jnp.float32, -k, k); idx += 1
            params["lstm"][(l, d)] = (w_ih, w_hh, b_ih + b_hh)
    kl = 1.0 / np.sqrt(cdim * ndir)
    params["w_last"] = jax.random.uniform(keys[idx], (cdim * ndir, hdim), jnp.float32, -kl, kl); idx += 1
    params["b_last"] = jax.random.uniform(keys[idx], (hdim,), jnp.float32, -kl, kl)
    return params


# ----------------------------------------------------------------------------
if __name__ == "__main__":
    B, T, idim, elayers, cdim, hdim = 2, 8, 16, 2, 32, 32

    key = jax.random.PRNGKey(0)
    k_x, k_p = jax.random.split(key)
    xs_pad = jax.random.normal(k_x, (B, T, idim), jnp.float32)
    ilens = jnp.array([8, 6], dtype=jnp.int32)   # sorted desc (pack_padded_sequence)
    params = init_params(k_p, idim, elayers, cdim, hdim, bidir=True)

    xs_out, olens, (h_n, c_n) = rnn_forward(
        xs_pad, ilens, params, elayers=elayers, cdim=cdim, hdim=hdim, bidir=True)
    xs_out = jax.block_until_ready(xs_out)

    assert xs_out.shape == (B, T, hdim)
    assert h_n.shape == (elayers * 2, B, cdim) and c_n.shape == (elayers * 2, B, cdim)

    ref_out, ref_h, ref_c = rnn_forward_ref(
        xs_pad, ilens, params, elayers=elayers, cdim=cdim, hdim=hdim, bidir=True)
    assert np.allclose(np.asarray(xs_out), np.asarray(ref_out), atol=1e-3, rtol=1e-2)
    assert np.allclose(np.asarray(h_n), np.asarray(ref_h), atol=1e-3, rtol=1e-2)
    assert np.allclose(np.asarray(c_n), np.asarray(ref_c), atol=1e-3, rtol=1e-2)

    print("KERNEL_OK")
</pallas_src>

<mosaic_0001>
module attributes {stable_mosaic.version = 11 : i64} {
  func.func @_blstm_layer_kernel(%arg0: i32, %arg1: i32, %arg2: memref<8x8x128xf32, #tpu.memory_space<vmem>>, %arg3: memref<8x8x1xf32, #tpu.memory_space<vmem>>, %arg4: memref<1x128x512xf32, #tpu.memory_space<vmem>>, %arg5: memref<1x128x512xf32, #tpu.memory_space<vmem>>, %arg6: memref<1x1x512xf32, #tpu.memory_space<vmem>>, %arg7: memref<8x8x128xf32, #tpu.memory_space<vmem>>, %arg8: memref<1x8x128xf32, #tpu.memory_space<vmem>>, %arg9: memref<1x8x128xf32, #tpu.memory_space<vmem>>, %arg10: memref<8x8x512xf32, #tpu.memory_space<vmem>>, %arg11: memref<8x128xf32, #tpu.memory_space<vmem>>, %arg12: memref<8x128xf32, #tpu.memory_space<vmem>>) attributes {dimension_semantics = [#tpu.dimension_semantics<parallel>, #tpu.dimension_semantics<arbitrary>], iteration_bounds = array<i64: 2, 1>, scalar_prefetch = 0 : i64, scratch_operands = 3 : i64, tpu.core_type = #tpu.core_type<tc>, window_params = [{transform_indices = @transform_0, window_bounds = array<i64: 8, 8, 128>}, {transform_indices = @transform_1, window_bounds = array<i64: 8, 8, 1>}, {pipeline_mode = #tpu.pipeline_mode<synchronous>, transform_indices = @transform_2, window_bounds = array<i64: 1, 128, 512>}, {pipeline_mode = #tpu.pipeline_mode<synchronous>, transform_indices = @transform_3, window_bounds = array<i64: 1, 128, 512>}, {pipeline_mode = #tpu.pipeline_mode<synchronous>, transform_indices = @transform_4, window_bounds = array<i64: 1, 1, 512>}, {transform_indices = @transform_5, window_bounds = array<i64: 8, 8, 128>}, {transform_indices = @transform_6, window_bounds = array<i64: 1, 8, 128>}, {transform_indices = @transform_7, window_bounds = array<i64: 1, 8, 128>}]} {
    %c0_i32 = arith.constant 0 : i32
    %0 = arith.cmpi eq, %arg1, %c0_i32 : i32
    %1 = arith.extui %0 : i1 to i32
    %c0_i32_0 = arith.constant 0 : i32
    %2 = arith.cmpi ne, %1, %c0_i32_0 : i32
    scf.if %2 {
      %cst_17 = arith.constant 0.000000e+00 : f32
      %23 = vector.broadcast %cst_17 : f32 to vector<8x128xf32>
      %c0_18 = arith.constant 0 : index
      %c0_19 = arith.constant 0 : index
      %24 = vector.load %arg11[%c0_18, %c0_19] : memref<8x128xf32, #tpu.memory_space<vmem>>, vector<8x128xf32>
      tpu.vector_store %arg11[%c0_18, %c0_19], %23 {strides = array<i32>} : memref<8x128xf32, #tpu.memory_space<vmem>>, vector<8x128xf32>,
      %cst_20 = arith.constant 0.000000e+00 : f32
      %25 = vector.broadcast %cst_20 : f32 to vector<8x128xf32>
      %c0_21 = arith.constant 0 : index
      %c0_22 = arith.constant 0 : index
      %26 = vector.load %arg12[%c0_21, %c0_22] : memref<8x128xf32, #tpu.memory_space<vmem>>, vector<8x128xf32>
      tpu.vector_store %arg12[%c0_21, %c0_22], %25 {strides = array<i32>} : memref<8x128xf32, #tpu.memory_space<vmem>>, vector<8x128xf32>,
    } else {
    }
    %c0 = arith.constant 0 : index
    %c0_1 = arith.constant 0 : index
    %c0_2 = arith.constant 0 : index
    %3 = vector.load %arg2[%c0, %c0_1, %c0_2] : memref<8x8x128xf32, #tpu.memory_space<vmem>>, vector<8x8x128xf32>
    %4 = vector.shape_cast %3 : vector<8x8x128xf32> to vector<64x128xf32>
    %c0_3 = arith.constant 0 : index
    %c0_4 = arith.constant 0 : index
    %c0_5 = arith.constant 0 : index
    %5 = vector.load %arg4[%c0_3, %c0_4, %c0_5] : memref<1x128x512xf32, #tpu.memory_space<vmem>>, vector<1x128x512xf32>
    %6 = vector.shape_cast %5 : vector<1x128x512xf32> to vector<128x512xf32>
    %cst = arith.constant dense<0.000000e+00> : vector<64x512xf32>
    %7 = tpu.matmul %4, %6, %cst {dimension_numbers = #tpu.dot_dimension_numbers<[1], [0], [0], [1], [0, 0, 1, 1], [], []>} : vector<64x128xf32>, vector<128x512xf32>, vector<64x512xf32> -> vector<64x512xf32>
    %c0_6 = arith.constant 0 : index
    %c0_7 = arith.constant 0 : index
    %c0_8 = arith.constant 0 : index
    %8 = vector.load %arg6[%c0_6, %c0_7, %c0_8] : memref<1x1x512xf32, #tpu.memory_space<vmem>>, vector<1x1x512xf32>
    %9 = vector.shape_cast %8 : vector<1x1x512xf32> to vector<1x512xf32>
    %10 = vector.broadcast %9 : vector<1x512xf32> to vector<64x512xf32>
    %11 = arith.addf %7, %10 : vector<64x512xf32>
    %12 = vector.shape_cast %11 : vector<64x512xf32> to vector<8x8x512xf32>
    %c0_9 = arith.constant 0 : index
    %c0_10 = arith.constant 0 : index
    %c0_11 = arith.constant 0 : index
    %13 = vector.load %arg10[%c0_9, %c0_10, %c0_11] : memref<8x8x512xf32, #tpu.memory_space<vmem>>, vector<8x8x512xf32>
    tpu.vector_store %arg10[%c0_9, %c0_10, %c0_11], %12 {strides = array<i32>} : memref<8x8x512xf32, #tpu.memory_space<vmem>>, vector<8x8x512xf32>,
    %c0_i32_12 = arith.constant 0 : i32
    %14 = arith.cmpi eq, %arg0, %c0_i32_12 : i32
    %15 = arith.extui %14 : i1 to i32
    %c0_i32_13 = arith.constant 0 : i32
    %16 = arith.cmpi ne, %15, %c0_i32_13 : i32
    scf.if %16 {
      %c0_i32_17 = arith.constant 0 : i32
      %23 = arith.index_cast %c0_i32_17 : i32 to index
      %c0_18 = arith.constant 0 : index
      %c0_19 = arith.constant 0 : index
      %24 = vector.load %arg10[%23, %c0_18, %c0_19] : memref<8x8x512xf32, #tpu.memory_space<vmem>>, vector<1x8x512xf32>
      %25 = vector.shape_cast %24 : vector<1x8x512xf32> to vector<8x512xf32>
      %26 = arith.index_cast %c0_i32_17 : i32 to index
      %c0_20 = arith.constant 0 : index
      %c0_21 = arith.constant 0 : index
      %27 = vector.load %arg3[%26, %c0_20, %c0_21] : memref<8x8x1xf32, #tpu.memory_space<vmem>>, vector<1x8x1xf32>
      %28 = vector.shape_cast %27 : vector<1x8x1xf32> to vector<8x1xf32>
      %cst_22 = arith.constant 0.000000e+00 : f32
      %29 = vector.broadcast %cst_22 : f32 to vector<8x1xf32>
      %30 = arith.cmpf ogt, %28, %29 : vector<8x1xf32>
      %c0_23 = arith.constant 0 : index
      %c0_24 = arith.constant 0 : index
      %31 = vector.load %arg11[%c0_23, %c0_24] : memref<8x128xf32, #tpu.memory_space<vmem>>, vector<8x128xf32>
      %c0_25 = arith.constant 0 : index
      %c0_26 = arith.constant 0 : index
      %32 = vector.load %arg12[%c0_25, %c0_26] : memref<8x128xf32, #tpu.memory_space<vmem>>, vector<8x128xf32>
      %c0_27 = arith.constant 0 : index
      %c0_28 = arith.constant 0 : index
      %c0_29 = arith.constant 0 : index
      %33 = vector.load %arg5[%c0_27, %c0_28, %c0_29] : memref<1x128x512xf32, #tpu.memory_space<vmem>>, vector<1x128x512xf32>
      %34 = vector.shape_cast %33 : vector<1x128x512xf32> to vector<128x512xf32>
      %cst_30 = arith.constant dense<0.000000e+00> : vector<8x512xf32>
      %35 = tpu.matmul %31, %34, %cst_30 {dimension_numbers = #tpu.dot_dimension_numbers<[1], [0], [0], [1], [0, 0, 1, 1], [], []>} : vector<8x128xf32>, vector<128x512xf32>, vector<8x512xf32> -> vector<8x512xf32>
      %36 = arith.addf %25, %35 : vector<8x512xf32>
      %37 = vector.extract_strided_slice %36 {offsets = [0, 0], sizes = [8, 128], strides = [1, 1]} : vector<8x512xf32> to vector<8x128xf32>
      %cst_31 = arith.constant 5.000000e-01 : f32
      %38 = vector.broadcast %cst_31 : f32 to vector<8x128xf32>
      %39 = arith.mulf %38, %37 : vector<8x128xf32>
      %40 = math.tanh %39 : vector<8x128xf32>
      %cst_32 = arith.constant 5.000000e-01 : f32
      %41 = vector.broadcast %cst_32 : f32 to vector<8x128xf32>
      %42 = arith.mulf %41, %40 : vector<8x128xf32>
      %cst_33 = arith.constant 5.000000e-01 : f32
      %43 = vector.broadcast %cst_33 : f32 to vector<8x128xf32>
      %44 = arith.addf %42, %43 : vector<8x128xf32>
      %45 = vector.extract_strided_slice %36 {offsets = [0, 128], sizes = [8, 128], strides = [1, 1]} : vector<8x512xf32> to vector<8x128xf32>
      %cst_34 = arith.constant 5.000000e-01 : f32
      %46 = vector.broadcast %cst_34 : f32 to vector<8x128xf32>
      %47 = arith.mulf %46, %45 : vector<8x128xf32>
      %48 = math.tanh %47 : vector<8x128xf32>
      %cst_35 = arith.constant 5.000000e-01 : f32
      %49 = vector.broadcast %cst_35 : f32 to vector<8x128xf32>
      %50 = arith.mulf %49, %48 : vector<8x128xf32>
      %cst_36 = arith.constant 5.000000e-01 : f32
      %51 = vector.broadcast %cst_36 : f32 to vector<8x128xf32>
      %52 = arith.addf %50, %51 : vector<8x128xf32>
      %53 = vector.extract_strided_slice %36 {offsets = [0, 256], sizes = [8, 128], strides = [1, 1]} : vector<8x512xf32> to vector<8x128xf32>
      %54 = math.tanh %53 : vector<8x128xf32>
      %55 = vector.extract_strided_slice %36 {offsets = [0, 384], sizes = [8, 128], strides = [1, 1]} : vector<8x512xf32> to vector<8x128xf32>
      %cst_37 = arith.constant 5.000000e-01 : f32
      %56 = vector.broadcast %cst_37 : f32 to vector<8x128xf32>
      %57 = arith.mulf %56, %55 : vector<8x128xf32>
      %58 = math.tanh %57 : vector<8x128xf32>
      %cst_38 = arith.constant 5.000000e-01 : f32
      %59 = vector.broadcast %cst_38 : f32 to vector<8x128xf32>
      %60 = arith.mulf %59, %58 : vector<8x128xf32>
      %cst_39 = arith.constant 5.000000e-01 : f32
      %61 = vector.broadcast %cst_39 : f32 to vector<8x128xf32>
      %62 = arith.addf %60, %61 : vector<8x128xf32>
      %63 = arith.mulf %52, %32 : vector<8x128xf32>
      %64 = arith.mulf %44, %54 : vector<8x128xf32>
      %65 = arith.addf %63, %64 : vector<8x128xf32>
      %66 = math.tanh %65 : vector<8x128xf32>
      %67 = arith.mulf %62, %66 : vector<8x128xf32>
      %68 = vector.shape_cast %30 : vector<8x1xi1> to vector<8x1xi1>
      %69 = vector.broadcast %68 : vector<8x1xi1> to vector<8x128xi1>
      %70 = arith.select %69, %65, %32 : vector<8x128xi1>, vector<8x128xf32>
      %c0_40 = arith.constant 0 : index
      %c0_41 = arith.constant 0 : index
      %71 = vector.load %arg12[%c0_40, %c0_41] : memref<8x128xf32, #tpu.memory_space<vmem>>, vector<8x128xf32>
      tpu.vector_store %arg12[%c0_40, %c0_41], %70 {strides = array<i32>} : memref<8x128xf32, #tpu.memory_space<vmem>>, vector<8x128xf32>,
      %72 = vector.shape_cast %30 : vector<8x1xi1> to vector<8x1xi1>
      %73 = vector.broadcast %72 : vector<8x1xi1> to vector<8x128xi1>
      %74 = arith.select %73, %67, %31 : vector<8x128xi1>, vector<8x128xf32>
      %c0_42 = arith.constant 0 : index
      %c0_43 = arith.constant 0 : index
      %75 = vector.load %arg11[%c0_42, %c0_43] : memref<8x128xf32, #tpu.memory_space<vmem>>, vector<8x128xf32>
      tpu.vector_store %arg11[%c0_42, %c0_43], %74 {strides = array<i32>} : memref<8x128xf32, #tpu.memory_space<vmem>>, vector<8x128xf32>,
      %cst_44 = arith.constant 0.000000e+00 : f32
      %76 = vector.shape_cast %30 : vector<8x1xi1> to vector<8x1xi1>
      %77 = vector.broadcast %76 : vector<8x1xi1> to vector<8x128xi1>
      %78 = vector.broadcast %cst_44 : f32 to vector<8x128xf32>
      %79 = arith.select %77, %67, %78 : vector<8x128xi1>, vector<8x128xf32>
      %80 = arith.index_cast %c0_i32_17 : i32 to index
      %c0_45 = arith.constant 0 : index
      %c0_46 = arith.constant 0 : index
      %81 = vector.load %arg7[%80, %c0_45, %c0_46] : memref<8x8x128xf32, #tpu.memory_space<vmem>>, vector<1x8x128xf32>
      %82 = vector.shape_cast %81 : vector<1x8x128xf32> to vector<8x128xf32>
      %83 = vector.shape_cast %79 : vector<8x128xf32> to vector<1x8x128xf32>
      tpu.vector_store %arg7[%80, %c0_45, %c0_46], %83 {strides = array<i32>} : memref<8x8x128xf32, #tpu.memory_space<vmem>>, vector<1x8x128xf32>,
      %c1_i32_47 = arith.constant 1 : i32
      %84 = arith.index_cast %c1_i32_47 : i32 to index
      %c0_48 = arith.constant 0 : index
      %c0_49 = arith.constant 0 : index
      %85 = vector.load %arg10[%84, %c0_48, %c0_49] : memref<8x8x512xf32, #tpu.memory_space<vmem>>, vector<1x8x512xf32>
      %86 = vector.shape_cast %85 : vector<1x8x512xf32> to vector<8x512xf32>
      %87 = arith.index_cast %c1_i32_47 : i32 to index
      %c0_50 = arith.constant 0 : index
      %c0_51 = arith.constant 0 : index
      %88 = vector.load %arg3[%87, %c0_50, %c0_51] : memref<8x8x1xf32, #tpu.memory_space<vmem>>, vector<1x8x1xf32>
      %89 = vector.shape_cast %88 : vector<1x8x1xf32> to vector<8x1xf32>
      %cst_52 = arith.constant 0.000000e+00 : f32
      %90 = vector.broadcast %cst_52 : f32 to vector<8x1xf32>
      %91 = arith.cmpf ogt, %89, %90 : vector<8x1xf32>
      %c0_53 = arith.constant 0 : index
      %c0_54 = arith.constant 0 : index
      %92 = vector.load %arg11[%c0_53, %c0_54] : memref<8x128xf32, #tpu.memory_space<vmem>>, vector<8x128xf32>
      %c0_55 = arith.constant 0 : index
      %c0_56 = arith.constant 0 : index
      %93 = vector.load %arg12[%c0_55, %c0_56] : memref<8x128xf32, #tpu.memory_space<vmem>>, vector<8x128xf32>
      %c0_57 = arith.constant 0 : index
      %c0_58 = arith.constant 0 : index
      %c0_59 = arith.constant 0 : index
      %94 = vector.load %arg5[%c0_57, %c0_58, %c0_59] : memref<1x128x512xf32, #tpu.memory_space<vmem>>, vector<1x128x512xf32>
      %95 = vector.shape_cast %94 : vector<1x128x512xf32> to vector<128x512xf32>
      %cst_60 = arith.constant dense<0.000000e+00> : vector<8x512xf32>
      %96 = tpu.matmul %92, %95, %cst_60 {dimension_numbers = #tpu.dot_dimension_numbers<[1], [0], [0], [1], [0, 0, 1, 1], [], []>} : vector<8x128xf32>, vector<128x512xf32>, vector<8x512xf32> -> vector<8x512xf32>
      %97 = arith.addf %86, %96 : vector<8x512xf32>
      %98 = vector.extract_strided_slice %97 {offsets = [0, 0], sizes = [8, 128], strides = [1, 1]} : vector<8x512xf32> to vector<8x128xf32>
      %cst_61 = arith.constant 5.000000e-01 : f32
      %99 = vector.broadcast %cst_61 : f32 to vector<8x128xf32>
      %100 = arith.mulf %99, %98 : vector<8x128xf32>
      %101 = math.tanh %100 : vector<8x128xf32>
      %cst_62 = arith.constant 5.000000e-01 : f32
      %102 = vector.broadcast %cst_62 : f32 to vector<8x128xf32>
      %103 = arith.mulf %102, %101 : vector<8x128xf32>
      %cst_63 = arith.constant 5.000000e-01 : f32
      %104 = vector.broadcast %cst_63 : f32 to vector<8x128xf32>
      %105 = arith.addf %103, %104 : vector<8x128xf32>
      %106 = vector.extract_strided_slice %97 {offsets = [0, 128], sizes = [8, 128], strides = [1, 1]} : vector<8x512xf32> to vector<8x128xf32>
      %cst_64 = arith.constant 5.000000e-01 : f32
      %107 = vector.broadcast %cst_64 : f32 to vector<8x128xf32>
      %108 = arith.mulf %107, %106 : vector<8x128xf32>
      %109 = math.tanh %108 : vector<8x128xf32>
      %cst_65 = arith.constant 5.000000e-01 : f32
      %110 = vector.broadcast %cst_65 : f32 to vector<8x128xf32>
      %111 = arith.mulf %110, %109 : vector<8x128xf32>
      %cst_66 = arith.constant 5.000000e-01 : f32
      %112 = vector.broadcast %cst_66 : f32 to vector<8x128xf32>
      %113 = arith.addf %111, %112 : vector<8x128xf32>
      %114 = vector.extract_strided_slice %97 {offsets = [0, 256], sizes = [8, 128], strides = [1, 1]} : vector<8x512xf32> to vector<8x128xf32>
      %115 = math.tanh %114 : vector<8x128xf32>
      %116 = vector.extract_strided_slice %97 {offsets = [0, 384], sizes = [8, 128], strides = [1, 1]} : vector<8x512xf32> to vector<8x128xf32>
      %cst_67 = arith.constant 5.000000e-01 : f32
      %117 = vector.broadcast %cst_67 : f32 to vector<8x128xf32>
      %118 = arith.mulf %117, %116 : vector<8x128xf32>
      %119 = math.tanh %118 : vector<8x128xf32>
      %cst_68 = arith.constant 5.000000e-01 : f32
      %120 = vector.broadcast %cst_68 : f32 to vector<8x128xf32>
      %121 = arith.mulf %120, %119 : vector<8x128xf32>
      %cst_69 = arith.constant 5.000000e-01 : f32
      %122 = vector.broadcast %cst_69 : f32 to vector<8x128xf32>
      %123 = arith.addf %121, %122 : vector<8x128xf32>
      %124 = arith.mulf %113, %93 : vector<8x128xf32>
      %125 = arith.mulf %105, %115 : vector<8x128xf32>
      %126 = arith.addf %124, %125 : vector<8x128xf32>
      %127 = math.tanh %126 : vector<8x128xf32>
      %128 = arith.mulf %123, %127 : vector<8x128xf32>
      %129 = vector.shape_cast %91 : vector<8x1xi1> to vector<8x1xi1>
      %130 = vector.broadcast %129 : vector<8x1xi1> to vector<8x128xi1>
      %131 = arith.select %130, %126, %93 : vector<8x128xi1>, vector<8x128xf32>
      %c0_70 = arith.constant 0 : index
      %c0_71 = arith.constant 0 : index
      %132 = vector.load %arg12[%c0_70, %c0_71] : memref<8x128xf32, #tpu.memory_space<vmem>>, vector<8x128xf32>
      tpu.vector_store %arg12[%c0_70, %c0_71], %131 {strides = array<i32>} : memref<8x128xf32, #tpu.memory_space<vmem>>, vector<8x128xf32>,
      %133 = vector.shape_cast %91 : vector<8x1xi1> to vector<8x1xi1>
      %134 = vector.broadcast %133 : vector<8x1xi1> to vector<8x128xi1>
      %135 = arith.select %134, %128, %92 : vector<8x128xi1>, vector<8x128xf32>
      %c0_72 = arith.constant 0 : index
      %c0_73 = arith.constant 0 : index
      %136 = vector.load %arg11[%c0_72, %c0_73] : memref<8x128xf32, #tpu.memory_space<vmem>>, vector<8x128xf32>
      tpu.vector_store %arg11[%c0_72, %c0_73], %135 {strides = array<i32>} : memref<8x128xf32, #tpu.memory_space<vmem>>, vector<8x128xf32>,
      %cst_74 = arith.constant 0.000000e+00 : f32
      %137 = vector.shape_cast %91 : vector<8x1xi1> to vector<8x1xi1>
      %138 = vector.broadcast %137 : vector<8x1xi1> to vector<8x128xi1>
      %139 = vector.broadcast %cst_74 : f32 to vector<8x128xf32>
      %140 = arith.select %138, %128, %139 : vector<8x128xi1>, vector<8x128xf32>
      %141 = arith.index_cast %c1_i32_47 : i32 to index
      %c0_75 = arith.constant 0 : index
      %c0_76 = arith.constant 0 : index
      %142 = vector.load %arg7[%141, %c0_75, %c0_76] : memref<8x8x128xf32, #tpu.memory_space<vmem>>, vector<1x8x128xf32>
      %143 = vector.shape_cast %142 : vector<1x8x128xf32> to vector<8x128xf32>
      %144 = vector.shape_cast %140 : vector<8x128xf32> to vector<1x8x128xf32>
      tpu.vector_store %arg7[%141, %c0_75, %c0_76], %144 {strides = array<i32>} : memref<8x8x128xf32, #tpu.memory_space<vmem>>, vector<1x8x128xf32>,
      %c2_i32 = arith.constant 2 : i32
      %145 = arith.index_cast %c2_i32 : i32 to index
      %c0_77 = arith.constant 0 : index
      %c0_78 = arith.constant 0 : index
      %146 = vector.load %arg10[%145, %c0_77, %c0_78] : memref<8x8x512xf32, #tpu.memory_space<vmem>>, vector<1x8x512xf32>
      %147 = vector.shape_cast %146 : vector<1x8x512xf32> to vector<8x512xf32>
      %148 = arith.index_cast %c2_i32 : i32 to index
      %c0_79 = arith.constant 0 : index
      %c0_80 = arith.constant 0 : index
      %149 = vector.load %arg3[%148, %c0_79, %c0_80] : memref<8x8x1xf32, #tpu.memory_space<vmem>>, vector<1x8x1xf32>
      %150 = vector.shape_cast %149 : vector<1x8x1xf32> to vector<8x1xf32>
      %cst_81 = arith.constant 0.000000e+00 : f32
      %151 = vector.broadcast %cst_81 : f32 to vector<8x1xf32>
      %152 = arith.cmpf ogt, %150, %151 : vector<8x1xf32>
      %c0_82 = arith.constant 0 : index
      %c0_83 = arith.constant 0 : index
      %153 = vector.load %arg11[%c0_82, %c0_83] : memref<8x128xf32, #tpu.memory_space<vmem>>, vector<8x128xf32>
      %c0_84 = arith.constant 0 : index
      %c0_85 = arith.constant 0 : index
      %154 = vector.load %arg12[%c0_84, %c0_85] : memref<8x128xf32, #tpu.memory_space<vmem>>, vector<8x128xf32>
      %c0_86 = arith.constant 0 : index
      %c0_87 = arith.constant 0 : index
      %c0_88 = arith.constant 0 : index
      %155 = vector.load %arg5[%c0_86, %c0_87, %c0_88] : memref<1x128x512xf32, #tpu.memory_space<vmem>>, vector<1x128x512xf32>
      %156 = vector.shape_cast %155 : vector<1x128x512xf32> to vector<128x512xf32>
      %cst_89 = arith.constant dense<0.000000e+00> : vector<8x512xf32>
      %157 = tpu.matmul %153, %156, %cst_89 {dimension_numbers = #tpu.dot_dimension_numbers<[1], [0], [0], [1], [0, 0, 1, 1], [], []>} : vector<8x128xf32>, vector<128x512xf32>, vector<8x512xf32> -> vector<8x512xf32>
      %158 = arith.addf %147, %157 : vector<8x512xf32>
      %159 = vector.extract_strided_slice %158 {offsets = [0, 0], sizes = [8, 128], strides = [1, 1]} : vector<8x512xf32> to vector<8x128xf32>
      %cst_90 = arith.constant 5.000000e-01 : f32
      %160 = vector.broadcast %cst_90 : f32 to vector<8x128xf32>
      %161 = arith.mulf %160, %159 : vector<8x128xf32>
      %162 = math.tanh %161 : vector<8x128xf32>
      %cst_91 = arith.constant 5.000000e-01 : f32
      %163 = vector.broadcast %cst_91 : f32 to vector<8x128xf32>
      %164 = arith.mulf %163, %162 : vector<8x128xf32>
      %cst_92 = arith.constant 5.000000e-01 : f32
      %165 = vector.broadcast %cst_92 : f32 to vector<8x128xf32>
      %166 = arith.addf %164, %165 : vector<8x128xf32>
      %167 = vector.extract_strided_slice %158 {offsets = [0, 128], sizes = [8, 128], strides = [1, 1]} : vector<8x512xf32> to vector<8x128xf32>
      %cst_93 = arith.constant 5.000000e-01 : f32
      %168 = vector.broadcast %cst_93 : f32 to vector<8x128xf32>
      %169 = arith.mulf %168, %167 : vector<8x128xf32>
      %170 = math.tanh %169 : vector<8x128xf32>
      %cst_94 = arith.constant 5.000000e-01 : f32
      %171 = vector.broadcast %cst_94 : f32 to vector<8x128xf32>
      %172 = arith.mulf %171, %170 : vector<8x128xf32>
      %cst_95 = arith.constant 5.000000e-01 : f32
      %173 = vector.broadcast %cst_95 : f32 to vector<8x128xf32>
      %174 = arith.addf %172, %173 : vector<8x128xf32>
      %175 = vector.extract_strided_slice %158 {offsets = [0, 256], sizes = [8, 128], strides = [1, 1]} : vector<8x512xf32> to vector<8x128xf32>
      %176 = math.tanh %175 : vector<8x128xf32>
      %177 = vector.extract_strided_slice %158 {offsets = [0, 384], sizes = [8, 128], strides = [1, 1]} : vector<8x512xf32> to vector<8x128xf32>
      %cst_96 = arith.constant 5.000000e-01 : f32
      %178 = vector.broadcast %cst_96 : f32 to vector<8x128xf32>
      %179 = arith.mulf %178, %177 : vector<8x128xf32>
      %180 = math.tanh %179 : vector<8x128xf32>
      %cst_97 = arith.constant 5.000000e-01 : f32
      %181 = vector.broadcast %cst_97 : f32 to vector<8x128xf32>
      %182 = arith.mulf %181, %180 : vector<8x128xf32>
      %cst_98 = arith.constant 5.000000e-01 : f32
      %183 = vector.broadcast %cst_98 : f32 to vector<8x128xf32>
      %184 = arith.addf %182, %183 : vector<8x128xf32>
      %185 = arith.mulf %174, %154 : vector<8x128xf32>
      %186 = arith.mulf %166, %176 : vector<8x128xf32>
      %187 = arith.addf %185, %186 : vector<8x128xf32>
      %188 = math.tanh %187 : vector<8x128xf32>
      %189 = arith.mulf %184, %188 : vector<8x128xf32>
      %190 = vector.shape_cast %152 : vector<8x1xi1> to vector<8x1xi1>
      %191 = vector.broadcast %190 : vector<8x1xi1> to vector<8x128xi1>
      %192 = arith.select %191, %187, %154 : vector<8x128xi1>, vector<8x128xf32>
      %c0_99 = arith.constant 0 : index
      %c0_100 = arith.constant 0 : index
      %193 = vector.load %arg12[%c0_99, %c0_100] : memref<8x128xf32, #tpu.memory_space<vmem>>, vector<8x128xf32>
      tpu.vector_store %arg12[%c0_99, %c0_100], %192 {strides = array<i32>} : memref<8x128xf32, #tpu.memory_space<vmem>>, vector<8x128xf32>,
      %194 = vector.shape_cast %152 : vector<8x1xi1> to vector<8x1xi1>
      %195 = vector.broadcast %194 : vector<8x1xi1> to vector<8x128xi1>
      %196 = arith.select %195, %189, %153 : vector<8x128xi1>, vector<8x128xf32>
      %c0_101 = arith.constant 0 : index
      %c0_102 = arith.constant 0 : index
      %197 = vector.load %arg11[%c0_101, %c0_102] : memref<8x128xf32, #tpu.memory_space<vmem>>, vector<8x128xf32>
      tpu.vector_store %arg11[%c0_101, %c0_102], %196 {strides = array<i32>} : memref<8x128xf32, #tpu.memory_space<vmem>>, vector<8x128xf32>,
      %cst_103 = arith.constant 0.000000e+00 : f32
      %198 = vector.shape_cast %152 : vector<8x1xi1> to vector<8x1xi1>
      %199 = vector.broadcast %198 : vector<8x1xi1> to vector<8x128xi1>
      %200 = vector.broadcast %cst_103 : f32 to vector<8x128xf32>
      %201 = arith.select %199, %189, %200 : vector<8x128xi1>, vector<8x128xf32>
      %202 = arith.index_cast %c2_i32 : i32 to index
      %c0_104 = arith.constant 0 : index
      %c0_105 = arith.constant 0 : index
      %203 = vector.load %arg7[%202, %c0_104, %c0_105] : memref<8x8x128xf32, #tpu.memory_space<vmem>>, vector<1x8x128xf32>
      %204 = vector.shape_cast %203 : vector<1x8x128xf32> to vector<8x128xf32>
      %205 = vector.shape_cast %201 : vector<8x128xf32> to vector<1x8x128xf32>
      tpu.vector_store %arg7[%202, %c0_104, %c0_105], %205 {strides = array<i32>} : memref<8x8x128xf32, #tpu.memory_space<vmem>>, vector<1x8x128xf32>,
      %c3_i32 = arith.constant 3 : i32
      %206 = arith.index_cast %c3_i32 : i32 to index
      %c0_106 = arith.constant 0 : index
      %c0_107 = arith.constant 0 : index
      %207 = vector.load %arg10[%206, %c0_106, %c0_107] : memref<8x8x512xf32, #tpu.memory_space<vmem>>, vector<1x8x512xf32>
      %208 = vector.shape_cast %207 : vector<1x8x512xf32> to vector<8x512xf32>
      %209 = arith.index_cast %c3_i32 : i32 to index
      %c0_108 = arith.constant 0 : index
      %c0_109 = arith.constant 0 : index
      %210 = vector.load %arg3[%209, %c0_108, %c0_109] : memref<8x8x1xf32, #tpu.memory_space<vmem>>, vector<1x8x1xf32>
      %211 = vector.shape_cast %210 : vector<1x8x1xf32> to vector<8x1xf32>
      %cst_110 = arith.constant 0.000000e+00 : f32
      %212 = vector.broadcast %cst_110 : f32 to vector<8x1xf32>
      %213 = arith.cmpf ogt, %211, %212 : vector<8x1xf32>
      %c0_111 = arith.constant 0 : index
      %c0_112 = arith.constant 0 : index
      %214 = vector.load %arg11[%c0_111, %c0_112] : memref<8x128xf32, #tpu.memory_space<vmem>>, vector<8x128xf32>
      %c0_113 = arith.constant 0 : index
      %c0_114 = arith.constant 0 : index
      %215 = vector.load %arg12[%c0_113, %c0_114] : memref<8x128xf32, #tpu.memory_space<vmem>>, vector<8x128xf32>
      %c0_115 = arith.constant 0 : index
      %c0_116 = arith.constant 0 : index
      %c0_117 = arith.constant 0 : index
      %216 = vector.load %arg5[%c0_115, %c0_116, %c0_117] : memref<1x128x512xf32, #tpu.memory_space<vmem>>, vector<1x128x512xf32>
      %217 = vector.shape_cast %216 : vector<1x128x512xf32> to vector<128x512xf32>
      %cst_118 = arith.constant dense<0.000000e+00> : vector<8x512xf32>
      %218 = tpu.matmul %214, %217, %cst_118 {dimension_numbers = #tpu.dot_dimension_numbers<[1], [0], [0], [1], [0, 0, 1, 1], [], []>} : vector<8x128xf32>, vector<128x512xf32>, vector<8x512xf32> -> vector<8x512xf32>
      %219 = arith.addf %208, %218 : vector<8x512xf32>
      %220 = vector.extract_strided_slice %219 {offsets = [0, 0], sizes = [8, 128], strides = [1, 1]} : vector<8x512xf32> to vector<8x128xf32>
      %cst_119 = arith.constant 5.000000e-01 : f32
      %221 = vector.broadcast %cst_119 : f32 to vector<8x128xf32>
      %222 = arith.mulf %221, %220 : vector<8x128xf32>
      %223 = math.tanh %222 : vector<8x128xf32>
      %cst_120 = arith.constant 5.000000e-01 : f32
      %224 = vector.broadcast %cst_120 : f32 to vector<8x128xf32>
      %225 = arith.mulf %224, %223 : vector<8x128xf32>
      %cst_121 = arith.constant 5.000000e-01 : f32
      %226 = vector.broadcast %cst_121 : f32 to vector<8x128xf32>
      %227 = arith.addf %225, %226 : vector<8x128xf32>
      %228 = vector.extract_strided_slice %219 {offsets = [0, 128], sizes = [8, 128], strides = [1, 1]} : vector<8x512xf32> to vector<8x128xf32>
      %cst_122 = arith.constant 5.000000e-01 : f32
      %229 = vector.broadcast %cst_122 : f32 to vector<8x128xf32>
      %230 = arith.mulf %229, %228 : vector<8x128xf32>
      %231 = math.tanh %230 : vector<8x128xf32>
      %cst_123 = arith.constant 5.000000e-01 : f32
      %232 = vector.broadcast %cst_123 : f32 to vector<8x128xf32>
      %233 = arith.mulf %232, %231 : vector<8x128xf32>
      %cst_124 = arith.constant 5.000000e-01 : f32
      %234 = vector.broadcast %cst_124 : f32 to vector<8x128xf32>
      %235 = arith.addf %233, %234 : vector<8x128xf32>
      %236 = vector.extract_strided_slice %219 {offsets = [0, 256], sizes = [8, 128], strides = [1, 1]} : vector<8x512xf32> to vector<8x128xf32>
      %237 = math.tanh %236 : vector<8x128xf32>
      %238 = vector.extract_strided_slice %219 {offsets = [0, 384], sizes = [8, 128], strides = [1, 1]} : vector<8x512xf32> to vector<8x128xf32>
      %cst_125 = arith.constant 5.000000e-01 : f32
      %239 = vector.broadcast %cst_125 : f32 to vector<8x128xf32>
      %240 = arith.mulf %239, %238 : vector<8x128xf32>
      %241 = math.tanh %240 : vector<8x128xf32>
      %cst_126 = arith.constant 5.000000e-01 : f32
      %242 = vector.broadcast %cst_126 : f32 to vector<8x128xf32>
      %243 = arith.mulf %242, %241 : vector<8x128xf32>
      %cst_127 = arith.constant 5.000000e-01 : f32
      %244 = vector.broadcast %cst_127 : f32 to vector<8x128xf32>
      %245 = arith.addf %243, %244 : vector<8x128xf32>
      %246 = arith.mulf %235, %215 : vector<8x128xf32>
      %247 = arith.mulf %227, %237 : vector<8x128xf32>
      %248 = arith.addf %246, %247 : vector<8x128xf32>
      %249 = math.tanh %248 : vector<8x128xf32>
      %250 = arith.mulf %245, %249 : vector<8x128xf32>
      %251 = vector.shape_cast %213 : vector<8x1xi1> to vector<8x1xi1>
      %252 = vector.broadcast %251 : vector<8x1xi1> to vector<8x128xi1>
      %253 = arith.select %252, %248, %215 : vector<8x128xi1>, vector<8x128xf32>
      %c0_128 = arith.constant 0 : index
      %c0_129 = arith.constant 0 : index
      %254 = vector.load %arg12[%c0_128, %c0_129] : memref<8x128xf32, #tpu.memory_space<vmem>>, vector<8x128xf32>
      tpu.vector_store %arg12[%c0_128, %c0_129], %253 {strides = array<i32>} : memref<8x128xf32, #tpu.memory_space<vmem>>, vector<8x128xf32>,
      %255 = vector.shape_cast %213 : vector<8x1xi1> to vector<8x1xi1>
      %256 = vector.broadcast %255 : vector<8x1xi1> to vector<8x128xi1>
      %257 = arith.select %256, %250, %214 : vector<8x128xi1>, vector<8x128xf32>
      %c0_130 = arith.constant 0 : index
      %c0_131 = arith.constant 0 : index
      %258 = vector.load %arg11[%c0_130, %c0_131] : memref<8x128xf32, #tpu.memory_space<vmem>>, vector<8x128xf32>
      tpu.vector_store %arg11[%c0_130, %c0_131], %257 {strides = array<i32>} : memref<8x128xf32, #tpu.memory_space<vmem>>, vector<8x128xf32>,
      %cst_132 = arith.constant 0.000000e+00 : f32
      %259 = vector.shape_cast %213 : vector<8x1xi1> to vector<8x1xi1>
      %260 = vector.broadcast %259 : vector<8x1xi1> to vector<8x128xi1>
      %261 = vector.broadcast %cst_132 : f32 to vector<8x128xf32>
      %262 = arith.select %260, %250, %261 : vector<8x128xi1>, vector<8x128xf32>
      %263 = arith.index_cast %c3_i32 : i32 to index
      %c0_133 = arith.constant 0 : index
      %c0_134 = arith.constant 0 : index
      %264 = vector.load %arg7[%263, %c0_133, %c0_134] : memref<8x8x128xf32, #tpu.memory_space<vmem>>, vector<1x8x128xf32>
      %265 = vector.shape_cast %264 : vector<1x8x128xf32> to vector<8x128xf32>
      %266 = vector.shape_cast %262 : vector<8x128xf32> to vector<1x8x128xf32>
      tpu.vector_store %arg7[%263, %c0_133, %c0_134], %266 {strides = array<i32>} : memref<8x8x128xf32, #tpu.memory_space<vmem>>, vector<1x8x128xf32>,
      %c4_i32 = arith.constant 4 : i32
      %267 = arith.index_cast %c4_i32 : i32 to index
      %c0_135 = arith.constant 0 : index
      %c0_136 = arith.constant 0 : index
      %268 = vector.load %arg10[%267, %c0_135, %c0_136] : memref<8x8x512xf32, #tpu.memory_space<vmem>>, vector<1x8x512xf32>
      %269 = vector.shape_cast %268 : vector<1x8x512xf32> to vector<8x512xf32>
      %270 = arith.index_cast %c4_i32 : i32 to index
      %c0_137 = arith.constant 0 : index
      %c0_138 = arith.constant 0 : index
      %271 = vector.load %arg3[%270, %c0_137, %c0_138] : memref<8x8x1xf32, #tpu.memory_space<vmem>>, vector<1x8x1xf32>
      %272 = vector.shape_cast %271 : vector<1x8x1xf32> to vector<8x1xf32>
      %cst_139 = arith.constant 0.000000e+00 : f32
      %273 = vector.broadcast %cst_139 : f32 to vector<8x1xf32>
      %274 = arith.cmpf ogt, %272, %273 : vector<8x1xf32>
      %c0_140 = arith.constant 0 : index
      %c0_141 = arith.constant 0 : index
      %275 = vector.load %arg11[%c0_140, %c0_141] : memref<8x128xf32, #tpu.memory_space<vmem>>, vector<8x128xf32>
      %c0_142 = arith.constant 0 : index
      %c0_143 = arith.constant 0 : index
      %276 = vector.load %arg12[%c0_142, %c0_143] : memref<8x128xf32, #tpu.memory_space<vmem>>, vector<8x128xf32>
      %c0_144 = arith.constant 0 : index
      %c0_145 = arith.constant 0 : index
      %c0_146 = arith.constant 0 : index
      %277 = vector.load %arg5[%c0_144, %c0_145, %c0_146] : memref<1x128x512xf32, #tpu.memory_space<vmem>>, vector<1x128x512xf32>
      %278 = vector.shape_cast %277 : vector<1x128x512xf32> to vector<128x512xf32>
      %cst_147 = arith.constant dense<0.000000e+00> : vector<8x512xf32>
      %279 = tpu.matmul %275, %278, %cst_147 {dimension_numbers = #tpu.dot_dimension_numbers<[1], [0], [0], [1], [0, 0, 1, 1], [], []>} : vector<8x128xf32>, vector<128x512xf32>, vector<8x512xf32> -> vector<8x512xf32>
      %280 = arith.addf %269, %279 : vector<8x512xf32>
      %281 = vector.extract_strided_slice %280 {offsets = [0, 0], sizes = [8, 128], strides = [1, 1]} : vector<8x512xf32> to vector<8x128xf32>
      %cst_148 = arith.constant 5.000000e-01 : f32
      %282 = vector.broadcast %cst_148 : f32 to vector<8x128xf32>
      %283 = arith.mulf %282, %281 : vector<8x128xf32>
      %284 = math.tanh %283 : vector<8x128xf32>
      %cst_149 = arith.constant 5.000000e-01 : f32
      %285 = vector.broadcast %cst_149 : f32 to vector<8x128xf32>
      %286 = arith.mulf %285, %284 : vector<8x128xf32>
      %cst_150 = arith.constant 5.000000e-01 : f32
      %287 = vector.broadcast %cst_150 : f32 to vector<8x128xf32>
      %288 = arith.addf %286, %287 : vector<8x128xf32>
      %289 = vector.extract_strided_slice %280 {offsets = [0, 128], sizes = [8, 128], strides = [1, 1]} : vector<8x512xf32> to vector<8x128xf32>
      %cst_151 = arith.constant 5.000000e-01 : f32
      %290 = vector.broadcast %cst_151 : f32 to vector<8x128xf32>
      %291 = arith.mulf %290, %289 : vector<8x128xf32>
      %292 = math.tanh %291 : vector<8x128xf32>
      %cst_152 = arith.constant 5.000000e-01 : f32
      %293 = vector.broadcast %cst_152 : f32 to vector<8x128xf32>
      %294 = arith.mulf %293, %292 : vector<8x128xf32>
      %cst_153 = arith.constant 5.000000e-01 : f32
      %295 = vector.broadcast %cst_153 : f32 to vector<8x128xf32>
      %296 = arith.addf %294, %295 : vector<8x128xf32>
      %297 = vector.extract_strided_slice %280 {offsets = [0, 256], sizes = [8, 128], strides = [1, 1]} : vector<8x512xf32> to vector<8x128xf32>
      %298 = math.tanh %297 : vector<8x128xf32>
      %299 = vector.extract_strided_slice %280 {offsets = [0, 384], sizes = [8, 128], strides = [1, 1]} : vector<8x512xf32> to vector<8x128xf32>
      %cst_154 = arith.constant 5.000000e-01 : f32
      %300 = vector.broadcast %cst_154 : f32 to vector<8x128xf32>
      %301 = arith.mulf %300, %299 : vector<8x128xf32>
      %302 = math.tanh %301 : vector<8x128xf32>
      %cst_155 = arith.constant 5.000000e-01 : f32
      %303 = vector.broadcast %cst_155 : f32 to vector<8x128xf32>
      %304 = arith.mulf %303, %302 : vector<8x128xf32>
      %cst_156 = arith.constant 5.000000e-01 : f32
      %305 = vector.broadcast %cst_156 : f32 to vector<8x128xf32>
      %306 = arith.addf %304, %305 : vector<8x128xf32>
      %307 = arith.mulf %296, %276 : vector<8x128xf32>
      %308 = arith.mulf %288, %298 : vector<8x128xf32>
      %309 = arith.addf %307, %308 : vector<8x128xf32>
      %310 = math.tanh %309 : vector<8x128xf32>
      %311 = arith.mulf %306, %310 : vector<8x128xf32>
      %312 = vector.shape_cast %274 : vector<8x1xi1> to vector<8x1xi1>
      %313 = vector.broadcast %312 : vector<8x1xi1> to vector<8x128xi1>
      %314 = arith.select %313, %309, %276 : vector<8x128xi1>, vector<8x128xf32>
      %c0_157 = arith.constant 0 : index
      %c0_158 = arith.constant 0 : index
      %315 = vector.load %arg12[%c0_157, %c0_158] : memref<8x128xf32, #tpu.memory_space<vmem>>, vector<8x128xf32>
      tpu.vector_store %arg12[%c0_157, %c0_158], %314 {strides = array<i32>} : memref<8x128xf32, #tpu.memory_space<vmem>>, vector<8x128xf32>,
      %316 = vector.shape_cast %274 : vector<8x1xi1> to vector<8x1xi1>
      %317 = vector.broadcast %316 : vector<8x1xi1> to vector<8x128xi1>
      %318 = arith.select %317, %311, %275 : vector<8x128xi1>, vector<8x128xf32>
      %c0_159 = arith.constant 0 : index
      %c0_160 = arith.constant 0 : index
      %319 = vector.load %arg11[%c0_159, %c0_160] : memref<8x128xf32, #tpu.memory_space<vmem>>, vector<8x128xf32>
      tpu.vector_store %arg11[%c0_159, %c0_160], %318 {strides = array<i32>} : memref<8x128xf32, #tpu.memory_space<vmem>>, vector<8x128xf32>,
      %cst_161 = arith.constant 0.000000e+00 : f32
      %320 = vector.shape_cast %274 : vector<8x1xi1> to vector<8x1xi1>
      %321 = vector.broadcast %320 : vector<8x1xi1> to vector<8x128xi1>
      %322 = vector.broadcast %cst_161 : f32 to vector<8x128xf32>
      %323 = arith.select %321, %311, %322 : vector<8x128xi1>, vector<8x128xf32>
      %324 = arith.index_cast %c4_i32 : i32 to index
      %c0_162 = arith.constant 0 : index
      %c0_163 = arith.constant 0 : index
      %325 = vector.load %arg7[%324, %c0_162, %c0_163] : memref<8x8x128xf32, #tpu.memory_space<vmem>>, vector<1x8x128xf32>
      %326 = vector.shape_cast %325 : vector<1x8x128xf32> to vector<8x128xf32>
      %327 = vector.shape_cast %323 : vector<8x128xf32> to vector<1x8x128xf32>
      tpu.vector_store %arg7[%324, %c0_162, %c0_163], %327 {strides = array<i32>} : memref<8x8x128xf32, #tpu.memory_space<vmem>>, vector<1x8x128xf32>,
      %c5_i32 = arith.constant 5 : i32
      %328 = arith.index_cast %c5_i32 : i32 to index
      %c0_164 = arith.constant 0 : index
      %c0_165 = arith.constant 0 : index
      %329 = vector.load %arg10[%328, %c0_164, %c0_165] : memref<8x8x512xf32, #tpu.memory_space<vmem>>, vector<1x8x512xf32>
      %330 = vector.shape_cast %329 : vector<1x8x512xf32> to vector<8x512xf32>
      %331 = arith.index_cast %c5_i32 : i32 to index
      %c0_166 = arith.constant 0 : index
      %c0_167 = arith.constant 0 : index
      %332 = vector.load %arg3[%331, %c0_166, %c0_167] : memref<8x8x1xf32, #tpu.memory_space<vmem>>, vector<1x8x1xf32>
      %333 = vector.shape_cast %332 : vector<1x8x1xf32> to vector<8x1xf32>
      %cst_168 = arith.constant 0.000000e+00 : f32
      %334 = vector.broadcast %cst_168 : f32 to vector<8x1xf32>
      %335 = arith.cmpf ogt, %333, %334 : vector<8x1xf32>
      %c0_169 = arith.constant 0 : index
      %c0_170 = arith.constant 0 : index
      %336 = vector.load %arg11[%c0_169, %c0_170] : memref<8x128xf32, #tpu.memory_space<vmem>>, vector<8x128xf32>
      %c0_171 = arith.constant 0 : index
      %c0_172 = arith.constant 0 : index
      %337 = vector.load %arg12[%c0_171, %c0_172] : memref<8x128xf32, #tpu.memory_space<vmem>>, vector<8x128xf32>
      %c0_173 = arith.constant 0 : index
      %c0_174 = arith.constant 0 : index
      %c0_175 = arith.constant 0 : index
      %338 = vector.load %arg5[%c0_173, %c0_174, %c0_175] : memref<1x128x512xf32, #tpu.memory_space<vmem>>, vector<1x128x512xf32>
      %339 = vector.shape_cast %338 : vector<1x128x512xf32> to vector<128x512xf32>
      %cst_176 = arith.constant dense<0.000000e+00> : vector<8x512xf32>
      %340 = tpu.matmul %336, %339, %cst_176 {dimension_numbers = #tpu.dot_dimension_numbers<[1], [0], [0], [1], [0, 0, 1, 1], [], []>} : vector<8x128xf32>, vector<128x512xf32>, vector<8x512xf32> -> vector<8x512xf32>
      %341 = arith.addf %330, %340 : vector<8x512xf32>
      %342 = vector.extract_strided_slice %341 {offsets = [0, 0], sizes = [8, 128], strides = [1, 1]} : vector<8x512xf32> to vector<8x128xf32>
      %cst_177 = arith.constant 5.000000e-01 : f32
      %343 = vector.broadcast %cst_177 : f32 to vector<8x128xf32>
      %344 = arith.mulf %343, %342 : vector<8x128xf32>
      %345 = math.tanh %344 : vector<8x128xf32>
      %cst_178 = arith.constant 5.000000e-01 : f32
      %346 = vector.broadcast %cst_178 : f32 to vector<8x128xf32>
      %347 = arith.mulf %346, %345 : vector<8x128xf32>
      %cst_179 = arith.constant 5.000000e-01 : f32
      %348 = vector.broadcast %cst_179 : f32 to vector<8x128xf32>
      %349 = arith.addf %347, %348 : vector<8x128xf32>
      %350 = vector.extract_strided_slice %341 {offsets = [0, 128], sizes = [8, 128], strides = [1, 1]} : vector<8x512xf32> to vector<8x128xf32>
      %cst_180 = arith.constant 5.000000e-01 : f32
      %351 = vector.broadcast %cst_180 : f32 to vector<8x128xf32>
      %352 = arith.mulf %351, %350 : vector<8x128xf32>
      %353 = math.tanh %352 : vector<8x128xf32>
      %cst_181 = arith.constant 5.000000e-01 : f32
      %354 = vector.broadcast %cst_181 : f32 to vector<8x128xf32>
      %355 = arith.mulf %354, %353 : vector<8x128xf32>
      %cst_182 = arith.constant 5.000000e-01 : f32
      %356 = vector.broadcast %cst_182 : f32 to vector<8x128xf32>
      %357 = arith.addf %355, %356 : vector<8x128xf32>
      %358 = vector.extract_strided_slice %341 {offsets = [0, 256], sizes = [8, 128], strides = [1, 1]} : vector<8x512xf32> to vector<8x128xf32>
      %359 = math.tanh %358 : vector<8x128xf32>
      %360 = vector.extract_strided_slice %341 {offsets = [0, 384], sizes = [8, 128], strides = [1, 1]} : vector<8x512xf32> to vector<8x128xf32>
      %cst_183 = arith.constant 5.000000e-01 : f32
      %361 = vector.broadcast %cst_183 : f32 to vector<8x128xf32>
      %362 = arith.mulf %361, %360 : vector<8x128xf32>
      %363 = math.tanh %362 : vector<8x128xf32>
      %cst_184 = arith.constant 5.000000e-01 : f32
      %364 = vector.broadcast %cst_184 : f32 to vector<8x128xf32>
      %365 = arith.mulf %364, %363 : vector<8x128xf32>
      %cst_185 = arith.constant 5.000000e-01 : f32
      %366 = vector.broadcast %cst_185 : f32 to vector<8x128xf32>
      %367 = arith.addf %365, %366 : vector<8x128xf32>
      %368 = arith.mulf %357, %337 : vector<8x128xf32>
      %369 = arith.mulf %349, %359 : vector<8x128xf32>
      %370 = arith.addf %368, %369 : vector<8x128xf32>
      %371 = math.tanh %370 : vector<8x128xf32>
      %372 = arith.mulf %367, %371 : vector<8x128xf32>
      %373 = vector.shape_cast %335 : vector<8x1xi1> to vector<8x1xi1>
      %374 = vector.broadcast %373 : vector<8x1xi1> to vector<8x128xi1>
      %375 = arith.select %374, %370, %337 : vector<8x128xi1>, vector<8x128xf32>
      %c0_186 = arith.constant 0 : index
      %c0_187 = arith.constant 0 : index
      %376 = vector.load %arg12[%c0_186, %c0_187] : memref<8x128xf32, #tpu.memory_space<vmem>>, vector<8x128xf32>
      tpu.vector_store %arg12[%c0_186, %c0_187], %375 {strides = array<i32>} : memref<8x128xf32, #tpu.memory_space<vmem>>, vector<8x128xf32>,
      %377 = vector.shape_cast %335 : vector<8x1xi1> to vector<8x1xi1>
      %378 = vector.broadcast %377 : vector<8x1xi1> to vector<8x128xi1>
      %379 = arith.select %378, %372, %336 : vector<8x128xi1>, vector<8x128xf32>
      %c0_188 = arith.constant 0 : index
      %c0_189 = arith.constant 0 : index
      %380 = vector.load %arg11[%c0_188, %c0_189] : memref<8x128xf32, #tpu.memory_space<vmem>>, vector<8x128xf32>
      tpu.vector_store %arg11[%c0_188, %c0_189], %379 {strides = array<i32>} : memref<8x128xf32, #tpu.memory_space<vmem>>, vector<8x128xf32>,
      %cst_190 = arith.constant 0.000000e+00 : f32
      %381 = vector.shape_cast %335 : vector<8x1xi1> to vector<8x1xi1>
      %382 = vector.broadcast %381 : vector<8x1xi1> to vector<8x128xi1>
      %383 = vector.broadcast %cst_190 : f32 to vector<8x128xf32>
      %384 = arith.select %382, %372, %383 : vector<8x128xi1>, vector<8x128xf32>
      %385 = arith.index_cast %c5_i32 : i32 to index
      %c0_191 = arith.constant 0 : index
      %c0_192 = arith.constant 0 : index
      %386 = vector.load %arg7[%385, %c0_191, %c0_192] : memref<8x8x128xf32, #tpu.memory_space<vmem>>, vector<1x8x128xf32>
      %387 = vector.shape_cast %386 : vector<1x8x128xf32> to vector<8x128xf32>
      %388 = vector.shape_cast %384 : vector<8x128xf32> to vector<1x8x128xf32>
      tpu.vector_store %arg7[%385, %c0_191, %c0_192], %388 {strides = array<i32>} : memref<8x8x128xf32, #tpu.memory_space<vmem>>, vector<1x8x128xf32>,
      %c6_i32 = arith.constant 6 : i32
      %389 = arith.index_cast %c6_i32 : i32 to index
      %c0_193 = arith.constant 0 : index
      %c0_194 = arith.constant 0 : index
      %390 = vector.load %arg10[%389, %c0_193, %c0_194] : memref<8x8x512xf32, #tpu.memory_space<vmem>>, vector<1x8x512xf32>
      %391 = vector.shape_cast %390 : vector<1x8x512xf32> to vector<8x512xf32>
      %392 = arith.index_cast %c6_i32 : i32 to index
      %c0_195 = arith.constant 0 : index
      %c0_196 = arith.constant 0 : index
      %393 = vector.load %arg3[%392, %c0_195, %c0_196] : memref<8x8x1xf32, #tpu.memory_space<vmem>>, vector<1x8x1xf32>
      %394 = vector.shape_cast %393 : vector<1x8x1xf32> to vector<8x1xf32>
      %cst_197 = arith.constant 0.000000e+00 : f32
      %395 = vector.broadcast %cst_197 : f32 to vector<8x1xf32>
      %396 = arith.cmpf ogt, %394, %395 : vector<8x1xf32>
      %c0_198 = arith.constant 0 : index
      %c0_199 = arith.constant 0 : index
      %397 = vector.load %arg11[%c0_198, %c0_199] : memref<8x128xf32, #tpu.memory_space<vmem>>, vector<8x128xf32>
      %c0_200 = arith.constant 0 : index
      %c0_201 = arith.constant 0 : index
      %398 = vector.load %arg12[%c0_200, %c0_201] : memref<8x128xf32, #tpu.memory_space<vmem>>, vector<8x128xf32>
      %c0_202 = arith.constant 0 : index
      %c0_203 = arith.constant 0 : index
      %c0_204 = arith.constant 0 : index
      %399 = vector.load %arg5[%c0_202, %c0_203, %c0_204] : memref<1x128x512xf32, #tpu.memory_space<vmem>>, vector<1x128x512xf32>
      %400 = vector.shape_cast %399 : vector<1x128x512xf32> to vector<128x512xf32>
      %cst_205 = arith.constant dense<0.000000e+00> : vector<8x512xf32>
      %401 = tpu.matmul %397, %400, %cst_205 {dimension_numbers = #tpu.dot_dimension_numbers<[1], [0], [0], [1], [0, 0, 1, 1], [], []>} : vector<8x128xf32>, vector<128x512xf32>, vector<8x512xf32> -> vector<8x512xf32>
      %402 = arith.addf %391, %401 : vector<8x512xf32>
      %403 = vector.extract_strided_slice %402 {offsets = [0, 0], sizes = [8, 128], strides = [1, 1]} : vector<8x512xf32> to vector<8x128xf32>
      %cst_206 = arith.constant 5.000000e-01 : f32
      %404 = vector.broadcast %cst_206 : f32 to vector<8x128xf32>
      %405 = arith.mulf %404, %403 : vector<8x128xf32>
      %406 = math.tanh %405 : vector<8x128xf32>
      %cst_207 = arith.constant 5.000000e-01 : f32
      %407 = vector.broadcast %cst_207 : f32 to vector<8x128xf32>
      %408 = arith.mulf %407, %406 : vector<8x128xf32>
      %cst_208 = arith.constant 5.000000e-01 : f32
      %409 = vector.broadcast %cst_208 : f32 to vector<8x128xf32>
      %410 = arith.addf %408, %409 : vector<8x128xf32>
      %411 = vector.extract_strided_slice %402 {offsets = [0, 128], sizes = [8, 128], strides = [1, 1]} : vector<8x512xf32> to vector<8x128xf32>
      %cst_209 = arith.constant 5.000000e-01 : f32
      %412 = vector.broadcast %cst_209 : f32 to vector<8x128xf32>
      %413 = arith.mulf %412, %411 : vector<8x128xf32>
      %414 = math.tanh %413 : vector<8x128xf32>
      %cst_210 = arith.constant 5.000000e-01 : f32
      %415 = vector.broadcast %cst_210 : f32 to vector<8x128xf32>
      %416 = arith.mulf %415, %414 : vector<8x128xf32>
      %cst_211 = arith.constant 5.000000e-01 : f32
      %417 = vector.broadcast %cst_211 : f32 to vector<8x128xf32>
      %418 = arith.addf %416, %417 : vector<8x128xf32>
      %419 = vector.extract_strided_slice %402 {offsets = [0, 256], sizes = [8, 128], strides = [1, 1]} : vector<8x512xf32> to vector<8x128xf32>
      %420 = math.tanh %419 : vector<8x128xf32>
      %421 = vector.extract_strided_slice %402 {offsets = [0, 384], sizes = [8, 128], strides = [1, 1]} : vector<8x512xf32> to vector<8x128xf32>
      %cst_212 = arith.constant 5.000000e-01 : f32
      %422 = vector.broadcast %cst_212 : f32 to vector<8x128xf32>
      %423 = arith.mulf %422, %421 : vector<8x128xf32>
      %424 = math.tanh %423 : vector<8x128xf32>
      %cst_213 = arith.constant 5.000000e-01 : f32
      %425 = vector.broadcast %cst_213 : f32 to vector<8x128xf32>
      %426 = arith.mulf %425, %424 : vector<8x128xf32>
      %cst_214 = arith.constant 5.000000e-01 : f32
      %427 = vector.broadcast %cst_214 : f32 to vector<8x128xf32>
      %428 = arith.addf %426, %427 : vector<8x128xf32>
      %429 = arith.mulf %418, %398 : vector<8x128xf32>
      %430 = arith.mulf %410, %420 : vector<8x128xf32>
      %431 = arith.addf %429, %430 : vector<8x128xf32>
      %432 = math.tanh %431 : vector<8x128xf32>
      %433 = arith.mulf %428, %432 : vector<8x128xf32>
      %434 = vector.shape_cast %396 : vector<8x1xi1> to vector<8x1xi1>
      %435 = vector.broadcast %434 : vector<8x1xi1> to vector<8x128xi1>
      %436 = arith.select %435, %431, %398 : vector<8x128xi1>, vector<8x128xf32>
      %c0_215 = arith.constant 0 : index
      %c0_216 = arith.constant 0 : index
      %437 = vector.load %arg12[%c0_215, %c0_216] : memref<8x128xf32, #tpu.memory_space<vmem>>, vector<8x128xf32>
      tpu.vector_store %arg12[%c0_215, %c0_216], %436 {strides = array<i32>} : memref<8x128xf32, #tpu.memory_space<vmem>>, vector<8x128xf32>,
      %438 = vector.shape_cast %396 : vector<8x1xi1> to vector<8x1xi1>
      %439 = vector.broadcast %438 : vector<8x1xi1> to vector<8x128xi1>
      %440 = arith.select %439, %433, %397 : vector<8x128xi1>, vector<8x128xf32>
      %c0_217 = arith.constant 0 : index
      %c0_218 = arith.constant 0 : index
      %441 = vector.load %arg11[%c0_217, %c0_218] : memref<8x128xf32, #tpu.memory_space<vmem>>, vector<8x128xf32>
      tpu.vector_store %arg11[%c0_217, %c0_218], %440 {strides = array<i32>} : memref<8x128xf32, #tpu.memory_space<vmem>>, vector<8x128xf32>,
      %cst_219 = arith.constant 0.000000e+00 : f32
      %442 = vector.shape_cast %396 : vector<8x1xi1> to vector<8x1xi1>
      %443 = vector.broadcast %442 : vector<8x1xi1> to vector<8x128xi1>
      %444 = vector.broadcast %cst_219 : f32 to vector<8x128xf32>
      %445 = arith.select %443, %433, %444 : vector<8x128xi1>, vector<8x128xf32>
      %446 = arith.index_cast %c6_i32 : i32 to index
      %c0_220 = arith.constant 0 : index
      %c0_221 = arith.constant 0 : index
      %447 = vector.load %arg7[%446, %c0_220, %c0_221] : memref<8x8x128xf32, #tpu.memory_space<vmem>>, vector<1x8x128xf32>
      %448 = vector.shape_cast %447 : vector<1x8x128xf32> to vector<8x128xf32>
      %449 = vector.shape_cast %445 : vector<8x128xf32> to vector<1x8x128xf32>
      tpu.vector_store %arg7[%446, %c0_220, %c0_221], %449 {strides = array<i32>} : memref<8x8x128xf32, #tpu.memory_space<vmem>>, vector<1x8x128xf32>,
      %c7_i32 = arith.constant 7 : i32
      %450 = arith.index_cast %c7_i32 : i32 to index
      %c0_222 = arith.constant 0 : index
      %c0_223 = arith.constant 0 : index
      %451 = vector.load %arg10[%450, %c0_222, %c0_223] : memref<8x8x512xf32, #tpu.memory_space<vmem>>, vector<1x8x512xf32>
      %452 = vector.shape_cast %451 : vector<1x8x512xf32> to vector<8x512xf32>
      %453 = arith.index_cast %c7_i32 : i32 to index
      %c0_224 = arith.constant 0 : index
      %c0_225 = arith.constant 0 : index
      %454 = vector.load %arg3[%453, %c0_224, %c0_225] : memref<8x8x1xf32, #tpu.memory_space<vmem>>, vector<1x8x1xf32>
      %455 = vector.shape_cast %454 : vector<1x8x1xf32> to vector<8x1xf32>
      %cst_226 = arith.constant 0.000000e+00 : f32
      %456 = vector.broadcast %cst_226 : f32 to vector<8x1xf32>
      %457 = arith.cmpf ogt, %455, %456 : vector<8x1xf32>
      %c0_227 = arith.constant 0 : index
      %c0_228 = arith.constant 0 : index
      %458 = vector.load %arg11[%c0_227, %c0_228] : memref<8x128xf32, #tpu.memory_space<vmem>>, vector<8x128xf32>
      %c0_229 = arith.constant 0 : index
      %c0_230 = arith.constant 0 : index
      %459 = vector.load %arg12[%c0_229, %c0_230] : memref<8x128xf32, #tpu.memory_space<vmem>>, vector<8x128xf32>
      %c0_231 = arith.constant 0 : index
      %c0_232 = arith.constant 0 : index
      %c0_233 = arith.constant 0 : index
      %460 = vector.load %arg5[%c0_231, %c0_232, %c0_233] : memref<1x128x512xf32, #tpu.memory_space<vmem>>, vector<1x128x512xf32>
      %461 = vector.shape_cast %460 : vector<1x128x512xf32> to vector<128x512xf32>
      %cst_234 = arith.constant dense<0.000000e+00> : vector<8x512xf32>
      %462 = tpu.matmul %458, %461, %cst_234 {dimension_numbers = #tpu.dot_dimension_numbers<[1], [0], [0], [1], [0, 0, 1, 1], [], []>} : vector<8x128xf32>, vector<128x512xf32>, vector<8x512xf32> -> vector<8x512xf32>
      %463 = arith.addf %452, %462 : vector<8x512xf32>
      %464 = vector.extract_strided_slice %463 {offsets = [0, 0], sizes = [8, 128], strides = [1, 1]} : vector<8x512xf32> to vector<8x128xf32>
      %cst_235 = arith.constant 5.000000e-01 : f32
      %465 = vector.broadcast %cst_235 : f32 to vector<8x128xf32>
      %466 = arith.mulf %465, %464 : vector<8x128xf32>
      %467 = math.tanh %466 : vector<8x128xf32>
      %cst_236 = arith.constant 5.000000e-01 : f32
      %468 = vector.broadcast %cst_236 : f32 to vector<8x128xf32>
      %469 = arith.mulf %468, %467 : vector<8x128xf32>
      %cst_237 = arith.constant 5.000000e-01 : f32
      %470 = vector.broadcast %cst_237 : f32 to vector<8x128xf32>
      %471 = arith.addf %469, %470 : vector<8x128xf32>
      %472 = vector.extract_strided_slice %463 {offsets = [0, 128], sizes = [8, 128], strides = [1, 1]} : vector<8x512xf32> to vector<8x128xf32>
      %cst_238 = arith.constant 5.000000e-01 : f32
      %473 = vector.broadcast %cst_238 : f32 to vector<8x128xf32>
      %474 = arith.mulf %473, %472 : vector<8x128xf32>
      %475 = math.tanh %474 : vector<8x128xf32>
      %cst_239 = arith.constant 5.000000e-01 : f32
      %476 = vector.broadcast %cst_239 : f32 to vector<8x128xf32>
      %477 = arith.mulf %476, %475 : vector<8x128xf32>
      %cst_240 = arith.constant 5.000000e-01 : f32
      %478 = vector.broadcast %cst_240 : f32 to vector<8x128xf32>
      %479 = arith.addf %477, %478 : vector<8x128xf32>
      %480 = vector.extract_strided_slice %463 {offsets = [0, 256], sizes = [8, 128], strides = [1, 1]} : vector<8x512xf32> to vector<8x128xf32>
      %481 = math.tanh %480 : vector<8x128xf32>
      %482 = vector.extract_strided_slice %463 {offsets = [0, 384], sizes = [8, 128], strides = [1, 1]} : vector<8x512xf32> to vector<8x128xf32>
      %cst_241 = arith.constant 5.000000e-01 : f32
      %483 = vector.broadcast %cst_241 : f32 to vector<8x128xf32>
      %484 = arith.mulf %483, %482 : vector<8x128xf32>
      %485 = math.tanh %484 : vector<8x128xf32>
      %cst_242 = arith.constant 5.000000e-01 : f32
      %486 = vector.broadcast %cst_242 : f32 to vector<8x128xf32>
      %487 = arith.mulf %486, %485 : vector<8x128xf32>
      %cst_243 = arith.constant 5.000000e-01 : f32
      %488 = vector.broadcast %cst_243 : f32 to vector<8x128xf32>
      %489 = arith.addf %487, %488 : vector<8x128xf32>
      %490 = arith.mulf %479, %459 : vector<8x128xf32>
      %491 = arith.mulf %471, %481 : vector<8x128xf32>
      %492 = arith.addf %490, %491 : vector<8x128xf32>
      %493 = math.tanh %492 : vector<8x128xf32>
      %494 = arith.mulf %489, %493 : vector<8x128xf32>
      %495 = vector.shape_cast %457 : vector<8x1xi1> to vector<8x1xi1>
      %496 = vector.broadcast %495 : vector<8x1xi1> to vector<8x128xi1>
      %497 = arith.select %496, %492, %459 : vector<8x128xi1>, vector<8x128xf32>
      %c0_244 = arith.constant 0 : index
      %c0_245 = arith.constant 0 : index
      %498 = vector.load %arg12[%c0_244, %c0_245] : memref<8x128xf32, #tpu.memory_space<vmem>>, vector<8x128xf32>
      tpu.vector_store %arg12[%c0_244, %c0_245], %497 {strides = array<i32>} : memref<8x128xf32, #tpu.memory_space<vmem>>, vector<8x128xf32>,
      %499 = vector.shape_cast %457 : vector<8x1xi1> to vector<8x1xi1>
      %500 = vector.broadcast %499 : vector<8x1xi1> to vector<8x128xi1>
      %501 = arith.select %500, %494, %458 : vector<8x128xi1>, vector<8x128xf32>
      %c0_246 = arith.constant 0 : index
      %c0_247 = arith.constant 0 : index
      %502 = vector.load %arg11[%c0_246, %c0_247] : memref<8x128xf32, #tpu.memory_space<vmem>>, vector<8x128xf32>
      tpu.vector_store %arg11[%c0_246, %c0_247], %501 {strides = array<i32>} : memref<8x128xf32, #tpu.memory_space<vmem>>, vector<8x128xf32>,
      %cst_248 = arith.constant 0.000000e+00 : f32
      %503 = vector.shape_cast %457 : vector<8x1xi1> to vector<8x1xi1>
      %504 = vector.broadcast %503 : vector<8x1xi1> to vector<8x128xi1>
      %505 = vector.broadcast %cst_248 : f32 to vector<8x128xf32>
      %506 = arith.select %504, %494, %505 : vector<8x128xi1>, vector<8x128xf32>
      %507 = arith.index_cast %c7_i32 : i32 to index
      %c0_249 = arith.constant 0 : index
      %c0_250 = arith.constant 0 : index
      %508 = vector.load %arg7[%507, %c0_249, %c0_250] : memref<8x8x128xf32, #tpu.memory_space<vmem>>, vector<1x8x128xf32>
      %509 = vector.shape_cast %508 : vector<1x8x128xf32> to vector<8x128xf32>
      %510 = vector.shape_cast %506 : vector<8x128xf32> to vector<1x8x128xf32>
      tpu.vector_store %arg7[%507, %c0_249, %c0_250], %510 {strides = array<i32>} : memref<8x8x128xf32, #tpu.memory_space<vmem>>, vector<1x8x128xf32>,
      %c8_i32 = arith.constant 8 : i32
    } else {
    }
    %c1_i32 = arith.constant 1 : i32
    %17 = arith.cmpi eq, %arg0, %c1_i32 : i32
    %18 = arith.extui %17 : i1 to i32
    %c0_i32_14 = arith.constant 0 : i32
    %19 = arith.cmpi ne, %18, %c0_i32_14 : i32
    scf.if %19 {
      %c0_i32_17 = arith.constant 0 : i32
      %c7_i32 = arith.constant 7 : i32
      %23 = arith.subi %c7_i32, %c0_i32_17 : i32
      %24 = arith.index_cast %23 : i32 to index
      %c0_18 = arith.constant 0 : index
      %c0_19 = arith.constant 0 : index
      %25 = vector.load %arg10[%24, %c0_18, %c0_19] : memref<8x8x512xf32, #tpu.memory_space<vmem>>, vector<1x8x512xf32>
      %26 = vector.shape_cast %25 : vector<1x8x512xf32> to vector<8x512xf32>
      %27 = arith.index_cast %23 : i32 to index
      %c0_20 = arith.constant 0 : index
      %c0_21 = arith.constant 0 : index
      %28 = vector.load %arg3[%27, %c0_20, %c0_21] : memref<8x8x1xf32, #tpu.memory_space<vmem>>, vector<1x8x1xf32>
      %29 = vector.shape_cast %28 : vector<1x8x1xf32> to vector<8x1xf32>
      %cst_22 = arith.constant 0.000000e+00 : f32
      %30 = vector.broadcast %cst_22 : f32 to vector<8x1xf32>
      %31 = arith.cmpf ogt, %29, %30 : vector<8x1xf32>
      %c0_23 = arith.constant 0 : index
      %c0_24 = arith.constant 0 : index
      %32 = vector.load %arg11[%c0_23, %c0_24] : memref<8x128xf32, #tpu.memory_space<vmem>>, vector<8x128xf32>
      %c0_25 = arith.constant 0 : index
      %c0_26 = arith.constant 0 : index
      %33 = vector.load %arg12[%c0_25, %c0_26] : memref<8x128xf32, #tpu.memory_space<vmem>>, vector<8x128xf32>
      %c0_27 = arith.constant 0 : index
      %c0_28 = arith.constant 0 : index
      %c0_29 = arith.constant 0 : index
      %34 = vector.load %arg5[%c0_27, %c0_28, %c0_29] : memref<1x128x512xf32, #tpu.memory_space<vmem>>, vector<1x128x512xf32>
      %35 = vector.shape_cast %34 : vector<1x128x512xf32> to vector<128x512xf32>
      %cst_30 = arith.constant dense<0.000000e+00> : vector<8x512xf32>
      %36 = tpu.matmul %32, %35, %cst_30 {dimension_numbers = #tpu.dot_dimension_numbers<[1], [0], [0], [1], [0, 0, 1, 1], [], []>} : vector<8x128xf32>, vector<128x512xf32>, vector<8x512xf32> -> vector<8x512xf32>
      %37 = arith.addf %26, %36 : vector<8x512xf32>
      %38 = vector.extract_strided_slice %37 {offsets = [0, 0], sizes = [8, 128], strides = [1, 1]} : vector<8x512xf32> to vector<8x128xf32>
      %cst_31 = arith.constant 5.000000e-01 : f32
      %39 = vector.broadcast %cst_31 : f32 to vector<8x128xf32>
      %40 = arith.mulf %39, %38 : vector<8x128xf32>
      %41 = math.tanh %40 : vector<8x128xf32>
      %cst_32 = arith.constant 5.000000e-01 : f32
      %42 = vector.broadcast %cst_32 : f32 to vector<8x128xf32>
      %43 = arith.mulf %42, %41 : vector<8x128xf32>
      %cst_33 = arith.constant 5.000000e-01 : f32
      %44 = vector.broadcast %cst_33 : f32 to vector<8x128xf32>
      %45 = arith.addf %43, %44 : vector<8x128xf32>
      %46 = vector.extract_strided_slice %37 {offsets = [0, 128], sizes = [8, 128], strides = [1, 1]} : vector<8x512xf32> to vector<8x128xf32>
      %cst_34 = arith.constant 5.000000e-01 : f32
      %47 = vector.broadcast %cst_34 : f32 to vector<8x128xf32>
      %48 = arith.mulf %47, %46 : vector<8x128xf32>
      %49 = math.tanh %48 : vector<8x128xf32>
      %cst_35 = arith.constant 5.000000e-01 : f32
      %50 = vector.broadcast %cst_35 : f32 to vector<8x128xf32>
      %51 = arith.mulf %50, %49 : vector<8x128xf32>
      %cst_36 = arith.constant 5.000000e-01 : f32
      %52 = vector.broadcast %cst_36 : f32 to vector<8x128xf32>
      %53 = arith.addf %51, %52 : vector<8x128xf32>
      %54 = vector.extract_strided_slice %37 {offsets = [0, 256], sizes = [8, 128], strides = [1, 1]} : vector<8x512xf32> to vector<8x128xf32>
      %55 = math.tanh %54 : vector<8x128xf32>
      %56 = vector.extract_strided_slice %37 {offsets = [0, 384], sizes = [8, 128], strides = [1, 1]} : vector<8x512xf32> to vector<8x128xf32>
      %cst_37 = arith.constant 5.000000e-01 : f32
      %57 = vector.broadcast %cst_37 : f32 to vector<8x128xf32>
      %58 = arith.mulf %57, %56 : vector<8x128xf32>
      %59 = math.tanh %58 : vector<8x128xf32>
      %cst_38 = arith.constant 5.000000e-01 : f32
      %60 = vector.broadcast %cst_38 : f32 to vector<8x128xf32>
      %61 = arith.mulf %60, %59 : vector<8x128xf32>
      %cst_39 = arith.constant 5.000000e-01 : f32
      %62 = vector.broadcast %cst_39 : f32 to vector<8x128xf32>
      %63 = arith.addf %61, %62 : vector<8x128xf32>
      %64 = arith.mulf %53, %33 : vector<8x128xf32>
      %65 = arith.mulf %45, %55 : vector<8x128xf32>
      %66 = arith.addf %64, %65 : vector<8x128xf32>
      %67 = math.tanh %66 : vector<8x128xf32>
      %68 = arith.mulf %63, %67 : vector<8x128xf32>
      %69 = vector.shape_cast %31 : vector<8x1xi1> to vector<8x1xi1>
      %70 = vector.broadcast %69 : vector<8x1xi1> to vector<8x128xi1>
      %71 = arith.select %70, %66, %33 : vector<8x128xi1>, vector<8x128xf32>
      %c0_40 = arith.constant 0 : index
      %c0_41 = arith.constant 0 : index
      %72 = vector.load %arg12[%c0_40, %c0_41] : memref<8x128xf32, #tpu.memory_space<vmem>>, vector<8x128xf32>
      tpu.vector_store %arg12[%c0_40, %c0_41], %71 {strides = array<i32>} : memref<8x128xf32, #tpu.memory_space<vmem>>, vector<8x128xf32>,
      %73 = vector.shape_cast %31 : vector<8x1xi1> to vector<8x1xi1>
      %74 = vector.broadcast %73 : vector<8x1xi1> to vector<8x128xi1>
      %75 = arith.select %74, %68, %32 : vector<8x128xi1>, vector<8x128xf32>
      %c0_42 = arith.constant 0 : index
      %c0_43 = arith.constant 0 : index
      %76 = vector.load %arg11[%c0_42, %c0_43] : memref<8x128xf32, #tpu.memory_space<vmem>>, vector<8x128xf32>
      tpu.vector_store %arg11[%c0_42, %c0_43], %75 {strides = array<i32>} : memref<8x128xf32, #tpu.memory_space<vmem>>, vector<8x128xf32>,
      %cst_44 = arith.constant 0.000000e+00 : f32
      %77 = vector.shape_cast %31 : vector<8x1xi1> to vector<8x1xi1>
      %78 = vector.broadcast %77 : vector<8x1xi1> to vector<8x128xi1>
      %79 = vector.broadcast %cst_44 : f32 to vector<8x128xf32>
      %80 = arith.select %78, %68, %79 : vector<8x128xi1>, vector<8x128xf32>
      %81 = arith.index_cast %23 : i32 to index
      %c0_45 = arith.constant 0 : index
      %c0_46 = arith.constant 0 : index
      %82 = vector.load %arg7[%81, %c0_45, %c0_46] : memref<8x8x128xf32, #tpu.memory_space<vmem>>, vector<1x8x128xf32>
      %83 = vector.shape_cast %82 : vector<1x8x128xf32> to vector<8x128xf32>
      %84 = vector.shape_cast %80 : vector<8x128xf32> to vector<1x8x128xf32>
      tpu.vector_store %arg7[%81, %c0_45, %c0_46], %84 {strides = array<i32>} : memref<8x8x128xf32, #tpu.memory_space<vmem>>, vector<1x8x128xf32>,
      %c1_i32_47 = arith.constant 1 : i32
      %c7_i32_48 = arith.constant 7 : i32
      %85 = arith.subi %c7_i32_48, %c1_i32_47 : i32
      %86 = arith.index_cast %85 : i32 to index
      %c0_49 = arith.constant 0 : index
      %c0_50 = arith.constant 0 : index
      %87 = vector.load %arg10[%86, %c0_49, %c0_50] : memref<8x8x512xf32, #tpu.memory_space<vmem>>, vector<1x8x512xf32>
      %88 = vector.shape_cast %87 : vector<1x8x512xf32> to vector<8x512xf32>
      %89 = arith.index_cast %85 : i32 to index
      %c0_51 = arith.constant 0 : index
      %c0_52 = arith.constant 0 : index
      %90 = vector.load %arg3[%89, %c0_51, %c0_52] : memref<8x8x1xf32, #tpu.memory_space<vmem>>, vector<1x8x1xf32>
      %91 = vector.shape_cast %90 : vector<1x8x1xf32> to vector<8x1xf32>
      %cst_53 = arith.constant 0.000000e+00 : f32
      %92 = vector.broadcast %cst_53 : f32 to vector<8x1xf32>
      %93 = arith.cmpf ogt, %91, %92 : vector<8x1xf32>
      %c0_54 = arith.constant 0 : index
      %c0_55 = arith.constant 0 : index
      %94 = vector.load %arg11[%c0_54, %c0_55] : memref<8x128xf32, #tpu.memory_space<vmem>>, vector<8x128xf32>
      %c0_56 = arith.constant 0 : index
      %c0_57 = arith.constant 0 : index
      %95 = vector.load %arg12[%c0_56, %c0_57] : memref<8x128xf32, #tpu.memory_space<vmem>>, vector<8x128xf32>
      %c0_58 = arith.constant 0 : index
      %c0_59 = arith.constant 0 : index
      %c0_60 = arith.constant 0 : index
      %96 = vector.load %arg5[%c0_58, %c0_59, %c0_60] : memref<1x128x512xf32, #tpu.memory_space<vmem>>, vector<1x128x512xf32>
      %97 = vector.shape_cast %96 : vector<1x128x512xf32> to vector<128x512xf32>
      %cst_61 = arith.constant dense<0.000000e+00> : vector<8x512xf32>
      %98 = tpu.matmul %94, %97, %cst_61 {dimension_numbers = #tpu.dot_dimension_numbers<[1], [0], [0], [1], [0, 0, 1, 1], [], []>} : vector<8x128xf32>, vector<128x512xf32>, vector<8x512xf32> -> vector<8x512xf32>
      %99 = arith.addf %88, %98 : vector<8x512xf32>
      %100 = vector.extract_strided_slice %99 {offsets = [0, 0], sizes = [8, 128], strides = [1, 1]} : vector<8x512xf32> to vector<8x128xf32>
      %cst_62 = arith.constant 5.000000e-01 : f32
      %101 = vector.broadcast %cst_62 : f32 to vector<8x128xf32>
      %102 = arith.mulf %101, %100 : vector<8x128xf32>
      %103 = math.tanh %102 : vector<8x128xf32>
      %cst_63 = arith.constant 5.000000e-01 : f32
      %104 = vector.broadcast %cst_63 : f32 to vector<8x128xf32>
      %105 = arith.mulf %104, %103 : vector<8x128xf32>
      %cst_64 = arith.constant 5.000000e-01 : f32
      %106 = vector.broadcast %cst_64 : f32 to vector<8x128xf32>
      %107 = arith.addf %105, %106 : vector<8x128xf32>
      %108 = vector.extract_strided_slice %99 {offsets = [0, 128], sizes = [8, 128], strides = [1, 1]} : vector<8x512xf32> to vector<8x128xf32>
      %cst_65 = arith.constant 5.000000e-01 : f32
      %109 = vector.broadcast %cst_65 : f32 to vector<8x128xf32>
      %110 = arith.mulf %109, %108 : vector<8x128xf32>
      %111 = math.tanh %110 : vector<8x128xf32>
      %cst_66 = arith.constant 5.000000e-01 : f32
      %112 = vector.broadcast %cst_66 : f32 to vector<8x128xf32>
      %113 = arith.mulf %112, %111 : vector<8x128xf32>
      %cst_67 = arith.constant 5.000000e-01 : f32
      %114 = vector.broadcast %cst_67 : f32 to vector<8x128xf32>
      %115 = arith.addf %113, %114 : vector<8x128xf32>
      %116 = vector.extract_strided_slice %99 {offsets = [0, 256], sizes = [8, 128], strides = [1, 1]} : vector<8x512xf32> to vector<8x128xf32>
      %117 = math.tanh %116 : vector<8x128xf32>
      %118 = vector.extract_strided_slice %99 {offsets = [0, 384], sizes = [8, 128], strides = [1, 1]} : vector<8x512xf32> to vector<8x128xf32>
      %cst_68 = arith.constant 5.000000e-01 : f32
      %119 = vector.broadcast %cst_68 : f32 to vector<8x128xf32>
      %120 = arith.mulf %119, %118 : vector<8x128xf32>
      %121 = math.tanh %120 : vector<8x128xf32>
      %cst_69 = arith.constant 5.000000e-01 : f32
      %122 = vector.broadcast %cst_69 : f32 to vector<8x128xf32>
      %123 = arith.mulf %122, %121 : vector<8x128xf32>
      %cst_70 = arith.constant 5.000000e-01 : f32
      %124 = vector.broadcast %cst_70 : f32 to vector<8x128xf32>
      %125 = arith.addf %123, %124 : vector<8x128xf32>
      %126 = arith.mulf %115, %95 : vector<8x128xf32>
      %127 = arith.mulf %107, %117 : vector<8x128xf32>
      %128 = arith.addf %126, %127 : vector<8x128xf32>
      %129 = math.tanh %128 : vector<8x128xf32>
      %130 = arith.mulf %125, %129 : vector<8x128xf32>
      %131 = vector.shape_cast %93 : vector<8x1xi1> to vector<8x1xi1>
      %132 = vector.broadcast %131 : vector<8x1xi1> to vector<8x128xi1>
      %133 = arith.select %132, %128, %95 : vector<8x128xi1>, vector<8x128xf32>
      %c0_71 = arith.constant 0 : index
      %c0_72 = arith.constant 0 : index
      %134 = vector.load %arg12[%c0_71, %c0_72] : memref<8x128xf32, #tpu.memory_space<vmem>>, vector<8x128xf32>
      tpu.vector_store %arg12[%c0_71, %c0_72], %133 {strides = array<i32>} : memref<8x128xf32, #tpu.memory_space<vmem>>, vector<8x128xf32>,
      %135 = vector.shape_cast %93 : vector<8x1xi1> to vector<8x1xi1>
      %136 = vector.broadcast %135 : vector<8x1xi1> to vector<8x128xi1>
      %137 = arith.select %136, %130, %94 : vector<8x128xi1>, vector<8x128xf32>
      %c0_73 = arith.constant 0 : index
      %c0_74 = arith.constant 0 : index
      %138 = vector.load %arg11[%c0_73, %c0_74] : memref<8x128xf32, #tpu.memory_space<vmem>>, vector<8x128xf32>
      tpu.vector_store %arg11[%c0_73, %c0_74], %137 {strides = array<i32>} : memref<8x128xf32, #tpu.memory_space<vmem>>, vector<8x128xf32>,
      %cst_75 = arith.constant 0.000000e+00 : f32
      %139 = vector.shape_cast %93 : vector<8x1xi1> to vector<8x1xi1>
      %140 = vector.broadcast %139 : vector<8x1xi1> to vector<8x128xi1>
      %141 = vector.broadcast %cst_75 : f32 to vector<8x128xf32>
      %142 = arith.select %140, %130, %141 : vector<8x128xi1>, vector<8x128xf32>
      %143 = arith.index_cast %85 : i32 to index
      %c0_76 = arith.constant 0 : index
      %c0_77 = arith.constant 0 : index
      %144 = vector.load %arg7[%143, %c0_76, %c0_77] : memref<8x8x128xf32, #tpu.memory_space<vmem>>, vector<1x8x128xf32>
      %145 = vector.shape_cast %144 : vector<1x8x128xf32> to vector<8x128xf32>
      %146 = vector.shape_cast %142 : vector<8x128xf32> to vector<1x8x128xf32>
      tpu.vector_store %arg7[%143, %c0_76, %c0_77], %146 {strides = array<i32>} : memref<8x8x128xf32, #tpu.memory_space<vmem>>, vector<1x8x128xf32>,
      %c2_i32 = arith.constant 2 : i32
      %c7_i32_78 = arith.constant 7 : i32
      %147 = arith.subi %c7_i32_78, %c2_i32 : i32
      %148 = arith.index_cast %147 : i32 to index
      %c0_79 = arith.constant 0 : index
      %c0_80 = arith.constant 0 : index
      %149 = vector.load %arg10[%148, %c0_79, %c0_80] : memref<8x8x512xf32, #tpu.memory_space<vmem>>, vector<1x8x512xf32>
      %150 = vector.shape_cast %149 : vector<1x8x512xf32> to vector<8x512xf32>
      %151 = arith.index_cast %147 : i32 to index
      %c0_81 = arith.constant 0 : index
      %c0_82 = arith.constant 0 : index
      %152 = vector.load %arg3[%151, %c0_81, %c0_82] : memref<8x8x1xf32, #tpu.memory_space<vmem>>, vector<1x8x1xf32>
      %153 = vector.shape_cast %152 : vector<1x8x1xf32> to vector<8x1xf32>
      %cst_83 = arith.constant 0.000000e+00 : f32
      %154 = vector.broadcast %cst_83 : f32 to vector<8x1xf32>
      %155 = arith.cmpf ogt, %153, %154 : vector<8x1xf32>
      %c0_84 = arith.constant 0 : index
      %c0_85 = arith.constant 0 : index
      %156 = vector.load %arg11[%c0_84, %c0_85] : memref<8x128xf32, #tpu.memory_space<vmem>>, vector<8x128xf32>
      %c0_86 = arith.constant 0 : index
      %c0_87 = arith.constant 0 : index
      %157 = vector.load %arg12[%c0_86, %c0_87] : memref<8x128xf32, #tpu.memory_space<vmem>>, vector<8x128xf32>
      %c0_88 = arith.constant 0 : index
      %c0_89 = arith.constant 0 : index
      %c0_90 = arith.constant 0 : index
      %158 = vector.load %arg5[%c0_88, %c0_89, %c0_90] : memref<1x128x512xf32, #tpu.memory_space<vmem>>, vector<1x128x512xf32>
      %159 = vector.shape_cast %158 : vector<1x128x512xf32> to vector<128x512xf32>
      %cst_91 = arith.constant dense<0.000000e+00> : vector<8x512xf32>
      %160 = tpu.matmul %156, %159, %cst_91 {dimension_numbers = #tpu.dot_dimension_numbers<[1], [0], [0], [1], [0, 0, 1, 1], [], []>} : vector<8x128xf32>, vector<128x512xf32>, vector<8x512xf32> -> vector<8x512xf32>
      %161 = arith.addf %150, %160 : vector<8x512xf32>
      %162 = vector.extract_strided_slice %161 {offsets = [0, 0], sizes = [8, 128], strides = [1, 1]} : vector<8x512xf32> to vector<8x128xf32>
      %cst_92 = arith.constant 5.000000e-01 : f32
      %163 = vector.broadcast %cst_92 : f32 to vector<8x128xf32>
      %164 = arith.mulf %163, %162 : vector<8x128xf32>
      %165 = math.tanh %164 : vector<8x128xf32>
      %cst_93 = arith.constant 5.000000e-01 : f32
      %166 = vector.broadcast %cst_93 : f32 to vector<8x128xf32>
      %167 = arith.mulf %166, %165 : vector<8x128xf32>
      %cst_94 = arith.constant 5.000000e-01 : f32
      %168 = vector.broadcast %cst_94 : f32 to vector<8x128xf32>
      %169 = arith.addf %167, %168 : vector<8x128xf32>
      %170 = vector.extract_strided_slice %161 {offsets = [0, 128], sizes = [8, 128], strides = [1, 1]} : vector<8x512xf32> to vector<8x128xf32>
      %cst_95 = arith.constant 5.000000e-01 : f32
      %171 = vector.broadcast %cst_95 : f32 to vector<8x128xf32>
      %172 = arith.mulf %171, %170 : vector<8x128xf32>
      %173 = math.tanh %172 : vector<8x128xf32>
      %cst_96 = arith.constant 5.000000e-01 : f32
      %174 = vector.broadcast %cst_96 : f32 to vector<8x128xf32>
      %175 = arith.mulf %174, %173 : vector<8x128xf32>
      %cst_97 = arith.constant 5.000000e-01 : f32
      %176 = vector.broadcast %cst_97 : f32 to vector<8x128xf32>
      %177 = arith.addf %175, %176 : vector<8x128xf32>
      %178 = vector.extract_strided_slice %161 {offsets = [0, 256], sizes = [8, 128], strides = [1, 1]} : vector<8x512xf32> to vector<8x128xf32>
      %179 = math.tanh %178 : vector<8x128xf32>
      %180 = vector.extract_strided_slice %161 {offsets = [0, 384], sizes = [8, 128], strides = [1, 1]} : vector<8x512xf32> to vector<8x128xf32>
      %cst_98 = arith.constant 5.000000e-01 : f32
      %181 = vector.broadcast %cst_98 : f32 to vector<8x128xf32>
      %182 = arith.mulf %181, %180 : vector<8x128xf32>
      %183 = math.tanh %182 : vector<8x128xf32>
      %cst_99 = arith.constant 5.000000e-01 : f32
      %184 = vector.broadcast %cst_99 : f32 to vector<8x128xf32>
      %185 = arith.mulf %184, %183 : vector<8x128xf32>
      %cst_100 = arith.constant 5.000000e-01 : f32
      %186 = vector.broadcast %cst_100 : f32 to vector<8x128xf32>
      %187 = arith.addf %185, %186 : vector<8x128xf32>
      %188 = arith.mulf %177, %157 : vector<8x128xf32>
      %189 = arith.mulf %169, %179 : vector<8x128xf32>
      %190 = arith.addf %188, %189 : vector<8x128xf32>
      %191 = math.tanh %190 : vector<8x128xf32>
      %192 = arith.mulf %187, %191 : vector<8x128xf32>
      %193 = vector.shape_cast %155 : vector<8x1xi1> to vector<8x1xi1>
      %194 = vector.broadcast %193 : vector<8x1xi1> to vector<8x128xi1>
      %195 = arith.select %194, %190, %157 : vector<8x128xi1>, vector<8x128xf32>
      %c0_101 = arith.constant 0 : index
      %c0_102 = arith.constant 0 : index
      %196 = vector.load %arg12[%c0_101, %c0_102] : memref<8x128xf32, #tpu.memory_space<vmem>>, vector<8x128xf32>
      tpu.vector_store %arg12[%c0_101, %c0_102], %195 {strides = array<i32>} : memref<8x128xf32, #tpu.memory_space<vmem>>, vector<8x128xf32>,
      %197 = vector.shape_cast %155 : vector<8x1xi1> to vector<8x1xi1>
      %198 = vector.broadcast %197 : vector<8x1xi1> to vector<8x128xi1>
      %199 = arith.select %198, %192, %156 : vector<8x128xi1>, vector<8x128xf32>
      %c0_103 = arith.constant 0 : index
      %c0_104 = arith.constant 0 : index
      %200 = vector.load %arg11[%c0_103, %c0_104] : memref<8x128xf32, #tpu.memory_space<vmem>>, vector<8x128xf32>
      tpu.vector_store %arg11[%c0_103, %c0_104], %199 {strides = array<i32>} : memref<8x128xf32, #tpu.memory_space<vmem>>, vector<8x128xf32>,
      %cst_105 = arith.constant 0.000000e+00 : f32
      %201 = vector.shape_cast %155 : vector<8x1xi1> to vector<8x1xi1>
      %202 = vector.broadcast %201 : vector<8x1xi1> to vector<8x128xi1>
      %203 = vector.broadcast %cst_105 : f32 to vector<8x128xf32>
      %204 = arith.select %202, %192, %203 : vector<8x128xi1>, vector<8x128xf32>
      %205 = arith.index_cast %147 : i32 to index
      %c0_106 = arith.constant 0 : index
      %c0_107 = arith.constant 0 : index
      %206 = vector.load %arg7[%205, %c0_106, %c0_107] : memref<8x8x128xf32, #tpu.memory_space<vmem>>, vector<1x8x128xf32>
      %207 = vector.shape_cast %206 : vector<1x8x128xf32> to vector<8x128xf32>
      %208 = vector.shape_cast %204 : vector<8x128xf32> to vector<1x8x128xf32>
      tpu.vector_store %arg7[%205, %c0_106, %c0_107], %208 {strides = array<i32>} : memref<8x8x128xf32, #tpu.memory_space<vmem>>, vector<1x8x128xf32>,
      %c3_i32 = arith.constant 3 : i32
      %c7_i32_108 = arith.constant 7 : i32
      %209 = arith.subi %c7_i32_108, %c3_i32 : i32
      %210 = arith.index_cast %209 : i32 to index
      %c0_109 = arith.constant 0 : index
      %c0_110 = arith.constant 0 : index
      %211 = vector.load %arg10[%210, %c0_109, %c0_110] : memref<8x8x512xf32, #tpu.memory_space<vmem>>, vector<1x8x512xf32>
      %212 = vector.shape_cast %211 : vector<1x8x512xf32> to vector<8x512xf32>
      %213 = arith.index_cast %209 : i32 to index
      %c0_111 = arith.constant 0 : index
      %c0_112 = arith.constant 0 : index
      %214 = vector.load %arg3[%213, %c0_111, %c0_112] : memref<8x8x1xf32, #tpu.memory_space<vmem>>, vector<1x8x1xf32>
      %215 = vector.shape_cast %214 : vector<1x8x1xf32> to vector<8x1xf32>
      %cst_113 = arith.constant 0.000000e+00 : f32
      %216 = vector.broadcast %cst_113 : f32 to vector<8x1xf32>
      %217 = arith.cmpf ogt, %215, %216 : vector<8x1xf32>
      %c0_114 = arith.constant 0 : index
      %c0_115 = arith.constant 0 : index
      %218 = vector.load %arg11[%c0_114, %c0_115] : memref<8x128xf32, #tpu.memory_space<vmem>>, vector<8x128xf32>
      %c0_116 = arith.constant 0 : index
      %c0_117 = arith.constant 0 : index
      %219 = vector.load %arg12[%c0_116, %c0_117] : memref<8x128xf32, #tpu.memory_space<vmem>>, vector<8x128xf32>
      %c0_118 = arith.constant 0 : index
      %c0_119 = arith.constant 0 : index
      %c0_120 = arith.constant 0 : index
      %220 = vector.load %arg5[%c0_118, %c0_119, %c0_120] : memref<1x128x512xf32, #tpu.memory_space<vmem>>, vector<1x128x512xf32>
      %221 = vector.shape_cast %220 : vector<1x128x512xf32> to vector<128x512xf32>
      %cst_121 = arith.constant dense<0.000000e+00> : vector<8x512xf32>
      %222 = tpu.matmul %218, %221, %cst_121 {dimension_numbers = #tpu.dot_dimension_numbers<[1], [0], [0], [1], [0, 0, 1, 1], [], []>} : vector<8x128xf32>, vector<128x512xf32>, vector<8x512xf32> -> vector<8x512xf32>
      %223 = arith.addf %212, %222 : vector<8x512xf32>
      %224 = vector.extract_strided_slice %223 {offsets = [0, 0], sizes = [8, 128], strides = [1, 1]} : vector<8x512xf32> to vector<8x128xf32>
      %cst_122 = arith.constant 5.000000e-01 : f32
      %225 = vector.broadcast %cst_122 : f32 to vector<8x128xf32>
      %226 = arith.mulf %225, %224 : vector<8x128xf32>
      %227 = math.tanh %226 : vector<8x128xf32>
      %cst_123 = arith.constant 5.000000e-01 : f32
      %228 = vector.broadcast %cst_123 : f32 to vector<8x128xf32>
      %229 = arith.mulf %228, %227 : vector<8x128xf32>
      %cst_124 = arith.constant 5.000000e-01 : f32
      %230 = vector.broadcast %cst_124 : f32 to vector<8x128xf32>
      %231 = arith.addf %229, %230 : vector<8x128xf32>
      %232 = vector.extract_strided_slice %223 {offsets = [0, 128], sizes = [8, 128], strides = [1, 1]} : vector<8x512xf32> to vector<8x128xf32>
      %cst_125 = arith.constant 5.000000e-01 : f32
      %233 = vector.broadcast %cst_125 : f32 to vector<8x128xf32>
      %234 = arith.mulf %233, %232 : vector<8x128xf32>
      %235 = math.tanh %234 : vector<8x128xf32>
      %cst_126 = arith.constant 5.000000e-01 : f32
      %236 = vector.broadcast %cst_126 : f32 to vector<8x128xf32>
      %237 = arith.mulf %236, %235 : vector<8x128xf32>
      %cst_127 = arith.constant 5.000000e-01 : f32
      %238 = vector.broadcast %cst_127 : f32 to vector<8x128xf32>
      %239 = arith.addf %237, %238 : vector<8x128xf32>
      %240 = vector.extract_strided_slice %223 {offsets = [0, 256], sizes = [8, 128], strides = [1, 1]} : vector<8x512xf32> to vector<8x128xf32>
      %241 = math.tanh %240 : vector<8x128xf32>
      %242 = vector.extract_strided_slice %223 {offsets = [0, 384], sizes = [8, 128], strides = [1, 1]} : vector<8x512xf32> to vector<8x128xf32>
      %cst_128 = arith.constant 5.000000e-01 : f32
      %243 = vector.broadcast %cst_128 : f32 to vector<8x128xf32>
      %244 = arith.mulf %243, %242 : vector<8x128xf32>
      %245 = math.tanh %244 : vector<8x128xf32>
      %cst_129 = arith.constant 5.000000e-01 : f32
      %246 = vector.broadcast %cst_129 : f32 to vector<8x128xf32>
      %247 = arith.mulf %246, %245 : vector<8x128xf32>
      %cst_130 = arith.constant 5.000000e-01 : f32
      %248 = vector.broadcast %cst_130 : f32 to vector<8x128xf32>
      %249 = arith.addf %247, %248 : vector<8x128xf32>
      %250 = arith.mulf %239, %219 : vector<8x128xf32>
      %251 = arith.mulf %231, %241 : vector<8x128xf32>
      %252 = arith.addf %250, %251 : vector<8x128xf32>
      %253 = math.tanh %252 : vector<8x128xf32>
      %254 = arith.mulf %249, %253 : vector<8x128xf32>
      %255 = vector.shape_cast %217 : vector<8x1xi1> to vector<8x1xi1>
      %256 = vector.broadcast %255 : vector<8x1xi1> to vector<8x128xi1>
      %257 = arith.select %256, %252, %219 : vector<8x128xi1>, vector<8x128xf32>
      %c0_131 = arith.constant 0 : index
      %c0_132 = arith.constant 0 : index
      %258 = vector.load %arg12[%c0_131, %c0_132] : memref<8x128xf32, #tpu.memory_space<vmem>>, vector<8x128xf32>
      tpu.vector_store %arg12[%c0_131, %c0_132], %257 {strides = array<i32>} : memref<8x128xf32, #tpu.memory_space<vmem>>, vector<8x128xf32>,
      %259 = vector.shape_cast %217 : vector<8x1xi1> to vector<8x1xi1>
      %260 = vector.broadcast %259 : vector<8x1xi1> to vector<8x128xi1>
      %261 = arith.select %260, %254, %218 : vector<8x128xi1>, vector<8x128xf32>
      %c0_133 = arith.constant 0 : index
      %c0_134 = arith.constant 0 : index
      %262 = vector.load %arg11[%c0_133, %c0_134] : memref<8x128xf32, #tpu.memory_space<vmem>>, vector<8x128xf32>
      tpu.vector_store %arg11[%c0_133, %c0_134], %261 {strides = array<i32>} : memref<8x128xf32, #tpu.memory_space<vmem>>, vector<8x128xf32>,
      %cst_135 = arith.constant 0.000000e+00 : f32
      %263 = vector.shape_cast %217 : vector<8x1xi1> to vector<8x1xi1>
      %264 = vector.broadcast %263 : vector<8x1xi1> to vector<8x128xi1>
      %265 = vector.broadcast %cst_135 : f32 to vector<8x128xf32>
      %266 = arith.select %264, %254, %265 : vector<8x128xi1>, vector<8x128xf32>
      %267 = arith.index_cast %209 : i32 to index
      %c0_136 = arith.constant 0 : index
      %c0_137 = arith.constant 0 : index
      %268 = vector.load %arg7[%267, %c0_136, %c0_137] : memref<8x8x128xf32, #tpu.memory_space<vmem>>, vector<1x8x128xf32>
      %269 = vector.shape_cast %268 : vector<1x8x128xf32> to vector<8x128xf32>
      %270 = vector.shape_cast %266 : vector<8x128xf32> to vector<1x8x128xf32>
      tpu.vector_store %arg7[%267, %c0_136, %c0_137], %270 {strides = array<i32>} : memref<8x8x128xf32, #tpu.memory_space<vmem>>, vector<1x8x128xf32>,
      %c4_i32 = arith.constant 4 : i32
      %c7_i32_138 = arith.constant 7 : i32
      %271 = arith.subi %c7_i32_138, %c4_i32 : i32
      %272 = arith.index_cast %271 : i32 to index
      %c0_139 = arith.constant 0 : index
      %c0_140 = arith.constant 0 : index
      %273 = vector.load %arg10[%272, %c0_139, %c0_140] : memref<8x8x512xf32, #tpu.memory_space<vmem>>, vector<1x8x512xf32>
      %274 = vector.shape_cast %273 : vector<1x8x512xf32> to vector<8x512xf32>
      %275 = arith.index_cast %271 : i32 to index
      %c0_141 = arith.constant 0 : index
      %c0_142 = arith.constant 0 : index
      %276 = vector.load %arg3[%275, %c0_141, %c0_142] : memref<8x8x1xf32, #tpu.memory_space<vmem>>, vector<1x8x1xf32>
      %277 = vector.shape_cast %276 : vector<1x8x1xf32> to vector<8x1xf32>
      %cst_143 = arith.constant 0.000000e+00 : f32
      %278 = vector.broadcast %cst_143 : f32 to vector<8x1xf32>
      %279 = arith.cmpf ogt, %277, %278 : vector<8x1xf32>
      %c0_144 = arith.constant 0 : index
      %c0_145 = arith.constant 0 : index
      %280 = vector.load %arg11[%c0_144, %c0_145] : memref<8x128xf32, #tpu.memory_space<vmem>>, vector<8x128xf32>
      %c0_146 = arith.constant 0 : index
      %c0_147 = arith.constant 0 : index
      %281 = vector.load %arg12[%c0_146, %c0_147] : memref<8x128xf32, #tpu.memory_space<vmem>>, vector<8x128xf32>
      %c0_148 = arith.constant 0 : index
      %c0_149 = arith.constant 0 : index
      %c0_150 = arith.constant 0 : index
      %282 = vector.load %arg5[%c0_148, %c0_149, %c0_150] : memref<1x128x512xf32, #tpu.memory_space<vmem>>, vector<1x128x512xf32>
      %283 = vector.shape_cast %282 : vector<1x128x512xf32> to vector<128x512xf32>
      %cst_151 = arith.constant dense<0.000000e+00> : vector<8x512xf32>
      %284 = tpu.matmul %280, %283, %cst_151 {dimension_numbers = #tpu.dot_dimension_numbers<[1], [0], [0], [1], [0, 0, 1, 1], [], []>} : vector<8x128xf32>, vector<128x512xf32>, vector<8x512xf32> -> vector<8x512xf32>
      %285 = arith.addf %274, %284 : vector<8x512xf32>
      %286 = vector.extract_strided_slice %285 {offsets = [0, 0], sizes = [8, 128], strides = [1, 1]} : vector<8x512xf32> to vector<8x128xf32>
      %cst_152 = arith.constant 5.000000e-01 : f32
      %287 = vector.broadcast %cst_152 : f32 to vector<8x128xf32>
      %288 = arith.mulf %287, %286 : vector<8x128xf32>
      %289 = math.tanh %288 : vector<8x128xf32>
      %cst_153 = arith.constant 5.000000e-01 : f32
      %290 = vector.broadcast %cst_153 : f32 to vector<8x128xf32>
      %291 = arith.mulf %290, %289 : vector<8x128xf32>
      %cst_154 = arith.constant 5.000000e-01 : f32
      %292 = vector.broadcast %cst_154 : f32 to vector<8x128xf32>
      %293 = arith.addf %291, %292 : vector<8x128xf32>
      %294 = vector.extract_strided_slice %285 {offsets = [0, 128], sizes = [8, 128], strides = [1, 1]} : vector<8x512xf32> to vector<8x128xf32>
      %cst_155 = arith.constant 5.000000e-01 : f32
      %295 = vector.broadcast %cst_155 : f32 to vector<8x128xf32>
      %296 = arith.mulf %295, %294 : vector<8x128xf32>
      %297 = math.tanh %296 : vector<8x128xf32>
      %cst_156 = arith.constant 5.000000e-01 : f32
      %298 = vector.broadcast %cst_156 : f32 to vector<8x128xf32>
      %299 = arith.mulf %298, %297 : vector<8x128xf32>
      %cst_157 = arith.constant 5.000000e-01 : f32
      %300 = vector.broadcast %cst_157 : f32 to vector<8x128xf32>
      %301 = arith.addf %299, %300 : vector<8x128xf32>
      %302 = vector.extract_strided_slice %285 {offsets = [0, 256], sizes = [8, 128], strides = [1, 1]} : vector<8x512xf32> to vector<8x128xf32>
      %303 = math.tanh %302 : vector<8x128xf32>
      %304 = vector.extract_strided_slice %285 {offsets = [0, 384], sizes = [8, 128], strides = [1, 1]} : vector<8x512xf32> to vector<8x128xf32>
      %cst_158 = arith.constant 5.000000e-01 : f32
      %305 = vector.broadcast %cst_158 : f32 to vector<8x128xf32>
      %306 = arith.mulf %305, %304 : vector<8x128xf32>
      %307 = math.tanh %306 : vector<8x128xf32>
      %cst_159 = arith.constant 5.000000e-01 : f32
      %308 = vector.broadcast %cst_159 : f32 to vector<8x128xf32>
      %309 = arith.mulf %308, %307 : vector<8x128xf32>
      %cst_160 = arith.constant 5.000000e-01 : f32
      %310 = vector.broadcast %cst_160 : f32 to vector<8x128xf32>
      %311 = arith.addf %309, %310 : vector<8x128xf32>
      %312 = arith.mulf %301, %281 : vector<8x128xf32>
      %313 = arith.mulf %293, %303 : vector<8x128xf32>
      %314 = arith.addf %312, %313 : vector<8x128xf32>
      %315 = math.tanh %314 : vector<8x128xf32>
      %316 = arith.mulf %311, %315 : vector<8x128xf32>
      %317 = vector.shape_cast %279 : vector<8x1xi1> to vector<8x1xi1>
      %318 = vector.broadcast %317 : vector<8x1xi1> to vector<8x128xi1>
      %319 = arith.select %318, %314, %281 : vector<8x128xi1>, vector<8x128xf32>
      %c0_161 = arith.constant 0 : index
      %c0_162 = arith.constant 0 : index
      %320 = vector.load %arg12[%c0_161, %c0_162] : memref<8x128xf32, #tpu.memory_space<vmem>>, vector<8x128xf32>
      tpu.vector_store %arg12[%c0_161, %c0_162], %319 {strides = array<i32>} : memref<8x128xf32, #tpu.memory_space<vmem>>, vector<8x128xf32>,
      %321 = vector.shape_cast %279 : vector<8x1xi1> to vector<8x1xi1>
      %322 = vector.broadcast %321 : vector<8x1xi1> to vector<8x128xi1>
      %323 = arith.select %322, %316, %280 : vector<8x128xi1>, vector<8x128xf32>
      %c0_163 = arith.constant 0 : index
      %c0_164 = arith.constant 0 : index
      %324 = vector.load %arg11[%c0_163, %c0_164] : memref<8x128xf32, #tpu.memory_space<vmem>>, vector<8x128xf32>
      tpu.vector_store %arg11[%c0_163, %c0_164], %323 {strides = array<i32>} : memref<8x128xf32, #tpu.memory_space<vmem>>, vector<8x128xf32>,
      %cst_165 = arith.constant 0.000000e+00 : f32
      %325 = vector.shape_cast %279 : vector<8x1xi1> to vector<8x1xi1>
      %326 = vector.broadcast %325 : vector<8x1xi1> to vector<8x128xi1>
      %327 = vector.broadcast %cst_165 : f32 to vector<8x128xf32>
      %328 = arith.select %326, %316, %327 : vector<8x128xi1>, vector<8x128xf32>
      %329 = arith.index_cast %271 : i32 to index
      %c0_166 = arith.constant 0 : index
      %c0_167 = arith.constant 0 : index
      %330 = vector.load %arg7[%329, %c0_166, %c0_167] : memref<8x8x128xf32, #tpu.memory_space<vmem>>, vector<1x8x128xf32>
      %331 = vector.shape_cast %330 : vector<1x8x128xf32> to vector<8x128xf32>
      %332 = vector.shape_cast %328 : vector<8x128xf32> to vector<1x8x128xf32>
      tpu.vector_store %arg7[%329, %c0_166, %c0_167], %332 {strides = array<i32>} : memref<8x8x128xf32, #tpu.memory_space<vmem>>, vector<1x8x128xf32>,
      %c5_i32 = arith.constant 5 : i32
      %c7_i32_168 = arith.constant 7 : i32
      %333 = arith.subi %c7_i32_168, %c5_i32 : i32
      %334 = arith.index_cast %333 : i32 to index
      %c0_169 = arith.constant 0 : index
      %c0_170 = arith.constant 0 : index
      %335 = vector.load %arg10[%334, %c0_169, %c0_170] : memref<8x8x512xf32, #tpu.memory_space<vmem>>, vector<1x8x512xf32>
      %336 = vector.shape_cast %335 : vector<1x8x512xf32> to vector<8x512xf32>
      %337 = arith.index_cast %333 : i32 to index
      %c0_171 = arith.constant 0 : index
      %c0_172 = arith.constant 0 : index
      %338 = vector.load %arg3[%337, %c0_171, %c0_172] : memref<8x8x1xf32, #tpu.memory_space<vmem>>, vector<1x8x1xf32>
      %339 = vector.shape_cast %338 : vector<1x8x1xf32> to vector<8x1xf32>
      %cst_173 = arith.constant 0.000000e+00 : f32
      %340 = vector.broadcast %cst_173 : f32 to vector<8x1xf32>
      %341 = arith.cmpf ogt, %339, %340 : vector<8x1xf32>
      %c0_174 = arith.constant 0 : index
      %c0_175 = arith.constant 0 : index
      %342 = vector.load %arg11[%c0_174, %c0_175] : memref<8x128xf32, #tpu.memory_space<vmem>>, vector<8x128xf32>
      %c0_176 = arith.constant 0 : index
      %c0_177 = arith.constant 0 : index
      %343 = vector.load %arg12[%c0_176, %c0_177] : memref<8x128xf32, #tpu.memory_space<vmem>>, vector<8x128xf32>
      %c0_178 = arith.constant 0 : index
      %c0_179 = arith.constant 0 : index
      %c0_180 = arith.constant 0 : index
      %344 = vector.load %arg5[%c0_178, %c0_179, %c0_180] : memref<1x128x512xf32, #tpu.memory_space<vmem>>, vector<1x128x512xf32>
      %345 = vector.shape_cast %344 : vector<1x128x512xf32> to vector<128x512xf32>
      %cst_181 = arith.constant dense<0.000000e+00> : vector<8x512xf32>
      %346 = tpu.matmul %342, %345, %cst_181 {dimension_numbers = #tpu.dot_dimension_numbers<[1], [0], [0], [1], [0, 0, 1, 1], [], []>} : vector<8x128xf32>, vector<128x512xf32>, vector<8x512xf32> -> vector<8x512xf32>
      %347 = arith.addf %336, %346 : vector<8x512xf32>
      %348 = vector.extract_strided_slice %347 {offsets = [0, 0], sizes = [8, 128], strides = [1, 1]} : vector<8x512xf32> to vector<8x128xf32>
      %cst_182 = arith.constant 5.000000e-01 : f32
      %349 = vector.broadcast %cst_182 : f32 to vector<8x128xf32>
      %350 = arith.mulf %349, %348 : vector<8x128xf32>
      %351 = math.tanh %350 : vector<8x128xf32>
      %cst_183 = arith.constant 5.000000e-01 : f32
      %352 = vector.broadcast %cst_183 : f32 to vector<8x128xf32>
      %353 = arith.mulf %352, %351 : vector<8x128xf32>
      %cst_184 = arith.constant 5.000000e-01 : f32
      %354 = vector.broadcast %cst_184 : f32 to vector<8x128xf32>
      %355 = arith.addf %353, %354 : vector<8x128xf32>
      %356 = vector.extract_strided_slice %347 {offsets = [0, 128], sizes = [8, 128], strides = [1, 1]} : vector<8x512xf32> to vector<8x128xf32>
      %cst_185 = arith.constant 5.000000e-01 : f32
      %357 = vector.broadcast %cst_185 : f32 to vector<8x128xf32>
      %358 = arith.mulf %357, %356 : vector<8x128xf32>
      %359 = math.tanh %358 : vector<8x128xf32>
      %cst_186 = arith.constant 5.000000e-01 : f32
      %360 = vector.broadcast %cst_186 : f32 to vector<8x128xf32>
      %361 = arith.mulf %360, %359 : vector<8x128xf32>
      %cst_187 = arith.constant 5.000000e-01 : f32
      %362 = vector.broadcast %cst_187 : f32 to vector<8x128xf32>
      %363 = arith.addf %361, %362 : vector<8x128xf32>
      %364 = vector.extract_strided_slice %347 {offsets = [0, 256], sizes = [8, 128], strides = [1, 1]} : vector<8x512xf32> to vector<8x128xf32>
      %365 = math.tanh %364 : vector<8x128xf32>
      %366 = vector.extract_strided_slice %347 {offsets = [0, 384], sizes = [8, 128], strides = [1, 1]} : vector<8x512xf32> to vector<8x128xf32>
      %cst_188 = arith.constant 5.000000e-01 : f32
      %367 = vector.broadcast %cst_188 : f32 to vector<8x128xf32>
      %368 = arith.mulf %367, %366 : vector<8x128xf32>
      %369 = math.tanh %368 : vector<8x128xf32>
      %cst_189 = arith.constant 5.000000e-01 : f32
      %370 = vector.broadcast %cst_189 : f32 to vector<8x128xf32>
      %371 = arith.mulf %370, %369 : vector<8x128xf32>
      %cst_190 = arith.constant 5.000000e-01 : f32
      %372 = vector.broadcast %cst_190 : f32 to vector<8x128xf32>
      %373 = arith.addf %371, %372 : vector<8x128xf32>
      %374 = arith.mulf %363, %343 : vector<8x128xf32>
      %375 = arith.mulf %355, %365 : vector<8x128xf32>
      %376 = arith.addf %374, %375 : vector<8x128xf32>
      %377 = math.tanh %376 : vector<8x128xf32>
      %378 = arith.mulf %373, %377 : vector<8x128xf32>
      %379 = vector.shape_cast %341 : vector<8x1xi1> to vector<8x1xi1>
      %380 = vector.broadcast %379 : vector<8x1xi1> to vector<8x128xi1>
      %381 = arith.select %380, %376, %343 : vector<8x128xi1>, vector<8x128xf32>
      %c0_191 = arith.constant 0 : index
      %c0_192 = arith.constant 0 : index
      %382 = vector.load %arg12[%c0_191, %c0_192] : memref<8x128xf32, #tpu.memory_space<vmem>>, vector<8x128xf32>
      tpu.vector_store %arg12[%c0_191, %c0_192], %381 {strides = array<i32>} : memref<8x128xf32, #tpu.memory_space<vmem>>, vector<8x128xf32>,
      %383 = vector.shape_cast %341 : vector<8x1xi1> to vector<8x1xi1>
      %384 = vector.broadcast %383 : vector<8x1xi1> to vector<8x128xi1>
      %385 = arith.select %384, %378, %342 : vector<8x128xi1>, vector<8x128xf32>
      %c0_193 = arith.constant 0 : index
      %c0_194 = arith.constant 0 : index
      %386 = vector.load %arg11[%c0_193, %c0_194] : memref<8x128xf32, #tpu.memory_space<vmem>>, vector<8x128xf32>
      tpu.vector_store %arg11[%c0_193, %c0_194], %385 {strides = array<i32>} : memref<8x128xf32, #tpu.memory_space<vmem>>, vector<8x128xf32>,
      %cst_195 = arith.constant 0.000000e+00 : f32
      %387 = vector.shape_cast %341 : vector<8x1xi1> to vector<8x1xi1>
      %388 = vector.broadcast %387 : vector<8x1xi1> to vector<8x128xi1>
      %389 = vector.broadcast %cst_195 : f32 to vector<8x128xf32>
      %390 = arith.select %388, %378, %389 : vector<8x128xi1>, vector<8x128xf32>
      %391 = arith.index_cast %333 : i32 to index
      %c0_196 = arith.constant 0 : index
      %c0_197 = arith.constant 0 : index
      %392 = vector.load %arg7[%391, %c0_196, %c0_197] : memref<8x8x128xf32, #tpu.memory_space<vmem>>, vector<1x8x128xf32>
      %393 = vector.shape_cast %392 : vector<1x8x128xf32> to vector<8x128xf32>
      %394 = vector.shape_cast %390 : vector<8x128xf32> to vector<1x8x128xf32>
      tpu.vector_store %arg7[%391, %c0_196, %c0_197], %394 {strides = array<i32>} : memref<8x8x128xf32, #tpu.memory_space<vmem>>, vector<1x8x128xf32>,
      %c6_i32 = arith.constant 6 : i32
      %c7_i32_198 = arith.constant 7 : i32
      %395 = arith.subi %c7_i32_198, %c6_i32 : i32
      %396 = arith.index_cast %395 : i32 to index
      %c0_199 = arith.constant 0 : index
      %c0_200 = arith.constant 0 : index
      %397 = vector.load %arg10[%396, %c0_199, %c0_200] : memref<8x8x512xf32, #tpu.memory_space<vmem>>, vector<1x8x512xf32>
      %398 = vector.shape_cast %397 : vector<1x8x512xf32> to vector<8x512xf32>
      %399 = arith.index_cast %395 : i32 to index
      %c0_201 = arith.constant 0 : index
      %c0_202 = arith.constant 0 : index
      %400 = vector.load %arg3[%399, %c0_201, %c0_202] : memref<8x8x1xf32, #tpu.memory_space<vmem>>, vector<1x8x1xf32>
      %401 = vector.shape_cast %400 : vector<1x8x1xf32> to vector<8x1xf32>
      %cst_203 = arith.constant 0.000000e+00 : f32
      %402 = vector.broadcast %cst_203 : f32 to vector<8x1xf32>
      %403 = arith.cmpf ogt, %401, %402 : vector<8x1xf32>
      %c0_204 = arith.constant 0 : index
      %c0_205 = arith.constant 0 : index
      %404 = vector.load %arg11[%c0_204, %c0_205] : memref<8x128xf32, #tpu.memory_space<vmem>>, vector<8x128xf32>
      %c0_206 = arith.constant 0 : index
      %c0_207 = arith.constant 0 : index
      %405 = vector.load %arg12[%c0_206, %c0_207] : memref<8x128xf32, #tpu.memory_space<vmem>>, vector<8x128xf32>
      %c0_208 = arith.constant 0 : index
      %c0_209 = arith.constant 0 : index
      %c0_210 = arith.constant 0 : index
      %406 = vector.load %arg5[%c0_208, %c0_209, %c0_210] : memref<1x128x512xf32, #tpu.memory_space<vmem>>, vector<1x128x512xf32>
      %407 = vector.shape_cast %406 : vector<1x128x512xf32> to vector<128x512xf32>
      %cst_211 = arith.constant dense<0.000000e+00> : vector<8x512xf32>
      %408 = tpu.matmul %404, %407, %cst_211 {dimension_numbers = #tpu.dot_dimension_numbers<[1], [0], [0], [1], [0, 0, 1, 1], [], []>} : vector<8x128xf32>, vector<128x512xf32>, vector<8x512xf32> -> vector<8x512xf32>
      %409 = arith.addf %398, %408 : vector<8x512xf32>
      %410 = vector.extract_strided_slice %409 {offsets = [0, 0], sizes = [8, 128], strides = [1, 1]} : vector<8x512xf32> to vector<8x128xf32>
      %cst_212 = arith.constant 5.000000e-01 : f32
      %411 = vector.broadcast %cst_212 : f32 to vector<8x128xf32>
      %412 = arith.mulf %411, %410 : vector<8x128xf32>
      %413 = math.tanh %412 : vector<8x128xf32>
      %cst_213 = arith.constant 5.000000e-01 : f32
      %414 = vector.broadcast %cst_213 : f32 to vector<8x128xf32>
      %415 = arith.mulf %414, %413 : vector<8x128xf32>
      %cst_214 = arith.constant 5.000000e-01 : f32
      %416 = vector.broadcast %cst_214 : f32 to vector<8x128xf32>
      %417 = arith.addf %415, %416 : vector<8x128xf32>
      %418 = vector.extract_strided_slice %409 {offsets = [0, 128], sizes = [8, 128], strides = [1, 1]} : vector<8x512xf32> to vector<8x128xf32>
      %cst_215 = arith.constant 5.000000e-01 : f32
      %419 = vector.broadcast %cst_215 : f32 to vector<8x128xf32>
      %420 = arith.mulf %419, %418 : vector<8x128xf32>
      %421 = math.tanh %420 : vector<8x128xf32>
      %cst_216 = arith.constant 5.000000e-01 : f32
      %422 = vector.broadcast %cst_216 : f32 to vector<8x128xf32>
      %423 = arith.mulf %422, %421 : vector<8x128xf32>
      %cst_217 = arith.constant 5.000000e-01 : f32
      %424 = vector.broadcast %cst_217 : f32 to vector<8x128xf32>
      %425 = arith.addf %423, %424 : vector<8x128xf32>
      %426 = vector.extract_strided_slice %409 {offsets = [0, 256], sizes = [8, 128], strides = [1, 1]} : vector<8x512xf32> to vector<8x128xf32>
      %427 = math.tanh %426 : vector<8x128xf32>
      %428 = vector.extract_strided_slice %409 {offsets = [0, 384], sizes = [8, 128], strides = [1, 1]} : vector<8x512xf32> to vector<8x128xf32>
      %cst_218 = arith.constant 5.000000e-01 : f32
      %429 = vector.broadcast %cst_218 : f32 to vector<8x128xf32>
      %430 = arith.mulf %429, %428 : vector<8x128xf32>
      %431 = math.tanh %430 : vector<8x128xf32>
      %cst_219 = arith.constant 5.000000e-01 : f32
      %432 = vector.broadcast %cst_219 : f32 to vector<8x128xf32>
      %433 = arith.mulf %432, %431 : vector<8x128xf32>
      %cst_220 = arith.constant 5.000000e-01 : f32
      %434 = vector.broadcast %cst_220 : f32 to vector<8x128xf32>
      %435 = arith.addf %433, %434 : vector<8x128xf32>
      %436 = arith.mulf %425, %405 : vector<8x128xf32>
      %437 = arith.mulf %417, %427 : vector<8x128xf32>
      %438 = arith.addf %436, %437 : vector<8x128xf32>
      %439 = math.tanh %438 : vector<8x128xf32>
      %440 = arith.mulf %435, %439 : vector<8x128xf32>
      %441 = vector.shape_cast %403 : vector<8x1xi1> to vector<8x1xi1>
      %442 = vector.broadcast %441 : vector<8x1xi1> to vector<8x128xi1>
      %443 = arith.select %442, %438, %405 : vector<8x128xi1>, vector<8x128xf32>
      %c0_221 = arith.constant 0 : index
      %c0_222 = arith.constant 0 : index
      %444 = vector.load %arg12[%c0_221, %c0_222] : memref<8x128xf32, #tpu.memory_space<vmem>>, vector<8x128xf32>
      tpu.vector_store %arg12[%c0_221, %c0_222], %443 {strides = array<i32>} : memref<8x128xf32, #tpu.memory_space<vmem>>, vector<8x128xf32>,
      %445 = vector.shape_cast %403 : vector<8x1xi1> to vector<8x1xi1>
      %446 = vector.broadcast %445 : vector<8x1xi1> to vector<8x128xi1>
      %447 = arith.select %446, %440, %404 : vector<8x128xi1>, vector<8x128xf32>
      %c0_223 = arith.constant 0 : index
      %c0_224 = arith.constant 0 : index
      %448 = vector.load %arg11[%c0_223, %c0_224] : memref<8x128xf32, #tpu.memory_space<vmem>>, vector<8x128xf32>
      tpu.vector_store %arg11[%c0_223, %c0_224], %447 {strides = array<i32>} : memref<8x128xf32, #tpu.memory_space<vmem>>, vector<8x128xf32>,
      %cst_225 = arith.constant 0.000000e+00 : f32
      %449 = vector.shape_cast %403 : vector<8x1xi1> to vector<8x1xi1>
      %450 = vector.broadcast %449 : vector<8x1xi1> to vector<8x128xi1>
      %451 = vector.broadcast %cst_225 : f32 to vector<8x128xf32>
      %452 = arith.select %450, %440, %451 : vector<8x128xi1>, vector<8x128xf32>
      %453 = arith.index_cast %395 : i32 to index
      %c0_226 = arith.constant 0 : index
      %c0_227 = arith.constant 0 : index
      %454 = vector.load %arg7[%453, %c0_226, %c0_227] : memref<8x8x128xf32, #tpu.memory_space<vmem>>, vector<1x8x128xf32>
      %455 = vector.shape_cast %454 : vector<1x8x128xf32> to vector<8x128xf32>
      %456 = vector.shape_cast %452 : vector<8x128xf32> to vector<1x8x128xf32>
      tpu.vector_store %arg7[%453, %c0_226, %c0_227], %456 {strides = array<i32>} : memref<8x8x128xf32, #tpu.memory_space<vmem>>, vector<1x8x128xf32>,
      %c7_i32_228 = arith.constant 7 : i32
      %c7_i32_229 = arith.constant 7 : i32
      %457 = arith.subi %c7_i32_229, %c7_i32_228 : i32
      %458 = arith.index_cast %457 : i32 to index
      %c0_230 = arith.constant 0 : index
      %c0_231 = arith.constant 0 : index
      %459 = vector.load %arg10[%458, %c0_230, %c0_231] : memref<8x8x512xf32, #tpu.memory_space<vmem>>, vector<1x8x512xf32>
      %460 = vector.shape_cast %459 : vector<1x8x512xf32> to vector<8x512xf32>
      %461 = arith.index_cast %457 : i32 to index
      %c0_232 = arith.constant 0 : index
      %c0_233 = arith.constant 0 : index
      %462 = vector.load %arg3[%461, %c0_232, %c0_233] : memref<8x8x1xf32, #tpu.memory_space<vmem>>, vector<1x8x1xf32>
      %463 = vector.shape_cast %462 : vector<1x8x1xf32> to vector<8x1xf32>
      %cst_234 = arith.constant 0.000000e+00 : f32
      %464 = vector.broadcast %cst_234 : f32 to vector<8x1xf32>
      %465 = arith.cmpf ogt, %463, %464 : vector<8x1xf32>
      %c0_235 = arith.constant 0 : index
      %c0_236 = arith.constant 0 : index
      %466 = vector.load %arg11[%c0_235, %c0_236] : memref<8x128xf32, #tpu.memory_space<vmem>>, vector<8x128xf32>
      %c0_237 = arith.constant 0 : index
      %c0_238 = arith.constant 0 : index
      %467 = vector.load %arg12[%c0_237, %c0_238] : memref<8x128xf32, #tpu.memory_space<vmem>>, vector<8x128xf32>
      %c0_239 = arith.constant 0 : index
      %c0_240 = arith.constant 0 : index
      %c0_241 = arith.constant 0 : index
      %468 = vector.load %arg5[%c0_239, %c0_240, %c0_241] : memref<1x128x512xf32, #tpu.memory_space<vmem>>, vector<1x128x512xf32>
      %469 = vector.shape_cast %468 : vector<1x128x512xf32> to vector<128x512xf32>
      %cst_242 = arith.constant dense<0.000000e+00> : vector<8x512xf32>
      %470 = tpu.matmul %466, %469, %cst_242 {dimension_numbers = #tpu.dot_dimension_numbers<[1], [0], [0], [1], [0, 0, 1, 1], [], []>} : vector<8x128xf32>, vector<128x512xf32>, vector<8x512xf32> -> vector<8x512xf32>
      %471 = arith.addf %460, %470 : vector<8x512xf32>
      %472 = vector.extract_strided_slice %471 {offsets = [0, 0], sizes = [8, 128], strides = [1, 1]} : vector<8x512xf32> to vector<8x128xf32>
      %cst_243 = arith.constant 5.000000e-01 : f32
      %473 = vector.broadcast %cst_243 : f32 to vector<8x128xf32>
      %474 = arith.mulf %473, %472 : vector<8x128xf32>
      %475 = math.tanh %474 : vector<8x128xf32>
      %cst_244 = arith.constant 5.000000e-01 : f32
      %476 = vector.broadcast %cst_244 : f32 to vector<8x128xf32>
      %477 = arith.mulf %476, %475 : vector<8x128xf32>
      %cst_245 = arith.constant 5.000000e-01 : f32
      %478 = vector.broadcast %cst_245 : f32 to vector<8x128xf32>
      %479 = arith.addf %477, %478 : vector<8x128xf32>
      %480 = vector.extract_strided_slice %471 {offsets = [0, 128], sizes = [8, 128], strides = [1, 1]} : vector<8x512xf32> to vector<8x128xf32>
      %cst_246 = arith.constant 5.000000e-01 : f32
      %481 = vector.broadcast %cst_246 : f32 to vector<8x128xf32>
      %482 = arith.mulf %481, %480 : vector<8x128xf32>
      %483 = math.tanh %482 : vector<8x128xf32>
      %cst_247 = arith.constant 5.000000e-01 : f32
      %484 = vector.broadcast %cst_247 : f32 to vector<8x128xf32>
      %485 = arith.mulf %484, %483 : vector<8x128xf32>
      %cst_248 = arith.constant 5.000000e-01 : f32
      %486 = vector.broadcast %cst_248 : f32 to vector<8x128xf32>
      %487 = arith.addf %485, %486 : vector<8x128xf32>
      %488 = vector.extract_strided_slice %471 {offsets = [0, 256], sizes = [8, 128], strides = [1, 1]} : vector<8x512xf32> to vector<8x128xf32>
      %489 = math.tanh %488 : vector<8x128xf32>
      %490 = vector.extract_strided_slice %471 {offsets = [0, 384], sizes = [8, 128], strides = [1, 1]} : vector<8x512xf32> to vector<8x128xf32>
      %cst_249 = arith.constant 5.000000e-01 : f32
      %491 = vector.broadcast %cst_249 : f32 to vector<8x128xf32>
      %492 = arith.mulf %491, %490 : vector<8x128xf32>
      %493 = math.tanh %492 : vector<8x128xf32>
      %cst_250 = arith.constant 5.000000e-01 : f32
      %494 = vector.broadcast %cst_250 : f32 to vector<8x128xf32>
      %495 = arith.mulf %494, %493 : vector<8x128xf32>
      %cst_251 = arith.constant 5.000000e-01 : f32
      %496 = vector.broadcast %cst_251 : f32 to vector<8x128xf32>
      %497 = arith.addf %495, %496 : vector<8x128xf32>
      %498 = arith.mulf %487, %467 : vector<8x128xf32>
      %499 = arith.mulf %479, %489 : vector<8x128xf32>
      %500 = arith.addf %498, %499 : vector<8x128xf32>
      %501 = math.tanh %500 : vector<8x128xf32>
      %502 = arith.mulf %497, %501 : vector<8x128xf32>
      %503 = vector.shape_cast %465 : vector<8x1xi1> to vector<8x1xi1>
      %504 = vector.broadcast %503 : vector<8x1xi1> to vector<8x128xi1>
      %505 = arith.select %504, %500, %467 : vector<8x128xi1>, vector<8x128xf32>
      %c0_252 = arith.constant 0 : index
      %c0_253 = arith.constant 0 : index
      %506 = vector.load %arg12[%c0_252, %c0_253] : memref<8x128xf32, #tpu.memory_space<vmem>>, vector<8x128xf32>
      tpu.vector_store %arg12[%c0_252, %c0_253], %505 {strides = array<i32>} : memref<8x128xf32, #tpu.memory_space<vmem>>, vector<8x128xf32>,
      %507 = vector.shape_cast %465 : vector<8x1xi1> to vector<8x1xi1>
      %508 = vector.broadcast %507 : vector<8x1xi1> to vector<8x128xi1>
      %509 = arith.select %508, %502, %466 : vector<8x128xi1>, vector<8x128xf32>
      %c0_254 = arith.constant 0 : index
      %c0_255 = arith.constant 0 : index
      %510 = vector.load %arg11[%c0_254, %c0_255] : memref<8x128xf32, #tpu.memory_space<vmem>>, vector<8x128xf32>
      tpu.vector_store %arg11[%c0_254, %c0_255], %509 {strides = array<i32>} : memref<8x128xf32, #tpu.memory_space<vmem>>, vector<8x128xf32>,
      %cst_256 = arith.constant 0.000000e+00 : f32
      %511 = vector.shape_cast %465 : vector<8x1xi1> to vector<8x1xi1>
      %512 = vector.broadcast %511 : vector<8x1xi1> to vector<8x128xi1>
      %513 = vector.broadcast %cst_256 : f32 to vector<8x128xf32>
      %514 = arith.select %512, %502, %513 : vector<8x128xi1>, vector<8x128xf32>
      %515 = arith.index_cast %457 : i32 to index
      %c0_257 = arith.constant 0 : index
      %c0_258 = arith.constant 0 : index
      %516 = vector.load %arg7[%515, %c0_257, %c0_258] : memref<8x8x128xf32, #tpu.memory_space<vmem>>, vector<1x8x128xf32>
      %517 = vector.shape_cast %516 : vector<1x8x128xf32> to vector<8x128xf32>
      %518 = vector.shape_cast %514 : vector<8x128xf32> to vector<1x8x128xf32>
      tpu.vector_store %arg7[%515, %c0_257, %c0_258], %518 {strides = array<i32>} : memref<8x8x128xf32, #tpu.memory_space<vmem>>, vector<1x8x128xf32>,
      %c8_i32 = arith.constant 8 : i32
    } else {
    }
    %c0_i32_15 = arith.constant 0 : i32
    %20 = arith.cmpi eq, %arg1, %c0_i32_15 : i32
    %21 = arith.extui %20 : i1 to i32
    %c0_i32_16 = arith.constant 0 : i32
    %22 = arith.cmpi ne, %21, %c0_i32_16 : i32
    scf.if %22 {
      %c0_17 = arith.constant 0 : index
      %c0_18 = arith.constant 0 : index
      %23 = vector.load %arg11[%c0_17, %c0_18] : memref<8x128xf32, #tpu.memory_space<vmem>>, vector<8x128xf32>
      %c0_19 = arith.constant 0 : index
      %c0_20 = arith.constant 0 : index
      %c0_21 = arith.constant 0 : index
      %24 = vector.load %arg8[%c0_19, %c0_20, %c0_21] : memref<1x8x128xf32, #tpu.memory_space<vmem>>, vector<1x8x128xf32>
      %25 = vector.shape_cast %24 : vector<1x8x128xf32> to vector<8x128xf32>
      %26 = vector.shape_cast %23 : vector<8x128xf32> to vector<1x8x128xf32>
      tpu.vector_store %arg8[%c0_19, %c0_20, %c0_21], %26 {strides = array<i32>} : memref<1x8x128xf32, #tpu.memory_space<vmem>>, vector<1x8x128xf32>,
      %c0_22 = arith.constant 0 : index
      %c0_23 = arith.constant 0 : index
      %27 = vector.load %arg12[%c0_22, %c0_23] : memref<8x128xf32, #tpu.memory_space<vmem>>, vector<8x128xf32>
      %c0_24 = arith.constant 0 : index
      %c0_25 = arith.constant 0 : index
      %c0_26 = arith.constant 0 : index
      %28 = vector.load %arg9[%c0_24, %c0_25, %c0_26] : memref<1x8x128xf32, #tpu.memory_space<vmem>>, vector<1x8x128xf32>
      %29 = vector.shape_cast %28 : vector<1x8x128xf32> to vector<8x128xf32>
      %30 = vector.shape_cast %27 : vector<8x128xf32> to vector<1x8x128xf32>
      tpu.vector_store %arg9[%c0_24, %c0_25, %c0_26], %30 {strides = array<i32>} : memref<1x8x128xf32, #tpu.memory_space<vmem>>, vector<1x8x128xf32>,
    } else {
    }
    return
  }
  func.func @transform_0(%arg0: i32, %arg1: i32) -> (i32, i32, i32) {
    %c0_i32 = arith.constant 0 : i32
    %0 = arith.subi %c0_i32, %arg1 : i32
    %1 = arith.muli %arg0, %0 : i32
    %c1_i32 = arith.constant 1 : i32
    %2 = arith.subi %c1_i32, %arg0 : i32
    %3 = arith.muli %2, %arg1 : i32
    %4 = arith.addi %1, %3 : i32
    %c0_i32_0 = arith.constant 0 : i32
    %c0_i32_1 = arith.constant 0 : i32
    %c0_i32_2 = arith.constant 0 : i32
    return %4, %c0_i32_0, %c0_i32_1 : i32, i32, i32
  }
  func.func @transform_1(%arg0: i32, %arg1: i32) -> (i32, i32, i32) {
    %c0_i32 = arith.constant 0 : i32
    %0 = arith.subi %c0_i32, %arg1 : i32
    %1 = arith.muli %arg0, %0 : i32
    %c1_i32 = arith.constant 1 : i32
    %2 = arith.subi %c1_i32, %arg0 : i32
    %3 = arith.muli %2, %arg1 : i32
    %4 = arith.addi %1, %3 : i32
    %c0_i32_0 = arith.constant 0 : i32
    %c0_i32_1 = arith.constant 0 : i32
    %c0_i32_2 = arith.constant 0 : i32
    return %4, %c0_i32_0, %c0_i32_1 : i32, i32, i32
  }
  func.func @transform_2(%arg0: i32, %arg1: i32) -> (i32, i32, i32) {
    %c0_i32 = arith.constant 0 : i32
    %c0_i32_0 = arith.constant 0 : i32
    %c0_i32_1 = arith.constant 0 : i32
    return %arg0, %c0_i32, %c0_i32_0 : i32, i32, i32
  }
  func.func @transform_3(%arg0: i32, %arg1: i32) -> (i32, i32, i32) {
    %c0_i32 = arith.constant 0 : i32
    %c0_i32_0 = arith.constant 0 : i32
    %c0_i32_1 = arith.constant 0 : i32
    return %arg0, %c0_i32, %c0_i32_0 : i32, i32, i32
  }
  func.func @transform_4(%arg0: i32, %arg1: i32) -> (i32, i32, i32) {
    %c0_i32 = arith.constant 0 : i32
    %c0_i32_0 = arith.constant 0 : i32
    %c0_i32_1 = arith.constant 0 : i32
    return %arg0, %c0_i32, %c0_i32_0 : i32, i32, i32
  }
  func.func @transform_5(%arg0: i32, %arg1: i32) -> (i32, i32, i32) {
    %c0_i32 = arith.constant 0 : i32
    %0 = arith.subi %c0_i32, %arg1 : i32
    %1 = arith.muli %arg0, %0 : i32
    %c1_i32 = arith.constant 1 : i32
    %2 = arith.subi %c1_i32, %arg0 : i32
    %3 = arith.muli %2, %arg1 : i32
    %4 = arith.addi %1, %3 : i32
    %c0_i32_0 = arith.constant 0 : i32
    %c0_i32_1 = arith.constant 0 : i32
    return %4, %c0_i32_0, %arg0 : i32, i32, i32
  }
  func.func @transform_6(%arg0: i32, %arg1: i32) -> (i32, i32, i32) {
    %c0_i32 = arith.constant 0 : i32
    %c0_i32_0 = arith.constant 0 : i32
    %c0_i32_1 = arith.constant 0 : i32
    return %arg0, %c0_i32, %c0_i32_0 : i32, i32, i32
  }
  func.func @transform_7(%arg0: i32, %arg1: i32) -> (i32, i32, i32) {
    %c0_i32 = arith.constant 0 : i32
    %c0_i32_0 = arith.constant 0 : i32
    %c0_i32_1 = arith.constant 0 : i32
    return %arg0, %c0_i32, %c0_i32_0 : i32, i32, i32
  }
}

</mosaic_0001>

<bundles_post_ra>
// kernel: tpu_custom_call.1
= control target key start
LH: loop header
LB: loop body
LE: loop exit
PB: predicated region body
PF: predicated region fallthrough
CT: control target
= control target key end

     0   :  { %13 = vsyncpa [#allocation6], 0  ;;  %s8176_s0 = inlined_call_operand.vmem [shape: f32[8,8,128], index: 0, kind: input, shape index: {}]   ;;  %s8177_s1 = inlined_call_operand.vmem [shape: f32[8,8,1], index: 1, kind: input, shape index: {}]   ;;  %s8178_s2 = inlined_call_operand.hbm [shape: f32[2,128,512], index: 2, kind: input, shape index: {}]   ;;  %s8179_s3 = inlined_call_operand.hbm [shape: f32[2,128,512], index: 3, kind: input, shape index: {}]   ;;  %s8180_s4 = inlined_call_operand.vmem [shape: f32[2,1,512], index: 4, kind: input, shape index: {}]   ;;  %s8181_s5 = inlined_call_operand.hbm [shape: f32[8,8,256], index: 5, kind: output, shape index: {0}]   ;;  %s8182_s6 = inlined_call_operand.hbm [shape: f32[2,8,128], index: 6, kind: output, shape index: {1}]   ;;  %s8183_s7 = inlined_call_operand.hbm [shape: f32[2,8,128], index: 7, kind: output, shape index: {2}]  }
   0x1   :  { %14 = vsyncpa [#allocation9], 0 }
   0x2   :  { %15 = vsyncpa [#allocation7], 0 }
   0x3   :  { %17 = vsyncpa [#allocation7 + $0x1], 0 }
   0x4   :  { %18 = vsyncpa [#allocation12], 0 }
   0x5   :  { %20 = vsyncpa [#allocation12 + $0x1], 0  ;;  %s6751_s24 = smov 0   ;;  %s6753_s25 = smov 0  }
   0x6   :  { %s6755_s26 = smov 0   ;;  %s6757_s27 = smov 0  }
   0x7   :  { %s6759_s28 = smov 0   ;;  %s6761_s29 = smov 0  }
   0x8 LB: > { %8192 = sst [smem:[#allocation18_spill]] %s6682_s26  ;;  %s6782_s30 = sadd.s32 4294967295, %s6694_s29   ;;  %s6694_s29 = sphi %s6761_s29, %s26_s29   ;;  %s6690_s28 = sphi %s6759_s28, %s8209_s28   ;;  %s6686_s27 = sphi %s6757_s27, %s8208_s27   ;;  %s6682_s26 = sphi %s6755_s26, %s8207_s26   ;;  %s6678_s25 = sphi %s6753_s25, %s8211_s25   ;;  %s6674_s24 = sphi %s6751_s24, %s8210_s24  }
   0x9   : > { %8193 = sst [smem:[#allocation19_spill]] %s6690_s28  ;;  %s8184_s8 = sadd.s32 4294967294, %s6694_s29  }
   0xa   : > { %s38_s9 = sadd.s32 1, %s6690_s28  ;;  %s117_s10 = sadd.s32 1, %s6682_s26 }
   0xb   : > { %p40_p0 = scmp.ge.s32.totalorder %s38_s9, 2  ;;  %p130_p1 = scmp.ne.s32.totalorder %s6678_s25, %s6674_s24 }
   0xc   : > { %p217_p2 = scmp.ne.s32.totalorder %s6682_s26, %s6678_s25  ;;  %p131_p3 = scmp.eq.s32.totalorder %s6782_s30, 0 }
   0xd   : > { %s8213_s9 = smov (%p40_p0, %s38_s9), 0  ;;  %p218_p4 = scmp.eq.s32.totalorder %s6782_s30, 1 }
   0xe   : > { %8194 = sst [smem:[#allocation20_spill]] %s8213_s9  ;;  %s114_s11 = ssub.s32 %s6690_s28, %s8213_s9 }
   0xf   : > { %p224_p5 = scmp.eq.s32.totalorder %s8184_s8, 1  ;;  %p115_p6 = scmp.eq.s32.totalorder %s114_s11, 0 }
  0x10   : > { %p6799_p7 = por %p218_p4, %p217_p2  ;;  %p5095_p9 = scmp.ge.s32.totalorder %s6694_s29, 1 }
  0x11   : > { %p6806_p8 = por %p224_p5, %p130_p1  ;;  %p283_p10 = scmp.lt.s32.totalorder %s6694_s29, 3 }
  0x12   : > { %s8195_s12 = scalar_select %p6799_p7, 1, 0 }
  0x13   : > { %s8196_s13 = scalar_select %p6806_p8, 1, 0 }
  0x14   : > { %s6812_s14 = scalar_select %p115_p6, %s6682_s26, %s117_s10  }
  0x15   : > { %s5146_s15 = sshll.u32 %s6686_s27, 13  ;;  %p6819_p11 = por %p131_p3, %p130_p1 }
  0x16   : > { %8197 = sst [smem:[#allocation21_spill]] %s6812_s14  ;;  %p6823_p12 = pnand %p5095_p9, %p283_p10 }
  0x17   : > { %s8198_s16 = scalar_select %p6819_p11, 1, 0 }
  0x18   : > { %s8199_s17 = scalar_select %p6823_p12, 1, 0 }
  0x19   : > { %s6696_s18 = smov [#allocation5]   ;;  %s6830_s22 = scalar_lea.hbm %s8178_s2, %s5146_s15 }
  0x1a   : > { %s298_s19 = sshll.u32 %s6696_s18, 4  ;;  %p6246_p13 = pneg %p6823_p12  ;;  %s6832_s19 = int_to_ptr.vmem [resolvable:$true] %s298_s19 }
  0x1b   : > { %s6697_s10 = smov [#allocation8]   ;;  %s6845_s21 = scalar_lea.hbm %s8179_s3, %s5146_s15 }
  0x1c   : > { %p6838_p0 = pnand %p6246_p13, %p6819_p11  ;;  %s314_s11 = sshll.u32 %s6697_s10, 4  ;;  %s6847_s11 = int_to_ptr.vmem [resolvable:$true] %s314_s11 }
  0x1d   : > { %s6488_s8 = scalar_lea.hbm %s6830_s22, 8192  ;;  %s6493_s14 = scalar_lea.hbm %s8178_s2, 16384 }
  0x1e   : > { %p6489_p1 = scmp.ne.s32.totalorder %s6830_s22, %s6488_s8  ;;  %p6490_p2 = pneg %p6838_p0 }
  0x1f   : > { %p6494_p5 = scmp.lt.u32.totalorder %s6830_s22, %s8178_s2  ;;  %p6495_p6 = scmp.lt.u32.totalorder %s6493_s14, %s6488_s8 }
  0x20   : > { %p6491_p3 = pnand %p6490_p2, %p6489_p1  ;;  %p6497_p10 = scmp.lt.u32.totalorder %s6488_s8, %s6830_s22 }
  0x21   : > { %p6496_p9 = por %p6495_p6, %p6494_p5 }
  0x22   : > { %p6492_p4 = pneg %p6491_p3 }
  0x23   : > { %p6498_p13 = por %p6497_p10, %p6496_p9 }
  0x25   : > { %p6499_p8 = pnand %p6498_p13, %p6492_p4 }
  0x27   : > { %6502 = shalt.err (!%p6499_p8)
}
  0x28   : > { %s6503_s15 = scalar_lea.vmem %s6832_s19, 8192  ;;  %p6511_p11 = scmp.lt.s32.totalorder %s6832_s19, %s6832_s19 }
  0x29   : > { %p6504_p1 = scmp.ne.s32.totalorder %s6832_s19, %s6503_s15  ;;  %p6512_p12 = scmp.lt.s32.totalorder %s6503_s15, %s6503_s15 }
  0x2b   : > { %p6506_p3 = pnand %p6504_p1, %p6490_p2  ;;  %p6513_p5 = por %p6512_p12, %p6511_p11 }
  0x2d   : > { %p6507_p7 = pneg %p6506_p3 }
  0x2f   : > { %p6514_p6 = pnand %p6513_p5, %p6507_p7 }
  0x31   : > { %6517 = shalt.err (!%p6514_p6)
}
  0x32   : > { %s6698_s26 = smov 512   ;;  %s6699_s28 = smov 32  }
  0x33   : > { %6249 = dma.hbm_to_vmem [thread:$0]  (!%p6838_p0), %s6830_s22, 8192, %s6832_s19, [#allocation6], %s6698_s26, %s6698_s26, %s6699_s28  }
  0x34   : > { %s6518_s8 = scalar_lea.hbm %s6845_s21, 8192  ;;  %s6523_s18 = scalar_lea.hbm %s8179_s3, 16384 }
  0x35   : > { %p6519_p8 = scmp.ne.s32.totalorder %s6845_s21, %s6518_s8  ;;  %p6524_p7 = scmp.lt.u32.totalorder %s6845_s21, %s8179_s3 }
  0x36   : > { %p6525_p12 = scmp.lt.u32.totalorder %s6523_s18, %s6518_s8  ;;  %p6527_p10 = scmp.lt.u32.totalorder %s6518_s8, %s6845_s21 }
  0x37   : > { %p6521_p4 = pnand %p6519_p8, %p6490_p2 }
  0x38   : > { %p6526_p9 = por %p6525_p12, %p6524_p7 }
  0x39   : > { %p6522_p11 = pneg %p6521_p4 }
  0x3a   : > { %p6528_p13 = por %p6527_p10, %p6526_p9 }
  0x3c   : > { %p6529_p1 = pnand %p6528_p13, %p6522_p11 }
  0x3e   : > { %6532 = shalt.err (!%p6529_p1)
}
  0x3f   : > { %s6533_s19 = scalar_lea.vmem %s6847_s11, 8192  ;;  %p6541_p8 = scmp.lt.s32.totalorder %s6847_s11, %s6847_s11 }
  0x40   : > { %p6534_p3 = scmp.ne.s32.totalorder %s6847_s11, %s6533_s19  ;;  %p6542_p4 = scmp.lt.s32.totalorder %s6533_s19, %s6533_s19 }
  0x42   : > { %p6536_p5 = pnand %p6534_p3, %p6490_p2  ;;  %p6543_p7 = por %p6542_p4, %p6541_p8 }
  0x44   : > { %p6537_p6 = pneg %p6536_p5 }
  0x46   : > { %p6544_p12 = pnand %p6543_p7, %p6537_p6 }
  0x48   : > { %6547 = shalt.err (!%p6544_p12)
}
  0x49   : > { %6252 = dma.hbm_to_vmem [thread:$0]  (!%p6838_p0), %s6845_s21, 8192, %s6847_s11, [#allocation9], %s6698_s26, %s6698_s26, %s6699_s28  }
  0x4a   : > { %p8201_p11 = scmp.ne.s32.totalorder %s8199_s17, 0 }
  0x4b   : > { %p8202_p9 = scmp.ne.s32.totalorder (!%p8201_p11), %s8198_s16, 0 }
  0x4c   : > { %375 = sbr.rel (%p8201_p11) target bundleno = 4512 (0x11a0), region = 40 }
  0x53   : > { %6657 = dma.done.wait (%p8202_p9), [#allocation6], 8192  }
  0x54   : > { %6659 = vsyncadd (%p8202_p9), [#allocation6], 4294959104 }
  0x55   : > { %6661 = dma.done.wait (%p8202_p9), [#allocation9], 8192  }
  0x56   : > { %6663 = vsyncadd (%p8202_p9), [#allocation9], 4294959104  ;;  %s6910_s22 = sand.u32 1, %s6678_s25   ;;  %v6700_v0 = vmov 0.0   ;;  %v497_v1 = vld [vmem:[#allocation5 + $0x8] sm:$0xff]  ;;  %v499_v3 = vld [vmem:[#allocation5 + $0x18] sm:$0xff] }
  0x57   : > { %s5104_s23 = sshll.u32 %s6910_s22, 6  ;;  %s5105_s17 = sshll.u32 %s6910_s22, 3  ;;  %486 = vst [vmem:[#allocation3] sm:$0xff] %v6700_v0  ;;  %487 = vst [vmem:[#allocation4] sm:$0xff] %v6700_v0  ;;  %646 = vmatprep.mubr.f32.mxu0 %v6700_v0  ;;  %759 = vmatprep.mubr.f32.mxu1 %v6700_v0  ;;  %v501_v2 = vld [vmem:[#allocation5 + $0x28] sm:$0xff]  ;;  %v503_v5 = vld [vmem:[#allocation5 + $0x38] sm:$0xff] }
  0x58   : > { %v5148_v4 = vpack.c.bf16 %v501_v2, %v497_v1  ;;  %v496_v6 = vld [vmem:[#allocation5] sm:$0xff]  ;;  %v5180_v8 = vpack.c.bf16 %v503_v5, %v499_v3  ;;  %v498_v10 = vld [vmem:[#allocation5 + $0x10] sm:$0xff]  ;;  %v505_v12 = vld [vmem:[#allocation5 + $0x48] sm:$0xff]  ;;  %p472_p0 = scmp.lt.s32.totalorder %s6686_s27, 1  ;;  %s7003_s14 = scalar_lea.vmem [#allocation10], %s5104_s23 }
  0x59   : > { %v500_v7 = vld [vmem:[#allocation5 + $0x20] sm:$0xff]  ;;  %v502_v11 = vld [vmem:[#allocation5 + $0x30] sm:$0xff]  ;;  %v509_v14 = vld [vmem:[#allocation5 + $0x68] sm:$0xff]  ;;  %s7007_s18 = scalar_lea.vmem [#allocation11], %s5105_s17  ;;  %s7011_s20 = scalar_lea.vmem [#allocation13], %s5105_s17 }
  0x5a   : > { %v5150_v9 = vpack.c.bf16 %v500_v7, %v496_v6  ;;  %5149 = vmatprep.subr.bf16.mxu0 %v5148_v4  ;;  %v5182_v13 = vpack.c.bf16 %v502_v11, %v498_v10  ;;  %v507_v15 = vld [vmem:[#allocation5 + $0x58] sm:$0xff]  ;;  %5181 = vmatprep.subr.bf16.mxu1 %v5180_v8  ;;  %v5152_v17 = vpack.c.bf16 %v509_v14, %v505_v12  ;;  %v504_v19 = vld [vmem:[#allocation5 + $0x40] sm:$0xff]  ;;  %v506_v21 = vld [vmem:[#allocation5 + $0x50] sm:$0xff]  ;;  %s473_s15 = scalar_select %p472_p0, %s6686_s27, 1 }
  0x5b   : > { %v511_v16 = vld [vmem:[#allocation5 + $0x78] sm:$0xff]  ;;  %v508_v20 = vld [vmem:[#allocation5 + $0x60] sm:$0xff]  ;;  %v510_v23 = vld [vmem:[#allocation5 + $0x70] sm:$0xff]  ;;  %p5108_p2 = scmp.ne.s32.totalorder %s6686_s27, 0 }
  0x5c   : > { %5151 = vmatpush1.bf16.msra.mxu0 %v5150_v9  ;;  %v5184_v18 = vpack.c.bf16 %v511_v16, %v507_v15  ;;  %5183 = vmatpush1.bf16.msra.mxu1 %v5182_v13  ;;  %v5154_v22 = vpack.c.bf16 %v508_v20, %v504_v19  ;;  %v513_v24 = vld [vmem:[#allocation5 + $0x88] sm:$0xff]  ;;  %v5186_v26 = vpack.c.bf16 %v510_v23, %v506_v21  ;;  %v515_v28 = vld [vmem:[#allocation5 + $0x98] sm:$0xff]  ;;  %v512_v30 = vld [vmem:[#allocation5 + $0x80] sm:$0xff]  ;;  %s5107_s26 = sshll.u32 %s473_s15, 2 }
  0x5d   : > { %v517_v25 = vld [vmem:[#allocation5 + $0xa8] sm:$0xff]  ;;  %5153 = vmatprep.subr.bf16.mxu0 %v5152_v17  ;;  %v519_v29 = vld [vmem:[#allocation5 + $0xb8] sm:$0xff]  ;;  %v516_v32 = vld [vmem:[#allocation5 + $0xa0] sm:$0xff]  ;;  %s475_s9 = scalar_lea.vmem %s8180_s4, %s5107_s26 }
  0x5e   : > { %5185 = vmatprep.subr.bf16.mxu1 %v5184_v18  ;;  %v5156_v27 = vpack.c.bf16 %v517_v25, %v513_v24  ;;  %v5188_v31 = vpack.c.bf16 %v519_v29, %v515_v28  ;;  %v514_v33 = vld [vmem:[#allocation5 + $0x90] sm:$0xff]  ;;  %v5158_v35 = vpack.c.bf16 %v516_v32, %v512_v30  ;;  %v521_v36 = vld [vmem:[#allocation5 + $0xc8] sm:$0xff]  ;;  %v523_v38 = vld [vmem:[#allocation5 + $0xd8] sm:$0xff] }
  0x5f   : > { %v518_v34 = vld [vmem:[#allocation5 + $0xb0] sm:$0xff]  ;;  %v525_v37 = vld [vmem:[#allocation5 + $0xe8] sm:$0xff]  ;;  %v527_v41 = vld [vmem:[#allocation5 + $0xf8] sm:$0xff] }
  0x60   : > { %5155 = vmatpush1.bf16.msra.mxu0 %v5154_v22  ;;  %5187 = vmatpush1.bf16.msra.mxu1 %v5186_v26  ;;  %v5190_v39 = vpack.c.bf16 %v518_v34, %v514_v33  ;;  %v5160_v40 = vpack.c.bf16 %v525_v37, %v521_v36  ;;  %v520_v42 = vld [vmem:[#allocation5 + $0xc0] sm:$0xff]  ;;  %v5192_v44 = vpack.c.bf16 %v527_v41, %v523_v38  ;;  %v522_v45 = vld [vmem:[#allocation5 + $0xd0] sm:$0xff]  ;;  %v529_v47 = vld [vmem:[#allocation5 + $0x108] sm:$0xff] }
  0x61   : > { %5157 = vmatprep.subr.bf16.mxu0 %v5156_v27  ;;  %v524_v43 = vld [vmem:[#allocation5 + $0xe0] sm:$0xff]  ;;  %5189 = vmatprep.subr.bf16.mxu1 %v5188_v31  ;;  %v526_v46 = vld [vmem:[#allocation5 + $0xf0] sm:$0xff]  ;;  %v533_v48 = vld [vmem:[#allocation5 + $0x128] sm:$0xff] }
  0x62   : > { %v531_v49 = vld [vmem:[#allocation5 + $0x118] sm:$0xff]  ;;  %v5162_v51 = vpack.c.bf16 %v524_v43, %v520_v42  ;;  %v5194_v52 = vpack.c.bf16 %v526_v46, %v522_v45  ;;  %v5164_v53 = vpack.c.bf16 %v533_v48, %v529_v47  ;;  %v528_v54 = vld [vmem:[#allocation5 + $0x100] sm:$0xff]  ;;  %v530_v56 = vld [vmem:[#allocation5 + $0x110] sm:$0xff]  ;;  %v562_v42 = vlaneseq }
  0x63   : > { %v535_v50 = vld [vmem:[#allocation5 + $0x138] sm:$0xff]  ;;  %v532_v55 = vld [vmem:[#allocation5 + $0x120] sm:$0xff]  ;;  %v534_v58 = vld [vmem:[#allocation5 + $0x130] sm:$0xff] }
  0x64   : > { %5159 = vmatpush1.bf16.msra.mxu0 %v5158_v35  ;;  %5191 = vmatpush1.bf16.msra.mxu1 %v5190_v39  ;;  %v5196_v57 = vpack.c.bf16 %v535_v50, %v531_v49  ;;  %v537_v59 = vld [vmem:[#allocation5 + $0x148] sm:$0xff]  ;;  %v539_v61 = vld [vmem:[#allocation5 + $0x158] sm:$0xff]  ;;  %v5166_v63 = vpack.c.bf16 %v532_v55, %v528_v54  ;;  %v5198_v1 = vpack.c.bf16 %v534_v58, %v530_v56  ;;  %v536_v3 = vld [vmem:[#allocation5 + $0x140] sm:$0xff]  ;;  %v563_v43 = vshrl.u32 %v562_v42, 7 }
  0x65   : > { %5161 = vmatprep.subr.bf16.mxu0 %v5160_v40  ;;  %5193 = vmatprep.subr.bf16.mxu1 %v5192_v44  ;;  %v541_v60 = vld [vmem:[#allocation5 + $0x168] sm:$0xff]  ;;  %v543_v62 = vld [vmem:[#allocation5 + $0x178] sm:$0xff]  ;;  %v540_v4 = vld [vmem:[#allocation5 + $0x160] sm:$0xff] }
  0x66   : > { %v5168_v2 = vpack.c.bf16 %v541_v60, %v537_v59  ;;  %v538_v5 = vld [vmem:[#allocation5 + $0x150] sm:$0xff]  ;;  %v5200_v6 = vpack.c.bf16 %v543_v62, %v539_v61  ;;  %v545_v8 = vld [vmem:[#allocation5 + $0x188] sm:$0xff]  ;;  %v547_v10 = vld [vmem:[#allocation5 + $0x198] sm:$0xff]  ;;  %v5170_v12 = vpack.c.bf16 %v540_v4, %v536_v3  ;;  %v564_v44 = vsub.s32 0, %v563_v43 }
  0x67   : > { %v542_v7 = vld [vmem:[#allocation5 + $0x170] sm:$0xff]  ;;  %v549_v9 = vld [vmem:[#allocation5 + $0x1a8] sm:$0xff]  ;;  %v551_v11 = vld [vmem:[#allocation5 + $0x1b8] sm:$0xff]  ;;  %v572_v46 = vsub.s32 2, %v563_v43  ;;  %v568_v47 = vsub.s32 1, %v563_v43  ;;  %v576_v48 = vsub.s32 3, %v563_v43 }
  0x68   : > { %5163 = vmatpush1.bf16.msra.mxu0 %v5162_v51  ;;  %5195 = vmatpush1.bf16.msra.mxu1 %v5194_v52  ;;  %v5202_v13 = vpack.c.bf16 %v542_v7, %v538_v5  ;;  %v5172_v14 = vpack.c.bf16 %v549_v9, %v545_v8  ;;  %v544_v15 = vld [vmem:[#allocation5 + $0x180] sm:$0xff]  ;;  %v546_v17 = vld [vmem:[#allocation5 + $0x190] sm:$0xff]  ;;  %v5204_v18 = vpack.c.bf16 %v551_v11, %v547_v10  ;;  %v553_v20 = vld [vmem:[#allocation5 + $0x1c8] sm:$0xff] }
  0x69   : > { %5165 = vmatprep.subr.bf16.mxu0 %v5164_v53  ;;  %5197 = vmatprep.subr.bf16.mxu1 %v5196_v57  ;;  %v548_v16 = vld [vmem:[#allocation5 + $0x1a0] sm:$0xff]  ;;  %v550_v19 = vld [vmem:[#allocation5 + $0x1b0] sm:$0xff]  ;;  %v557_v21 = vld [vmem:[#allocation5 + $0x1e8] sm:$0xff] }
  0x6a   : > { %v555_v22 = vld [vmem:[#allocation5 + $0x1d8] sm:$0xff]  ;;  %v5174_v24 = vpack.c.bf16 %v548_v16, %v544_v15  ;;  %v5206_v25 = vpack.c.bf16 %v550_v19, %v546_v17  ;;  %v5176_v26 = vpack.c.bf16 %v557_v21, %v553_v20  ;;  %v552_v27 = vld [vmem:[#allocation5 + $0x1c0] sm:$0xff]  ;;  %v554_v30 = vld [vmem:[#allocation5 + $0x1d0] sm:$0xff] }
  0x6b   : > { %v559_v23 = vld [vmem:[#allocation5 + $0x1f8] sm:$0xff]  ;;  %v556_v28 = vld [vmem:[#allocation5 + $0x1e0] sm:$0xff]  ;;  %v558_v31 = vld [vmem:[#allocation5 + $0x1f0] sm:$0xff] }
  0x6c   : > { %5167 = vmatpush1.bf16.msra.mxu0 %v5166_v63  ;;  %5199 = vmatpush1.bf16.msra.mxu1 %v5198_v1  ;;  %v5208_v29 = vpack.c.bf16 %v559_v23, %v555_v22  ;;  %v5178_v32 = vpack.c.bf16 %v556_v28, %v552_v27  ;;  %v5210_v33 = vpack.c.bf16 %v558_v31, %v554_v30  ;;  %v488_v34 = vld [vmem:[%s8176_s0] sm:$0xff]  ;;  %v489_v35 = vld [vmem:[%s8176_s0 + $0x8] sm:$0xff]  ;;  %v490_v36 = vld [vmem:[%s8176_s0 + $0x10] sm:$0xff] }
  0x6d   : > { %5169 = vmatprep.subr.bf16.mxu0 %v5168_v2  ;;  %5201 = vmatprep.subr.bf16.mxu1 %v5200_v6  ;;  %v491_v37 = vld [vmem:[%s8176_s0 + $0x18] sm:$0xff]  ;;  %v492_v38 = vld [vmem:[%s8176_s0 + $0x20] sm:$0xff]  ;;  %v493_v39 = vld [vmem:[%s8176_s0 + $0x28] sm:$0xff] }
  0x6e   : > { %v494_v40 = vld [vmem:[%s8176_s0 + $0x30] sm:$0xff]  ;;  %v495_v41 = vld [vmem:[%s8176_s0 + $0x38] sm:$0xff]  ;;  %v560_v45 = vld [vmem:[%s475_s9] sm:$0xf] }
  0x6f   : > { %v6961_v49 = vrot.slane %v560_v45, %v564_v44  ;;  %v6963_v50 = vrot.slane %v560_v45, %v572_v46  ;;  %v6967_v51 = vrot.slane %v560_v45, %v576_v48 }
  0x70   : > { %5171 = vmatpush1.bf16.msra.mxu0 %v5170_v12  ;;  %5203 = vmatpush1.bf16.msra.mxu1 %v5202_v13 }
  0x71   : > { %5173 = vmatprep.subr.bf16.mxu0 %v5172_v14  ;;  %5205 = vmatprep.subr.bf16.mxu1 %v5204_v18 }
  0x74   : > { %5175 = vmatpush1.bf16.msra.mxu0 %v5174_v24  ;;  %5207 = vmatpush1.bf16.msra.mxu1 %v5206_v25 }
  0x75   : > { %5177 = vmatprep.subr.bf16.mxu0 %v5176_v26  ;;  %5209 = vmatprep.subr.bf16.mxu1 %v5208_v29 }
  0x78   : > { %5179 = vmatpush1.bf16.msra.mxu0 %v5178_v32  ;;  %5211 = vmatpush1.bf16.msra.mxu1 %v5210_v33 }
  0x7b   : > { %647 = vmatmul.mubr.f32.vlgmr.msra.gmra.mrb[0].mxu0 %v488_v34  ;;  %760 = vmatmul.mubr.f32.vlgmr.msra.gmra.mrb[0].mxu1 %v488_v34 }
  0x7c   : > { %652 = vmatprep.mubr.f32.mxu0 %v6700_v0  ;;  %765 = vmatprep.mubr.f32.mxu1 %v6700_v0 }
  0x7f   : > { %653 = vmatmul.mubr.f32.gmra.mrb[2].mxu0 %v489_v35  ;;  %766 = vmatmul.mubr.f32.gmra.mrb[2].mxu1 %v489_v35 }
  0x80   : > { %658 = vmatprep.mubr.f32.mxu0 %v6700_v0  ;;  %771 = vmatprep.mubr.f32.mxu1 %v6700_v0 }
  0x83   : > { %659 = vmatmul.mubr.f32.gmra.mrb[4].mxu0 %v490_v36  ;;  %772 = vmatmul.mubr.f32.gmra.mrb[4].mxu1 %v490_v36 }
  0x84   : > { %664 = vmatprep.mubr.f32.mxu0 %v6700_v0  ;;  %777 = vmatprep.mubr.f32.mxu1 %v6700_v0 }
  0x87   : > { %665 = vmatmul.mubr.f32.gmra.mrb[6].mxu0 %v491_v37  ;;  %778 = vmatmul.mubr.f32.gmra.mrb[6].mxu1 %v491_v37 }
  0x88   : > { %670 = vmatprep.mubr.f32.mxu0 %v6700_v0  ;;  %783 = vmatprep.mubr.f32.mxu1 %v6700_v0 }
  0x8b   : > { %671 = vmatmul.mubr.f32.gmra.mrb[8].mxu0 %v492_v38  ;;  %784 = vmatmul.mubr.f32.gmra.mrb[8].mxu1 %v492_v38 }
  0x8c   : > { %676 = vmatprep.mubr.f32.mxu0 %v6700_v0  ;;  %789 = vmatprep.mubr.f32.mxu1 %v6700_v0 }
  0x8f   : > { %677 = vmatmul.mubr.f32.gmra.mrb[10].mxu0 %v493_v39  ;;  %790 = vmatmul.mubr.f32.gmra.mrb[10].mxu1 %v493_v39 }
  0x90   : > { %682 = vmatprep.mubr.f32.mxu0 %v6700_v0  ;;  %795 = vmatprep.mubr.f32.mxu1 %v6700_v0 }
  0x93   : > { %683 = vmatmul.mubr.f32.gmra.mrb[12].mxu0 %v494_v40  ;;  %796 = vmatmul.mubr.f32.gmra.mrb[12].mxu1 %v494_v40 }
  0x94   : > { %688 = vmatprep.mubr.f32.mxu0 %v6700_v0  ;;  %801 = vmatprep.mubr.f32.mxu1 %v6700_v0  ;;  %v6965_v0 = vrot.slane %v560_v45, %v568_v47 }
  0x97   : > { %689 = vmatmul.mubr.f32.gmra.mrb[14].mxu0 %v495_v41  ;;  %802 = vmatmul.mubr.f32.gmra.mrb[14].mxu1 %v495_v41 }
 0x14e   : > { %v648_v52 = vpop.f32.mrb[0].mxu0  ;;  %v761_v54 = vpop.f32.mrb[0].mxu1 }
 0x14f   : > { %v649_v53 = vadd.f32 %v648_v52, %v6961_v49  ;;  %v650_v55 = vpop.f32.mrb[1].mxu0  ;;  %v762_v56 = vadd.f32 %v761_v54, %v6963_v50  ;;  %v763_v58 = vpop.f32.mrb[1].mxu1 }
 0x150   : > { %v651_v57 = vadd.f32 %v650_v55, %v6965_v0  ;;  %v764_v59 = vadd.f32 %v763_v58, %v6967_v51  ;;  %v865_v58 = vld [vmem:[#allocation8 + $0x68] sm:$0xff] (!%p5108_p2) }
 0x151   : > { %808 = vst [vmem:[#allocation2] sm:$0xff] %v649_v53  ;;  %810 = vst [vmem:[#allocation2 + $0x10] sm:$0xff] %v762_v56 }
 0x152   : > { %809 = vst [vmem:[#allocation2 + $0x8] sm:$0xff] %v651_v57  ;;  %v654_v60 = vpop.f32.mrb[2].mxu0  ;;  %811 = vst [vmem:[#allocation2 + $0x18] sm:$0xff] %v764_v59  ;;  %v767_v62 = vpop.f32.mrb[2].mxu1  ;;  %v861_v57 = vld [vmem:[#allocation8 + $0x48] sm:$0xff] (!%p5108_p2)  ;;  %v6701_v59 = vmov (!%p5108_p2), 0.0  }
 0x153   : > { %v655_v61 = vadd.f32 %v654_v60, %v6961_v49  ;;  %v656_v63 = vpop.f32.mrb[3].mxu0  ;;  %v768_v1 = vadd.f32 %v767_v62, %v6963_v50  ;;  %v769_v3 = vpop.f32.mrb[3].mxu1  ;;  %980 = vmatprep.mubr.f32.mxu0 (!%p5108_p2), %v6701_v59  ;;  %1051 = vmatprep.mubr.f32.mxu1 (!%p5108_p2), %v6701_v59  ;;  %v860_v62 = vld [vmem:[#allocation8 + $0x40] sm:$0xff] (!%p5108_p2) }
 0x154   : > { %v657_v2 = vadd.f32 %v656_v63, %v6965_v0  ;;  %v770_v4 = vadd.f32 %v769_v3, %v6967_v51  ;;  %v864_v63 = vld [vmem:[#allocation8 + $0x60] sm:$0xff] (!%p5108_p2)  ;;  %v859_v3 = vld [vmem:[#allocation8 + $0x38] sm:$0xff] (!%p5108_p2) }
 0x155   : > { %812 = vst [vmem:[#allocation2 + $0x20] sm:$0xff] %v655_v61  ;;  %814 = vst [vmem:[#allocation2 + $0x30] sm:$0xff] %v768_v1  ;;  %v7020_v61 = vpack.c.bf16 (!%p5108_p2), %v865_v58, %v861_v57  ;;  %v855_v1 = vld [vmem:[#allocation8 + $0x18] sm:$0xff] (!%p5108_p2)  ;;  %v901_v57 = vld [vmem:[#allocation8 + $0x188] sm:$0xff] (!%p5108_p2) }
 0x156   : > { %813 = vst [vmem:[#allocation2 + $0x28] sm:$0xff] %v657_v2  ;;  %v660_v5 = vpop.f32.mrb[4].mxu0  ;;  %815 = vst [vmem:[#allocation2 + $0x38] sm:$0xff] %v770_v4  ;;  %v773_v7 = vpop.f32.mrb[4].mxu1  ;;  %v6702_v2 = vmov (!%p5108_p2), 0   ;;  %v854_v4 = vld [vmem:[#allocation8 + $0x10] sm:$0xff] (!%p5108_p2) }
 0x157   : > { %v661_v6 = vadd.f32 %v660_v5, %v6961_v49  ;;  %v662_v8 = vpop.f32.mrb[5].mxu0  ;;  %v774_v9 = vadd.f32 %v773_v7, %v6963_v50  ;;  %v775_v11 = vpop.f32.mrb[5].mxu1  ;;  %6324 = vset.pattern.permute.xlu0 (!%p5108_p2), %v6702_v2  ;;  %6325 = vset.pattern.permute.xlu1 (!%p5108_p2), %v6702_v2  ;;  %v858_v5 = vld [vmem:[#allocation8 + $0x30] sm:$0xff] (!%p5108_p2)  ;;  %v7028_v7 = vpack.c.bf16 (!%p5108_p2), %v859_v3, %v855_v1  ;;  %v905_v58 = vld [vmem:[#allocation8 + $0x1a8] sm:$0xff] (!%p5108_p2)  ;;  %v904_v3 = vld [vmem:[#allocation8 + $0x1a0] sm:$0xff] (!%p5108_p2) }
 0x158   : > { %v663_v10 = vadd.f32 %v662_v8, %v6965_v0  ;;  %v776_v12 = vadd.f32 %v775_v11, %v6967_v51  ;;  %v7030_v8 = vpack.c.bf16 (!%p5108_p2), %v858_v5, %v854_v4  ;;  %v868_v11 = vld [vmem:[#allocation8 + $0x80] sm:$0xff] (!%p5108_p2)  ;;  %v894_v5 = vld [vmem:[#allocation8 + $0x150] sm:$0xff] (!%p5108_p2) }
 0x159   : > { %816 = vst [vmem:[#allocation2 + $0x40] sm:$0xff] %v661_v6  ;;  %818 = vst [vmem:[#allocation2 + $0x50] sm:$0xff] %v774_v9  ;;  %v7026_v6 = vpack.c.bf16 (!%p5108_p2), %v864_v63, %v860_v62  ;;  %v869_v9 = vld [vmem:[#allocation8 + $0x88] sm:$0xff] (!%p5108_p2)  ;;  %5245 = vmatprep.subr.bf16.mxu1 (!%p5108_p2), %v7028_v7  ;;  %v900_v63 = vld [vmem:[#allocation8 + $0x180] sm:$0xff] (!%p5108_p2) }
 0x15a   : > { %817 = vst [vmem:[#allocation2 + $0x48] sm:$0xff] %v663_v10  ;;  %v666_v13 = vpop.f32.mrb[6].mxu0  ;;  %819 = vst [vmem:[#allocation2 + $0x58] sm:$0xff] %v776_v12  ;;  %v779_v15 = vpop.f32.mrb[6].mxu1  ;;  %v873_v10 = vld [vmem:[#allocation8 + $0xa8] sm:$0xff] (!%p5108_p2)  ;;  %5247 = vmatpush1.bf16.msra.mxu1 (!%p5108_p2), %v7030_v8 }
 0x15b   : > { %v667_v14 = vadd.f32 %v666_v13, %v6961_v49  ;;  %v668_v16 = vpop.f32.mrb[7].mxu0  ;;  %v780_v17 = vadd.f32 %v779_v15, %v6963_v50  ;;  %v781_v19 = vpop.f32.mrb[7].mxu1  ;;  %v7033_v12 = vpack.c.bf16 (!%p5108_p2), %v873_v10, %v869_v9  ;;  %v872_v13 = vld [vmem:[#allocation8 + $0xa0] sm:$0xff] (!%p5108_p2)  ;;  %v867_v15 = vld [vmem:[#allocation8 + $0x78] sm:$0xff] (!%p5108_p2)  ;;  %v898_v9 = vld [vmem:[#allocation8 + $0x170] sm:$0xff] (!%p5108_p2)  ;;  %v7084_v10 = vpack.c.bf16 (!%p5108_p2), %v905_v58, %v901_v57 }
 0x15c   : > { %v669_v18 = vadd.f32 %v668_v16, %v6965_v0  ;;  %v782_v20 = vadd.f32 %v781_v19, %v6967_v51  ;;  %v877_v19 = vld [vmem:[#allocation8 + $0xc8] sm:$0xff] (!%p5108_p2) }
 0x15d   : > { %820 = vst [vmem:[#allocation2 + $0x60] sm:$0xff] %v667_v14  ;;  %822 = vst [vmem:[#allocation2 + $0x70] sm:$0xff] %v780_v17  ;;  %v863_v14 = vld [vmem:[#allocation8 + $0x58] sm:$0xff] (!%p5108_p2)  ;;  %v862_v17 = vld [vmem:[#allocation8 + $0x50] sm:$0xff] (!%p5108_p2) }
 0x15e   : > { %821 = vst [vmem:[#allocation2 + $0x68] sm:$0xff] %v669_v18  ;;  %v672_v21 = vpop.f32.mrb[8].mxu0  ;;  %823 = vst [vmem:[#allocation2 + $0x78] sm:$0xff] %v782_v20  ;;  %v785_v23 = vpop.f32.mrb[8].mxu1  ;;  %v7036_v16 = vpack.c.bf16 (!%p5108_p2), %v867_v15, %v863_v14  ;;  %v866_v18 = vld [vmem:[#allocation8 + $0x70] sm:$0xff] (!%p5108_p2)  ;;  %v909_v15 = vld [vmem:[#allocation8 + $0x1c8] sm:$0xff] (!%p5108_p2) }
 0x15f   : > { %v673_v22 = vadd.f32 %v672_v21, %v6961_v49  ;;  %v674_v24 = vpop.f32.mrb[9].mxu0  ;;  %v786_v25 = vadd.f32 %v785_v23, %v6963_v50  ;;  %v787_v27 = vpop.f32.mrb[9].mxu1  ;;  %v7039_v20 = vpack.c.bf16 (!%p5108_p2), %v866_v18, %v862_v17  ;;  %v881_v21 = vld [vmem:[#allocation8 + $0xe8] sm:$0xff] (!%p5108_p2)  ;;  %v871_v23 = vld [vmem:[#allocation8 + $0x98] sm:$0xff] (!%p5108_p2)  ;;  %v848_v14 = vld [vmem:[%s8177_s1] sm:$0xff] (!%p5108_p2) }
 0x160   : > { %v675_v26 = vadd.f32 %v674_v24, %v6965_v0  ;;  %v788_v28 = vadd.f32 %v787_v27, %v6967_v51  ;;  %5249 = vmatprep.subr.bf16.mxu1 (!%p5108_p2), %v7036_v16  ;;  %v875_v24 = vld [vmem:[#allocation8 + $0xb8] sm:$0xff] (!%p5108_p2)  ;;  %v876_v27 = vld [vmem:[#allocation8 + $0xc0] sm:$0xff] (!%p5108_p2)  ;;  %v913_v17 = vld [vmem:[#allocation8 + $0x1e8] sm:$0xff] (!%p5108_p2)  ;;  %vm849_vm0 = vcmp.gt.f32.partialorder (!%p5108_p2), %v848_v14, 0.0 }
 0x161   : > { %824 = vst [vmem:[#allocation2 + $0x80] sm:$0xff] %v673_v22  ;;  %826 = vst [vmem:[#allocation2 + $0x90] sm:$0xff] %v786_v25  ;;  %v7042_v22 = vpack.c.bf16 (!%p5108_p2), %v872_v13, %v868_v11  ;;  %v870_v25 = vld [vmem:[#allocation8 + $0x90] sm:$0xff] (!%p5108_p2)  ;;  %5251 = vmatpush1.bf16.msra.mxu1 (!%p5108_p2), %v7039_v20  ;;  %v903_v11 = vld [vmem:[#allocation8 + $0x198] sm:$0xff] (!%p5108_p2) }
 0x162   : > { %825 = vst [vmem:[#allocation2 + $0x88] sm:$0xff] %v675_v26  ;;  %v678_v29 = vpop.f32.mrb[10].mxu0  ;;  %827 = vst [vmem:[#allocation2 + $0x98] sm:$0xff] %v788_v28  ;;  %v791_v31 = vpop.f32.mrb[10].mxu1  ;;  %v7046_v26 = vpack.c.bf16 (!%p5108_p2), %v881_v21, %v877_v19  ;;  %v880_v28 = vld [vmem:[#allocation8 + $0xe0] sm:$0xff] (!%p5108_p2)  ;;  %v907_v13 = vld [vmem:[#allocation8 + $0x1b8] sm:$0xff] (!%p5108_p2)  ;;  %v7093_v19 = vpack.c.bf16 (!%p5108_p2), %v898_v9, %v894_v5 }
 0x163   : > { %v679_v30 = vadd.f32 %v678_v29, %v6961_v49  ;;  %v680_v32 = vpop.f32.mrb[11].mxu0  ;;  %v792_v33 = vadd.f32 %v791_v31, %v6963_v50  ;;  %v793_v35 = vpop.f32.mrb[11].mxu1  ;;  %v7048_v29 = vpack.c.bf16 (!%p5108_p2), %v875_v24, %v871_v23  ;;  %v885_v31 = vld [vmem:[#allocation8 + $0x108] sm:$0xff] (!%p5108_p2)  ;;  %v5109_v18 = vld [vmem:[%s8177_s1 + $0x8] sm:$0xff] (!%p5108_p2)  ;;  %v908_v21 = vld [vmem:[#allocation8 + $0x1c0] sm:$0xff] (!%p5108_p2)  ;;  %v1080_v23 = vsel (!%p5108_p2), %vm849_vm0, 1, %v6702_v2 }
 0x164   : > { %v681_v34 = vadd.f32 %v680_v32, %v6965_v0  ;;  %v794_v36 = vadd.f32 %v793_v35, %v6967_v51  ;;  %v889_v32 = vld [vmem:[#allocation8 + $0x128] sm:$0xff] (!%p5108_p2)  ;;  %v883_v35 = vld [vmem:[#allocation8 + $0xf8] sm:$0xff] (!%p5108_p2)  ;;  %vm1098_vm1 = vcmp.gt.f32.partialorder (!%p5108_p2), %v5109_v18, 0.0  ;;  %v7097_v24 = vpack.c.bf16 (!%p5108_p2), %v904_v3, %v900_v63  ;;  %1082 = vperm.xlu0 (!%p5108_p2), %6324, %v1080_v23   ;;  %v846_v63 = vld [vmem:[#allocation2 + $0x10] sm:$0xff] (!%p5108_p2) }
 0x165   : > { %828 = vst [vmem:[#allocation2 + $0xa0] sm:$0xff] %v679_v30  ;;  %830 = vst [vmem:[#allocation2 + $0xb0] sm:$0xff] %v792_v33  ;;  %v874_v30 = vld [vmem:[#allocation8 + $0xb0] sm:$0xff] (!%p5108_p2)  ;;  %v879_v33 = vld [vmem:[#allocation8 + $0xd8] sm:$0xff] (!%p5108_p2)  ;;  %5253 = vmatprep.subr.bf16.mxu1 (!%p5108_p2), %v7048_v29 }
 0x166   : > { %829 = vst [vmem:[#allocation2 + $0xa8] sm:$0xff] %v681_v34  ;;  %v684_v37 = vpop.f32.mrb[12].mxu0  ;;  %831 = vst [vmem:[#allocation2 + $0xb8] sm:$0xff] %v794_v36  ;;  %v797_v39 = vpop.f32.mrb[12].mxu1  ;;  %v7051_v34 = vpack.c.bf16 (!%p5108_p2), %v874_v30, %v870_v25  ;;  %v7054_v36 = vpack.c.bf16 (!%p5108_p2), %v880_v28, %v876_v27  ;;  %v7100_v25 = vpack.c.bf16 (!%p5108_p2), %v907_v13, %v903_v11  ;;  %v902_v27 = vld [vmem:[#allocation8 + $0x190] sm:$0xff] (!%p5108_p2) }
 0x167   : > { %v685_v38 = vadd.f32 %v684_v37, %v6961_v49  ;;  %v686_v40 = vpop.f32.mrb[13].mxu0  ;;  %v798_v41 = vadd.f32 %v797_v39, %v6963_v50  ;;  %v799_v43 = vpop.f32.mrb[13].mxu1  ;;  %v884_v37 = vld [vmem:[#allocation8 + $0x100] sm:$0xff] (!%p5108_p2)  ;;  %v878_v39 = vld [vmem:[#allocation8 + $0xd0] sm:$0xff] (!%p5108_p2) }
 0x168   : > { %v687_v42 = vadd.f32 %v686_v40, %v6965_v0  ;;  %v800_v44 = vadd.f32 %v799_v43, %v6967_v51  ;;  %843 = sbr.rel (%p5108_p2) target bundleno = 2400 (0x960), region = 56  ;;  %v882_v40 = vld [vmem:[#allocation8 + $0xf0] sm:$0xff] (!%p5108_p2)  ;;  %v887_v43 = vld [vmem:[#allocation8 + $0x118] sm:$0xff] (!%p5108_p2)  ;;  %5255 = vmatpush1.bf16.msra.mxu1 (!%p5108_p2), %v7051_v34 }
 0x169   : > { %832 = vst [vmem:[#allocation2 + $0xc0] sm:$0xff] %v685_v38  ;;  %834 = vst [vmem:[#allocation2 + $0xd0] sm:$0xff] %v798_v41  ;;  %v7057_v38 = vpack.c.bf16 (!%p5108_p2), %v883_v35, %v879_v33  ;;  %v7060_v41 = vpack.c.bf16 (!%p5108_p2), %v889_v32, %v885_v31  ;;  %v906_v28 = vld [vmem:[#allocation8 + $0x1b0] sm:$0xff] (!%p5108_p2)  ;;  %v7106_v31 = vpack.c.bf16 (!%p5108_p2), %v913_v17, %v909_v15  ;;  %v912_v32 = vld [vmem:[#allocation8 + $0x1e0] sm:$0xff] (!%p5108_p2) }
 0x16a   : > { %833 = vst [vmem:[#allocation2 + $0xc8] sm:$0xff] %v687_v42  ;;  %v690_v45 = vpop.f32.mrb[14].mxu0  ;;  %835 = vst [vmem:[#allocation2 + $0xd8] sm:$0xff] %v800_v44  ;;  %v803_v47 = vpop.f32.mrb[14].mxu1  ;;  %v888_v42 = vld [vmem:[#allocation8 + $0x120] sm:$0xff] (!%p5108_p2)  ;;  %v891_v44 = vld [vmem:[#allocation8 + $0x138] sm:$0xff] (!%p5108_p2) }
 0x16b   : > { %v691_v46 = vadd.f32 %v690_v45, %v6961_v49  ;;  %v692_v48 = vpop.f32.mrb[15].mxu0  ;;  %v804_v52 = vadd.f32 %v803_v47, %v6963_v50  ;;  %v805_v54 = vpop.f32.mrb[15].mxu1  ;;  %v853_v49 = vld [vmem:[#allocation8 + $0x8] sm:$0xff] (!%p5108_p2)  ;;  %v7063_v47 = vpack.c.bf16 (!%p5108_p2), %v882_v40, %v878_v39  ;;  %5257 = vmatprep.subr.bf16.mxu1 (!%p5108_p2), %v7057_v38  ;;  %v5115_v30 = vld [vmem:[%s8177_s1 + $0x20] sm:$0xff] (!%p5108_p2)  ;;  %v911_v33 = vld [vmem:[#allocation8 + $0x1d8] sm:$0xff] (!%p5108_p2)  ;;  %v7110_v39 = vpack.c.bf16 (!%p5108_p2), %v906_v28, %v902_v27 }
 0x16c   : > { %v693_v53 = vadd.f32 %v692_v48, %v6965_v0  ;;  %v806_v55 = vadd.f32 %v805_v54, %v6967_v51  ;;  %v857_v50 = vld [vmem:[#allocation8 + $0x28] sm:$0xff] (!%p5108_p2)  ;;  %v852_v0 = vld [vmem:[#allocation8] sm:$0xff] (!%p5108_p2)  ;;  %v7066_v48 = vpack.c.bf16 (!%p5108_p2), %v888_v42, %v884_v37  ;;  %v886_v54 = vld [vmem:[#allocation8 + $0x110] sm:$0xff] (!%p5108_p2)  ;;  %v1329_v37 = vsel (!%p5108_p2), %vm1098_vm1, 1, %v6702_v2 }
 0x16d   : > { %836 = vst [vmem:[#allocation2 + $0xe0] sm:$0xff] %v691_v46  ;;  %838 = vst [vmem:[#allocation2 + $0xf0] sm:$0xff] %v804_v52  ;;  %v7014_v56 = vpack.c.bf16 (!%p5108_p2), %v857_v50, %v853_v49  ;;  %v856_v51 = vld [vmem:[#allocation8 + $0x20] sm:$0xff] (!%p5108_p2)  ;;  %v893_v45 = vld [vmem:[#allocation8 + $0x148] sm:$0xff] (!%p5108_p2)  ;;  %5259 = vmatpush1.bf16.msra.mxu1 (!%p5108_p2), %v7063_v47  ;;  %vm1848_vm2 = vcmp.gt.f32.partialorder (!%p5108_p2), %v5115_v30, 0.0  ;;  %v7113_v40 = vpack.c.bf16 (!%p5108_p2), %v912_v32, %v908_v21  ;;  %1331 = vperm.xlu0 (!%p5108_p2), %6324, %v1329_v37  }
 0x16e   : > { %837 = vst [vmem:[#allocation2 + $0xe8] sm:$0xff] %v693_v53  ;;  %839 = vst [vmem:[#allocation2 + $0xf8] sm:$0xff] %v806_v55  ;;  %v7018_v60 = vpack.c.bf16 (!%p5108_p2), %v856_v51, %v852_v0  ;;  %v897_v46 = vld [vmem:[#allocation8 + $0x168] sm:$0xff] (!%p5108_p2)  ;;  %v892_v52 = vld [vmem:[#allocation8 + $0x140] sm:$0xff] (!%p5108_p2)  ;;  %v7069_v53 = vpack.c.bf16 (!%p5108_p2), %v891_v44, %v887_v43 }
 0x16f   : > { %5213 = vmatprep.subr.bf16.mxu0 %v7014_v56  ;;  %v890_v55 = vld [vmem:[#allocation8 + $0x130] sm:$0xff]  ;;  %v7072_v49 = vpack.c.bf16 %v897_v46, %v893_v45  ;;  %v896_v50 = vld [vmem:[#allocation8 + $0x160] sm:$0xff]  ;;  %v895_v0 = vld [vmem:[#allocation8 + $0x158] sm:$0xff]  ;;  %v2079_v46 = vsel %vm1848_vm2, 1, %v6702_v2 }
 0x170   : > { %5215 = vmatpush1.bf16.msra.mxu0 %v7018_v60  ;;  %v899_v51 = vld [vmem:[#allocation8 + $0x178] sm:$0xff]  ;;  %v7075_v62 = vpack.c.bf16 %v890_v55, %v886_v54  ;;  %v7078_v1 = vpack.c.bf16 %v896_v50, %v892_v52  ;;  %5261 = vmatprep.subr.bf16.mxu1 %v7069_v53  ;;  %v910_v43 = vld [vmem:[#allocation8 + $0x1d0] sm:$0xff]  ;;  %v5119_v45 = vld [vmem:[%s8177_s1 + $0x30] sm:$0xff] }
 0x171   : > { %5217 = vmatprep.subr.bf16.mxu0 %v7020_v61  ;;  %v7081_v4 = vpack.c.bf16 %v899_v51, %v895_v0  ;;  %v915_v35 = vld [vmem:[#allocation8 + $0x1f8] sm:$0xff]  ;;  %v914_v44 = vld [vmem:[#allocation8 + $0x1f0] sm:$0xff]  ;;  %vm2348_vm3 = vcmp.gt.f32.partialorder %v5119_v45, 0.0  ;;  %2081 = vperm.xlu0 %6324, %v2079_v46   ;;  %v847_v15 = vld [vmem:[#allocation2 + $0x18] sm:$0xff] }
 0x172   : > { %5263 = vmatpush1.bf16.msra.mxu1 %v7075_v62  ;;  %v7116_v42 = vpack.c.bf16 %v915_v35, %v911_v33  ;;  %v7124_v52 = vpack.c.bf16 %v914_v44, %v910_v43  ;;  %v7127_v54 = vld [vmem:[#allocation3] sm:$0xff]  ;;  %v2579_v55 = vsel %vm2348_vm3, 1, %v6702_v2  ;;  %v845_v0 = vld [vmem:[#allocation2 + $0x8] sm:$0xff] }
 0x173   : > { %5265 = vmatprep.subr.bf16.mxu1 %v7081_v4  ;;  %v844_v50 = vld [vmem:[#allocation2] sm:$0xff]  ;;  %v851_v30 = vld [vmem:[#allocation4] sm:$0xff] }
 0x174   : > { %5219 = vmatpush1.bf16.msra.mxu0 %v7026_v6 }
 0x175   : > { %5221 = vmatprep.subr.bf16.mxu0 %v7033_v12  ;;  %2581 = vperm.xlu0 %6324, %v2579_v55  }
 0x176   : > { %5267 = vmatpush1.bf16.msra.mxu1 %v7093_v19 }
 0x177   : > { %5269 = vmatprep.subr.bf16.mxu1 %v7100_v25 }
 0x178   : > { %5223 = vmatpush1.bf16.msra.mxu0 %v7042_v22 }
 0x179   : > { %5225 = vmatprep.subr.bf16.mxu0 %v7046_v26 }
 0x17a   : > { %5271 = vmatpush1.bf16.msra.mxu1 %v7110_v39 }
 0x17b   : > { %5273 = vmatprep.subr.bf16.mxu1 %v7116_v42 }
 0x17c   : > { %5227 = vmatpush1.bf16.msra.mxu0 %v7054_v36 }
 0x17d   : > { %5229 = vmatprep.subr.bf16.mxu0 %v7060_v41 }
 0x17e   : > { %5275 = vmatpush1.bf16.msra.mxu1 %v7124_v52 }
 0x17f   : > { %5309 = vmatprep.subr.bf16.mxu1 %v7028_v7 }
 0x180   : > { %5231 = vmatpush1.bf16.msra.mxu0 %v7066_v48 }
 0x181   : > { %5233 = vmatprep.subr.bf16.mxu0 %v7072_v49  ;;  %1052 = vmatmul.mubr.f32.vlgmr.msra.gmra.mrb[0].mxu1 %v7127_v54 }
 0x182   : > { %5311 = vmatpush1.bf16.msra.mxu1 %v7030_v8  ;;  %1300 = vmatprep.mubr.f32.mxu1 %v6701_v59 }
 0x183   : > { %5313 = vmatprep.subr.bf16.mxu1 %v7036_v16 }
 0x184   : > { %5235 = vmatpush1.bf16.msra.mxu0 %v7078_v1 }
 0x185   : > { %5237 = vmatprep.subr.bf16.mxu0 %v7084_v10 }
 0x186   : > { %5315 = vmatpush1.bf16.msra.mxu1 %v7039_v20 }
 0x187   : > { %5317 = vmatprep.subr.bf16.mxu1 %v7048_v29 }
 0x188   : > { %5239 = vmatpush1.bf16.msra.mxu0 %v7097_v24 }
 0x189   : > { %5241 = vmatprep.subr.bf16.mxu0 %v7106_v31 }
 0x18a   : > { %5319 = vmatpush1.bf16.msra.mxu1 %v7051_v34 }
 0x18b   : > { %5321 = vmatprep.subr.bf16.mxu1 %v7057_v38 }
 0x18c   : > { %5243 = vmatpush1.bf16.msra.mxu0 %v7113_v40 }
 0x18d   : > { %5277 = vmatprep.subr.bf16.mxu0 %v7014_v56 }
 0x18e   : > { %5323 = vmatpush1.bf16.msra.mxu1 %v7063_v47 }
 0x18f   : > { %981 = vmatmul.mubr.f32.vlgmr.msra.gmra.mrb[0].mxu0 %v7127_v54  ;;  %5325 = vmatprep.subr.bf16.mxu1 %v7069_v53 }
 0x190   : > { %5279 = vmatpush1.bf16.msra.mxu0 %v7018_v60  ;;  %1229 = vmatprep.mubr.f32.mxu0 %v6701_v59 }
 0x191   : > { %5281 = vmatprep.subr.bf16.mxu0 %v7020_v61 }
 0x192   : > { %5327 = vmatpush1.bf16.msra.mxu1 %v7075_v62 }
 0x193   : > { %5329 = vmatprep.subr.bf16.mxu1 %v7081_v4 }
 0x194   : > { %5283 = vmatpush1.bf16.msra.mxu0 %v7026_v6 }
 0x195   : > { %5285 = vmatprep.subr.bf16.mxu0 %v7033_v12 }
 0x196   : > { %5331 = vmatpush1.bf16.msra.mxu1 %v7093_v19 }
 0x197   : > { %5333 = vmatprep.subr.bf16.mxu1 %v7100_v25 }
 0x198   : > { %5287 = vmatpush1.bf16.msra.mxu0 %v7042_v22 }
 0x199   : > { %5289 = vmatprep.subr.bf16.mxu0 %v7046_v26 }
 0x19a   : > { %5335 = vmatpush1.bf16.msra.mxu1 %v7110_v39 }
 0x19b   : > { %5337 = vmatprep.subr.bf16.mxu1 %v7116_v42 }
 0x19c   : > { %5291 = vmatpush1.bf16.msra.mxu0 %v7054_v36 }
 0x19d   : > { %5293 = vmatprep.subr.bf16.mxu0 %v7060_v41 }
 0x19e   : > { %5339 = vmatpush1.bf16.msra.mxu1 %v7124_v52 }
 0x19f   : > { %5373 = vmatprep.subr.bf16.mxu1 %v7028_v7 }
 0x1a0   : > { %5295 = vmatpush1.bf16.msra.mxu0 %v7066_v48 }
 0x1a1   : > { %5297 = vmatprep.subr.bf16.mxu0 %v7072_v49 }
 0x1a4   : > { %5299 = vmatpush1.bf16.msra.mxu0 %v7078_v1 }
 0x1a5   : > { %5301 = vmatprep.subr.bf16.mxu0 %v7084_v10 }
 0x1a8   : > { %5303 = vmatpush1.bf16.msra.mxu0 %v7097_v24 }
 0x1a9   : > { %5305 = vmatprep.subr.bf16.mxu0 %v7106_v31 }
 0x1ac   : > { %5307 = vmatpush1.bf16.msra.mxu0 %v7113_v40 }
 0x1ad   : > { %5341 = vmatprep.subr.bf16.mxu0 %v7014_v56 }
 0x1e3   : > { %v1083_v33 = vpop.permute.xlu0 %1082 }
 0x1e4   : > { %vm1084_vm4 = vcmp.eq.s32.totalorder %v1083_v33, 1  ;;  %v1603_v33 = vld [vmem:[#allocation8 + $0x10] sm:$0xff] }
 0x254   : > { %v1053_v9 = vpop.f32.mrb[0].mxu1 }
 0x255   : > { %v1060_v13 = vadd.f32 %v1053_v9, %v846_v63  ;;  %v1055_v14 = vpop.f32.mrb[1].mxu1 }
 0x256   : > { %v1061_v56 = vadd.f32 %v1055_v14, %v847_v15 }
 0x258   : > { %v1071_v17 = vmul.f32 0.5, %v1061_v56 }
 0x262   : > { %v982_v51 = vpop.f32.mrb[0].mxu0 }
 0x263   : > { %v1058_v57 = vadd.f32 %v982_v51, %v844_v50  ;;  %v984_v58 = vpop.f32.mrb[1].mxu0 }
 0x264   : > { %v1059_v3 = vadd.f32 %v984_v58, %v845_v0  ;;  %v1332_v58 = vpop.permute.xlu0 %1331 }
 0x265   : > { %v1062_v5 = vmul.f32 0.5, %v1058_v57  ;;  %vm1333_vm9 = vcmp.eq.s32.totalorder %v1332_v58, 1  ;;  %v1633_v58 = vld [vmem:[#allocation8 + $0x100] sm:$0xff] }
 0x266   : > { %v1066_v11 = vmul.f32 0.5, %v1059_v3 }
 0x267   : > { %6326 = vtanh.f32 %v1062_v5 }
 0x268   : > { %6328 = vtanh.f32 %v1066_v11 }
 0x269   : > { %6330 = vtanh.f32 %v1060_v13 }
 0x26a   : > { %6332 = vtanh.f32 %v1071_v17  ;;  %v1602_v17 = vld [vmem:[#allocation8 + $0x8] sm:$0xff] }
 0x271   : > { %v6327_v18 = vpop.eup %6326 }
 0x272   : > { %v6329_v7 = vpop.eup %6328  ;;  %v1064_v21 = vmul.f32 0.5, %v6327_v18  ;;  %v1606_v18 = vld [vmem:[#allocation8 + $0x28] sm:$0xff] }
 0x273   : > { %v6331_v23 = vpop.eup %6330  ;;  %v1068_v27 = vmul.f32 0.5, %v6329_v7  ;;  %v1604_v7 = vld [vmem:[#allocation8 + $0x18] sm:$0xff] }
 0x274   : > { %v1065_v28 = vadd.f32 0.5, %v1064_v21  ;;  %v6333_v45 = vpop.eup %6332  ;;  %v7238_v21 = vpack.c.bf16 %v1606_v18, %v1602_v17  ;;  %v1646_v17 = vld [vmem:[#allocation8 + $0x168] sm:$0xff]  ;;  %v1644_v18 = vld [vmem:[#allocation8 + $0x158] sm:$0xff] }
 0x275   : > { %v1069_v32 = vadd.f32 0.5, %v1068_v27  ;;  %v1073_v46 = vmul.f32 0.5, %v6333_v45  ;;  %v1601_v27 = vld [vmem:[#allocation8] sm:$0xff]  ;;  %v1612_v45 = vld [vmem:[#allocation8 + $0x58] sm:$0xff] }
 0x276   : > { %v1076_v35 = vmul.f32 %v6331_v23, %v1065_v28  ;;  %v1608_v23 = vld [vmem:[#allocation8 + $0x38] sm:$0xff]  ;;  %v1605_v28 = vld [vmem:[#allocation8 + $0x20] sm:$0xff] }
 0x277   : > { %v1075_v37 = vmul.f32 %v1069_v32, %v851_v30  ;;  %v1074_v55 = vadd.f32 0.5, %v1073_v46  ;;  %v7242_v32 = vpack.c.bf16 %v1605_v28, %v1601_v27  ;;  %v1641_v27 = vld [vmem:[#allocation8 + $0x140] sm:$0xff] }
 0x278   : > { %v1645_v28 = vld [vmem:[#allocation8 + $0x160] sm:$0xff] }
 0x279   : > { %v1077_v43 = vadd.f32 %v1076_v35, %v1075_v37  ;;  %v1607_v35 = vld [vmem:[#allocation8 + $0x30] sm:$0xff] }
 0x27a   : > { %v7245_v37 = vpack.c.bf16 %v1607_v35, %v1603_v33  ;;  %v7302_v35 = vpack.c.bf16 %v1645_v28, %v1641_v27 }
 0x27b   : > { %6334 = vtanh.f32 %v1077_v43  ;;  %v7170_v44 = vsel %vm1084_vm4, %v1077_v43, %v851_v30  ;;  %v7240_v30 = vpack.c.bf16 %v1608_v23, %v1604_v7  ;;  %v1610_v43 = vld [vmem:[#allocation8 + $0x48] sm:$0xff]  ;;  %v1648_v23 = vld [vmem:[#allocation8 + $0x178] sm:$0xff] }
 0x27c   : > { %v7300_v33 = vpack.c.bf16 %v1648_v23, %v1644_v18  ;;  %v1344_v18 = vld [vmem:[#allocation2 + $0x50] sm:$0xff] }
 0x285   : > { %v6335_v50 = vpop.eup %6334 }
 0x286   : > { %v1079_v0 = vmul.f32 %v6335_v50, %v1074_v55  ;;  %v1616_v55 = vld [vmem:[#allocation8 + $0x78] sm:$0xff]  ;;  %v1609_v50 = vld [vmem:[#allocation8 + $0x40] sm:$0xff] }
 0x288   : > { %v7173_v51 = vsel %vm1084_vm4, %v1079_v0, %v7127_v54  ;;  %v1089_v57 = vsel %vm1084_vm4, %v1079_v0, 0.0  ;;  %v1613_v0 = vld [vmem:[#allocation8 + $0x60] sm:$0xff] }
 0x289   : > { %1090 = vst [vmem:[%s7003_s14] sm:$0xff] %v1089_v57  ;;  %1230 = vmatmul.mubr.f32.vlgmr.msra.gmra.mrb[2].mxu0 %v7173_v51  ;;  %1301 = vmatmul.mubr.f32.vlgmr.msra.gmra.mrb[2].mxu1 %v7173_v51  ;;  %v7254_v57 = vpack.c.bf16 %v1613_v0, %v1609_v50  ;;  %v1654_v50 = vld [vmem:[#allocation8 + $0x1a8] sm:$0xff]  ;;  %v1652_v0 = vld [vmem:[#allocation8 + $0x198] sm:$0xff] }
 0x28a   : > { %5343 = vmatpush1.bf16.msra.mxu0 %v7018_v60  ;;  %5375 = vmatpush1.bf16.msra.mxu1 %v7030_v8  ;;  %v5111_v60 = vld [vmem:[%s8177_s1 + $0x10] sm:$0xff]  ;;  %v5117_v8 = vld [vmem:[%s8177_s1 + $0x28] sm:$0xff] }
 0x28b   : > { %5345 = vmatprep.subr.bf16.mxu0 %v7020_v61  ;;  %5377 = vmatprep.subr.bf16.mxu1 %v7036_v16  ;;  %v5113_v61 = vld [vmem:[%s8177_s1 + $0x18] sm:$0xff]  ;;  %vm1348_vm5 = vcmp.gt.f32.partialorder %v5111_v60, 0.0  ;;  %vm2098_vm7 = vcmp.gt.f32.partialorder %v5117_v8, 0.0  ;;  %v1611_v60 = vld [vmem:[#allocation8 + $0x50] sm:$0xff] }
 0x28c   : > { %1479 = vmatprep.mubr.f32.mxu0 %v6701_v59  ;;  %1550 = vmatprep.mubr.f32.mxu1 %v6701_v59  ;;  %vm1598_vm6 = vcmp.gt.f32.partialorder %v5113_v61, 0.0  ;;  %v5121_v16 = vld [vmem:[%s8177_s1 + $0x38] sm:$0xff]  ;;  %v1615_v61 = vld [vmem:[#allocation8 + $0x70] sm:$0xff] }
 0x28d   : > { %vm2598_vm8 = vcmp.gt.f32.partialorder %v5121_v16, 0.0  ;;  %v1618_v8 = vld [vmem:[#allocation8 + $0x88] sm:$0xff]  ;;  %v1620_v16 = vld [vmem:[#allocation8 + $0x98] sm:$0xff] }
 0x28e   : > { %5347 = vmatpush1.bf16.msra.mxu0 %v7026_v6  ;;  %5379 = vmatpush1.bf16.msra.mxu1 %v7039_v20  ;;  %v1579_v6 = vsel %vm1348_vm5, 1, %v6702_v2  ;;  %v2329_v20 = vsel %vm2098_vm7, 1, %v6702_v2 }
 0x28f   : > { %5349 = vmatprep.subr.bf16.mxu0 %v7033_v12  ;;  %5381 = vmatprep.subr.bf16.mxu1 %v7048_v29  ;;  %v1829_v12 = vsel %vm1598_vm6, 1, %v6702_v2  ;;  %v1093_v29 = vld [vmem:[#allocation2 + $0x28] sm:$0xff] }
 0x290   : > { %1581 = vperm.xlu1 %6325, %v1579_v6   ;;  %v7257_v6 = vpack.c.bf16 %v1615_v61, %v1611_v60  ;;  %v1656_v61 = vld [vmem:[#allocation8 + $0x1b8] sm:$0xff] }
 0x292   : > { %5351 = vmatpush1.bf16.msra.mxu0 %v7042_v22  ;;  %5383 = vmatpush1.bf16.msra.mxu1 %v7051_v34  ;;  %v2829_v22 = vsel %vm2598_vm8, 1, %v6702_v2 }
 0x293   : > { %5353 = vmatprep.subr.bf16.mxu0 %v7046_v26  ;;  %5385 = vmatprep.subr.bf16.mxu1 %v7057_v38  ;;  %v1092_v26 = vld [vmem:[#allocation2 + $0x20] sm:$0xff] }
 0x294   : > { %1831 = vperm.xlu1 %6325, %v1829_v12   ;;  %v1622_v12 = vld [vmem:[#allocation8 + $0xa8] sm:$0xff] }
 0x296   : > { %5355 = vmatpush1.bf16.msra.mxu0 %v7054_v36  ;;  %5387 = vmatpush1.bf16.msra.mxu1 %v7063_v47 }
 0x297   : > { %5357 = vmatprep.subr.bf16.mxu0 %v7060_v41  ;;  %5389 = vmatprep.subr.bf16.mxu1 %v7069_v53 }
 0x298   : > { %2331 = vperm.xlu1 %6325, %v2329_v20   ;;  %v7262_v20 = vpack.c.bf16 %v1622_v12, %v1618_v8  ;;  %v1649_v8 = vld [vmem:[#allocation8 + $0x180] sm:$0xff] }
 0x299   : > { %v1653_v12 = vld [vmem:[#allocation8 + $0x1a0] sm:$0xff] }
 0x29a   : > { %5359 = vmatpush1.bf16.msra.mxu0 %v7066_v48  ;;  %5391 = vmatpush1.bf16.msra.mxu1 %v7075_v62  ;;  %v1094_v48 = vld [vmem:[#allocation2 + $0x30] sm:$0xff] }
 0x29b   : > { %5361 = vmatprep.subr.bf16.mxu0 %v7072_v49  ;;  %5393 = vmatprep.subr.bf16.mxu1 %v7081_v4  ;;  %v1095_v4 = vld [vmem:[#allocation2 + $0x38] sm:$0xff] }
 0x29c   : > { %2831 = vperm.xlu1 %6325, %v2829_v22   ;;  %v1624_v22 = vld [vmem:[#allocation8 + $0xb8] sm:$0xff] }
 0x29e   : > { %5363 = vmatpush1.bf16.msra.mxu0 %v7078_v1  ;;  %5395 = vmatpush1.bf16.msra.mxu1 %v7093_v19 }
 0x29f   : > { %5365 = vmatprep.subr.bf16.mxu0 %v7084_v10  ;;  %5397 = vmatprep.subr.bf16.mxu1 %v7100_v25 }
 0x2a2   : > { %5367 = vmatpush1.bf16.msra.mxu0 %v7097_v24  ;;  %5399 = vmatpush1.bf16.msra.mxu1 %v7110_v39 }
 0x2a3   : > { %5369 = vmatprep.subr.bf16.mxu0 %v7106_v31  ;;  %5401 = vmatprep.subr.bf16.mxu1 %v7116_v42 }
 0x2a6   : > { %5371 = vmatpush1.bf16.msra.mxu0 %v7113_v40  ;;  %5403 = vmatpush1.bf16.msra.mxu1 %v7124_v52 }
 0x2a7   : > { %5405 = vmatprep.subr.bf16.mxu0 %v7238_v21  ;;  %5437 = vmatprep.subr.bf16.mxu1 %v7240_v30 }
 0x35c   : > { %v1231_v34 = vpop.f32.mrb[2].mxu0  ;;  %v1302_v36 = vpop.f32.mrb[2].mxu1 }
 0x35d   : > { %v1307_v38 = vadd.f32 %v1231_v34, %v1092_v26  ;;  %v1233_v41 = vpop.f32.mrb[3].mxu0  ;;  %v1304_v47 = vpop.f32.mrb[3].mxu1  ;;  %v1309_v1 = vadd.f32 %v1302_v36, %v1094_v48  ;;  %v1617_v26 = vld [vmem:[#allocation8 + $0x80] sm:$0xff]  ;;  %v7264_v34 = vpack.c.bf16 %v1624_v22, %v1620_v16  ;;  %v1626_v48 = vld [vmem:[#allocation8 + $0xc8] sm:$0xff]  ;;  %v7312_v16 = vpack.c.bf16 %v1656_v61, %v1652_v0 }
 0x35e   : > { %v1308_v53 = vadd.f32 %v1233_v41, %v1093_v29  ;;  %v1310_v10 = vadd.f32 %v1304_v47, %v1095_v4  ;;  %v1621_v29 = vld [vmem:[#allocation8 + $0xa0] sm:$0xff]  ;;  %v1623_v41 = vld [vmem:[#allocation8 + $0xb0] sm:$0xff]  ;;  %v7314_v22 = vpack.c.bf16 %v1653_v12, %v1649_v8 }
 0x35f   : > { %v1311_v49 = vmul.f32 0.5, %v1307_v38  ;;  %v7266_v36 = vpack.c.bf16 %v1621_v29, %v1617_v26  ;;  %v1619_v38 = vld [vmem:[#allocation8 + $0x90] sm:$0xff]  ;;  %v1625_v4 = vld [vmem:[#allocation8 + $0xc0] sm:$0xff] }
 0x360   : > { %v1315_v62 = vmul.f32 0.5, %v1308_v53  ;;  %v1320_v19 = vmul.f32 0.5, %v1310_v10  ;;  %v7269_v47 = vpack.c.bf16 %v1623_v41, %v1619_v38  ;;  %v1630_v53 = vld [vmem:[#allocation8 + $0xe8] sm:$0xff]  ;;  %v1629_v10 = vld [vmem:[#allocation8 + $0xe0] sm:$0xff]  ;;  %v1651_v26 = vld [vmem:[#allocation8 + $0x190] sm:$0xff] }
 0x361   : > { %6336 = vtanh.f32 %v1311_v49  ;;  %v1628_v49 = vld [vmem:[#allocation8 + $0xd8] sm:$0xff]  ;;  %v1655_v29 = vld [vmem:[#allocation8 + $0x1b0] sm:$0xff]  ;;  %v1658_v41 = vld [vmem:[#allocation8 + $0x1c8] sm:$0xff] }
 0x362   : > { %6338 = vtanh.f32 %v1315_v62  ;;  %v7274_v62 = vpack.c.bf16 %v1630_v53, %v1626_v48  ;;  %v7317_v38 = vpack.c.bf16 %v1655_v29, %v1651_v26  ;;  %v1662_v48 = vld [vmem:[#allocation8 + $0x1e8] sm:$0xff]  ;;  %v1660_v53 = vld [vmem:[#allocation8 + $0x1d8] sm:$0xff] }
 0x363   : > { %6340 = vtanh.f32 %v1309_v1  ;;  %v1632_v1 = vld [vmem:[#allocation8 + $0xf8] sm:$0xff] }
 0x364   : > { %6342 = vtanh.f32 %v1320_v19  ;;  %v7276_v19 = vpack.c.bf16 %v1632_v1, %v1628_v49  ;;  %v7322_v49 = vpack.c.bf16 %v1662_v48, %v1658_v41  ;;  %v1664_v1 = vld [vmem:[#allocation8 + $0x1f8] sm:$0xff]  ;;  %v1582_v48 = vpop.permute.xlu1 %1581 }
 0x365   : > { %vm1583_vm10 = vcmp.eq.s32.totalorder %v1582_v48, 1 }
 0x36b   : > { %v6337_v2 = vpop.eup %6336 }
 0x36c   : > { %v6339_v24 = vpop.eup %6338  ;;  %v1313_v25 = vmul.f32 0.5, %v6337_v2  ;;  %v7278_v2 = vpack.c.bf16 %v1629_v10, %v1625_v4  ;;  %v1657_v4 = vld [vmem:[#allocation8 + $0x1c0] sm:$0xff] }
 0x36d   : > { %v1317_v31 = vmul.f32 0.5, %v6339_v24  ;;  %v6341_v40 = vpop.eup %6340  ;;  %v1627_v24 = vld [vmem:[#allocation8 + $0xd0] sm:$0xff]  ;;  %v1661_v10 = vld [vmem:[#allocation8 + $0x1e0] sm:$0xff] }
 0x36e   : > { %v1314_v39 = vadd.f32 0.5, %v1313_v25  ;;  %v6343_v5 = vpop.eup %6342  ;;  %v1631_v25 = vld [vmem:[#allocation8 + $0xf0] sm:$0xff] }
 0x36f   : > { %v1318_v42 = vadd.f32 0.5, %v1317_v31  ;;  %v1322_v9 = vmul.f32 0.5, %v6343_v5  ;;  %v7281_v31 = vpack.c.bf16 %v1631_v25, %v1627_v24  ;;  %v7324_v24 = vpack.c.bf16 %v1664_v1, %v1660_v53 }
 0x370   : > { %v1325_v52 = vmul.f32 %v6341_v40, %v1314_v39  ;;  %v1634_v39 = vld [vmem:[#allocation8 + $0x108] sm:$0xff]  ;;  %v7326_v25 = vpack.c.bf16 %v1661_v10, %v1657_v4 }
 0x371   : > { %v1324_v54 = vmul.f32 %v1318_v42, %v7170_v44  ;;  %v1323_v11 = vadd.f32 0.5, %v1322_v9  ;;  %v1638_v40 = vld [vmem:[#allocation8 + $0x128] sm:$0xff]  ;;  %v1636_v42 = vld [vmem:[#allocation8 + $0x118] sm:$0xff] }
 0x373   : > { %v1326_v63 = vadd.f32 %v1325_v52, %v1324_v54  ;;  %v7286_v52 = vpack.c.bf16 %v1638_v40, %v1634_v39  ;;  %v1640_v54 = vld [vmem:[#allocation8 + $0x138] sm:$0xff]  ;;  %v1659_v39 = vld [vmem:[#allocation8 + $0x1d0] sm:$0xff] }
 0x374   : > { %v7288_v5 = vpack.c.bf16 %v1640_v54, %v1636_v42  ;;  %v1663_v40 = vld [vmem:[#allocation8 + $0x1f0] sm:$0xff] }
 0x375   : > { %6344 = vtanh.f32 %v1326_v63  ;;  %v7228_v3 = vsel %vm1333_vm9, %v1326_v63, %v7170_v44  ;;  %v1614_v44 = vld [vmem:[#allocation8 + $0x68] sm:$0xff]  ;;  %v1637_v63 = vld [vmem:[#allocation8 + $0x120] sm:$0xff]  ;;  %v7329_v42 = vpack.c.bf16 %v1663_v40, %v1659_v39  ;;  %v1342_v54 = vld [vmem:[#allocation2 + $0x40] sm:$0xff] }
 0x376   : > { %v7250_v46 = vpack.c.bf16 %v1614_v44, %v1610_v43  ;;  %v7290_v9 = vpack.c.bf16 %v1637_v63, %v1633_v58  ;;  %v1643_v43 = vld [vmem:[#allocation8 + $0x150] sm:$0xff]  ;;  %v1343_v58 = vld [vmem:[#allocation2 + $0x48] sm:$0xff] }
 0x377   : > { %v1647_v44 = vld [vmem:[#allocation8 + $0x170] sm:$0xff] }
 0x37f   : > { %v6345_v13 = vpop.eup %6344 }
 0x380   : > { %v1328_v14 = vmul.f32 %v6345_v13, %v1323_v11  ;;  %v1635_v11 = vld [vmem:[#allocation8 + $0x110] sm:$0xff] }
 0x381   : > { %v1639_v13 = vld [vmem:[#allocation8 + $0x130] sm:$0xff] }
 0x382   : > { %v7231_v15 = vsel %vm1333_vm9, %v1328_v14, %v7173_v51  ;;  %v1338_v56 = vsel %vm1333_vm9, %v1328_v14, 0.0  ;;  %v7252_v51 = vpack.c.bf16 %v1616_v55, %v1612_v45  ;;  %v7293_v14 = vpack.c.bf16 %v1639_v13, %v1635_v11  ;;  %v1650_v55 = vld [vmem:[#allocation8 + $0x188] sm:$0xff] }
 0x383   : > { %5110 = vst [vmem:[%s7003_s14 + $0x8] sm:$0xff] %v1338_v56  ;;  %1480 = vmatmul.mubr.f32.vlgmr.msra.gmra.mrb[4].mxu0 %v7231_v15  ;;  %1551 = vmatmul.mubr.f32.vlgmr.msra.gmra.mrb[4].mxu1 %v7231_v15  ;;  %v1642_v56 = vld [vmem:[#allocation8 + $0x148] sm:$0xff]  ;;  %v7305_v45 = vpack.c.bf16 %v1647_v44, %v1643_v43  ;;  %v7310_v60 = vpack.c.bf16 %v1654_v50, %v1650_v55 }
 0x384   : > { %1729 = vmatprep.mubr.f32.mxu0 %v6701_v59  ;;  %1800 = vmatprep.mubr.f32.mxu1 %v6701_v59  ;;  %v7298_v7 = vpack.c.bf16 %v1646_v17, %v1642_v56  ;;  %v1345_v44 = vld [vmem:[#allocation2 + $0x58] sm:$0xff] }
 0x385   : > { %5407 = vmatpush1.bf16.msra.mxu0 %v7242_v32  ;;  %5439 = vmatpush1.bf16.msra.mxu1 %v7245_v37 }
 0x386   : > { %5409 = vmatprep.subr.bf16.mxu0 %v7250_v46  ;;  %5441 = vmatprep.subr.bf16.mxu1 %v7252_v51 }
 0x389   : > { %5411 = vmatpush1.bf16.msra.mxu0 %v7254_v57  ;;  %5443 = vmatpush1.bf16.msra.mxu1 %v7257_v6 }
 0x38a   : > { %5413 = vmatprep.subr.bf16.mxu0 %v7262_v20  ;;  %5445 = vmatprep.subr.bf16.mxu1 %v7264_v34 }
 0x38d   : > { %5415 = vmatpush1.bf16.msra.mxu0 %v7266_v36  ;;  %5447 = vmatpush1.bf16.msra.mxu1 %v7269_v47 }
 0x38e   : > { %5417 = vmatprep.subr.bf16.mxu0 %v7274_v62  ;;  %5449 = vmatprep.subr.bf16.mxu1 %v7276_v19 }
 0x391   : > { %5419 = vmatpush1.bf16.msra.mxu0 %v7278_v2  ;;  %5451 = vmatpush1.bf16.msra.mxu1 %v7281_v31 }
 0x392   : > { %5421 = vmatprep.subr.bf16.mxu0 %v7286_v52  ;;  %5453 = vmatprep.subr.bf16.mxu1 %v7288_v5 }
 0x395   : > { %5423 = vmatpush1.bf16.msra.mxu0 %v7290_v9  ;;  %5455 = vmatpush1.bf16.msra.mxu1 %v7293_v14 }
 0x396   : > { %5425 = vmatprep.subr.bf16.mxu0 %v7298_v7  ;;  %5457 = vmatprep.subr.bf16.mxu1 %v7300_v33 }
 0x399   : > { %5427 = vmatpush1.bf16.msra.mxu0 %v7302_v35  ;;  %5459 = vmatpush1.bf16.msra.mxu1 %v7305_v45 }
 0x39a   : > { %5429 = vmatprep.subr.bf16.mxu0 %v7310_v60  ;;  %5461 = vmatprep.subr.bf16.mxu1 %v7312_v16 }
 0x39d   : > { %5431 = vmatpush1.bf16.msra.mxu0 %v7314_v22  ;;  %5463 = vmatpush1.bf16.msra.mxu1 %v7317_v38 }
 0x39e   : > { %5433 = vmatprep.subr.bf16.mxu0 %v7322_v49  ;;  %5465 = vmatprep.subr.bf16.mxu1 %v7324_v24 }
 0x3a1   : > { %5435 = vmatpush1.bf16.msra.mxu0 %v7326_v25  ;;  %5467 = vmatpush1.bf16.msra.mxu1 %v7329_v42 }
 0x3a2   : > { %5469 = vmatprep.subr.bf16.mxu0 %v7238_v21  ;;  %5501 = vmatprep.subr.bf16.mxu1 %v7240_v30 }
 0x456   : > { %v1481_v63 = vpop.f32.mrb[4].mxu0  ;;  %v1552_v11 = vpop.f32.mrb[4].mxu1 }
 0x457   : > { %v1557_v13 = vadd.f32 %v1481_v63, %v1342_v54  ;;  %v1483_v56 = vpop.f32.mrb[5].mxu0  ;;  %v1554_v17 = vpop.f32.mrb[5].mxu1  ;;  %v1559_v43 = vadd.f32 %v1552_v11, %v1344_v18 }
 0x458   : > { %v1558_v23 = vadd.f32 %v1483_v56, %v1343_v58  ;;  %v1560_v55 = vadd.f32 %v1554_v17, %v1345_v44 }
 0x459   : > { %v1561_v27 = vmul.f32 0.5, %v1557_v13 }
 0x45a   : > { %v1565_v28 = vmul.f32 0.5, %v1558_v23  ;;  %v1570_v50 = vmul.f32 0.5, %v1560_v55 }
 0x45b   : > { %6346 = vtanh.f32 %v1561_v27 }
 0x45c   : > { %6348 = vtanh.f32 %v1565_v28  ;;  %v1594_v28 = vld [vmem:[#allocation2 + $0x70] sm:$0xff] }
 0x45d   : > { %6350 = vtanh.f32 %v1559_v43 }
 0x45e   : > { %6352 = vtanh.f32 %v1570_v50 }
 0x465   : > { %v6347_v0 = vpop.eup %6346 }
 0x466   : > { %v6349_v61 = vpop.eup %6348  ;;  %v1563_v8 = vmul.f32 0.5, %v6347_v0  ;;  %v1595_v0 = vld [vmem:[#allocation2 + $0x78] sm:$0xff] }
 0x467   : > { %v1567_v12 = vmul.f32 0.5, %v6349_v61  ;;  %v6351_v29 = vpop.eup %6350 }
 0x468   : > { %v1564_v26 = vadd.f32 0.5, %v1563_v8  ;;  %v6353_v39 = vpop.eup %6352 }
 0x469   : > { %v1568_v41 = vadd.f32 0.5, %v1567_v12  ;;  %v1572_v40 = vmul.f32 0.5, %v6353_v39 }
 0x46a   : > { %v1575_v53 = vmul.f32 %v6351_v29, %v1564_v26 }
 0x46b   : > { %v1574_v1 = vmul.f32 %v1568_v41, %v7228_v3  ;;  %v1573_v54 = vadd.f32 0.5, %v1572_v40 }
 0x46d   : > { %v1576_v4 = vadd.f32 %v1575_v53, %v1574_v1 }
 0x46f   : > { %6354 = vtanh.f32 %v1576_v4  ;;  %v7338_v10 = vsel %vm1583_vm10, %v1576_v4, %v7228_v3  ;;  %v1592_v3 = vld [vmem:[#allocation2 + $0x60] sm:$0xff]  ;;  %v1832_v4 = vpop.permute.xlu1 %1831 }
 0x470   : > { %vm1833_vm11 = vcmp.eq.s32.totalorder %v1832_v4, 1  ;;  %v2351_v4 = vld [vmem:[#allocation8] sm:$0xff] }
 0x479   : > { %v6355_v58 = vpop.eup %6354 }
 0x47a   : > { %v1578_v63 = vmul.f32 %v6355_v58, %v1573_v54 }
 0x47c   : > { %v7341_v11 = vsel %vm1583_vm10, %v1578_v63, %v7231_v15  ;;  %v1588_v13 = vsel %vm1583_vm10, %v1578_v63, 0.0  ;;  %v1593_v15 = vld [vmem:[#allocation2 + $0x68] sm:$0xff] }
 0x47d   : > { %5112 = vst [vmem:[%s7003_s14 + $0x10] sm:$0xff] %v1588_v13  ;;  %1730 = vmatmul.mubr.f32.vlgmr.msra.gmra.mrb[6].mxu0 %v7341_v11  ;;  %1801 = vmatmul.mubr.f32.vlgmr.msra.gmra.mrb[6].mxu1 %v7341_v11 }
 0x47e   : > { %5471 = vmatpush1.bf16.msra.mxu0 %v7242_v32  ;;  %5503 = vmatpush1.bf16.msra.mxu1 %v7245_v37 }
 0x47f   : > { %5473 = vmatprep.subr.bf16.mxu0 %v7250_v46  ;;  %5505 = vmatprep.subr.bf16.mxu1 %v7252_v51 }
 0x480   : > { %1979 = vmatprep.mubr.f32.mxu0 %v6701_v59  ;;  %2050 = vmatprep.mubr.f32.mxu1 %v6701_v59 }
 0x482   : > { %5475 = vmatpush1.bf16.msra.mxu0 %v7254_v57  ;;  %5507 = vmatpush1.bf16.msra.mxu1 %v7257_v6 }
 0x483   : > { %5477 = vmatprep.subr.bf16.mxu0 %v7262_v20  ;;  %5509 = vmatprep.subr.bf16.mxu1 %v7264_v34 }
 0x486   : > { %5479 = vmatpush1.bf16.msra.mxu0 %v7266_v36  ;;  %5511 = vmatpush1.bf16.msra.mxu1 %v7269_v47 }
 0x487   : > { %5481 = vmatprep.subr.bf16.mxu0 %v7274_v62  ;;  %5513 = vmatprep.subr.bf16.mxu1 %v7276_v19 }
 0x48a   : > { %5483 = vmatpush1.bf16.msra.mxu0 %v7278_v2  ;;  %5515 = vmatpush1.bf16.msra.mxu1 %v7281_v31 }
 0x48b   : > { %5485 = vmatprep.subr.bf16.mxu0 %v7286_v52  ;;  %5517 = vmatprep.subr.bf16.mxu1 %v7288_v5 }
 0x48e   : > { %5487 = vmatpush1.bf16.msra.mxu0 %v7290_v9  ;;  %5519 = vmatpush1.bf16.msra.mxu1 %v7293_v14 }
 0x48f   : > { %5489 = vmatprep.subr.bf16.mxu0 %v7298_v7  ;;  %5521 = vmatprep.subr.bf16.mxu1 %v7300_v33 }
 0x492   : > { %5491 = vmatpush1.bf16.msra.mxu0 %v7302_v35  ;;  %5523 = vmatpush1.bf16.msra.mxu1 %v7305_v45 }
 0x493   : > { %5493 = vmatprep.subr.bf16.mxu0 %v7310_v60  ;;  %5525 = vmatprep.subr.bf16.mxu1 %v7312_v16 }
 0x496   : > { %5495 = vmatpush1.bf16.msra.mxu0 %v7314_v22  ;;  %5527 = vmatpush1.bf16.msra.mxu1 %v7317_v38 }
 0x497   : > { %5497 = vmatprep.subr.bf16.mxu0 %v7322_v49  ;;  %5529 = vmatprep.subr.bf16.mxu1 %v7324_v24 }
 0x49a   : > { %5499 = vmatpush1.bf16.msra.mxu0 %v7326_v25  ;;  %5531 = vmatpush1.bf16.msra.mxu1 %v7329_v42 }
 0x49b   : > { %5533 = vmatprep.subr.bf16.mxu0 %v7238_v21  ;;  %5565 = vmatprep.subr.bf16.mxu1 %v7240_v30 }
 0x550   : > { %v1731_v56 = vpop.f32.mrb[6].mxu0  ;;  %v1802_v17 = vpop.f32.mrb[6].mxu1 }
 0x551   : > { %v1807_v18 = vadd.f32 %v1731_v56, %v1592_v3  ;;  %v1733_v23 = vpop.f32.mrb[7].mxu0  ;;  %v1804_v27 = vpop.f32.mrb[7].mxu1  ;;  %v1809_v50 = vadd.f32 %v1802_v17, %v1594_v28 }
 0x552   : > { %v1808_v43 = vadd.f32 %v1733_v23, %v1593_v15  ;;  %v1810_v61 = vadd.f32 %v1804_v27, %v1595_v0 }
 0x553   : > { %v1811_v44 = vmul.f32 0.5, %v1807_v18 }
 0x554   : > { %v1815_v55 = vmul.f32 0.5, %v1808_v43  ;;  %v1820_v21 = vmul.f32 0.5, %v1810_v61 }
 0x555   : > { %6356 = vtanh.f32 %v1811_v44  ;;  %v2082_v44 = vpop.permute.xlu0 %2081 }
 0x556   : > { %6358 = vtanh.f32 %v1815_v55  ;;  %vm2083_vm12 = vcmp.eq.s32.totalorder %v2082_v44, 1 }
 0x557   : > { %6360 = vtanh.f32 %v1809_v50 }
 0x558   : > { %6362 = vtanh.f32 %v1820_v21 }
 0x55f   : > { %v6357_v8 = vpop.eup %6356 }
 0x560   : > { %v6359_v30 = vpop.eup %6358  ;;  %v1813_v12 = vmul.f32 0.5, %v6357_v8 }
 0x561   : > { %v1817_v26 = vmul.f32 0.5, %v6359_v30  ;;  %v6361_v41 = vpop.eup %6360 }
 0x562   : > { %v1814_v29 = vadd.f32 0.5, %v1813_v12  ;;  %v6363_v54 = vpop.eup %6362 }
 0x563   : > { %v1818_v48 = vadd.f32 0.5, %v1817_v26  ;;  %v1822_v58 = vmul.f32 0.5, %v6363_v54 }
 0x564   : > { %v1825_v53 = vmul.f32 %v6361_v41, %v1814_v29  ;;  %v2352_v29 = vld [vmem:[#allocation8 + $0x8] sm:$0xff] }
 0x565   : > { %v1824_v1 = vmul.f32 %v1818_v48, %v7338_v10  ;;  %v1823_v63 = vadd.f32 0.5, %v1822_v58  ;;  %v2356_v41 = vld [vmem:[#allocation8 + $0x28] sm:$0xff]  ;;  %v2354_v48 = vld [vmem:[#allocation8 + $0x18] sm:$0xff]  ;;  %v2353_v58 = vld [vmem:[#allocation8 + $0x10] sm:$0xff] }
 0x567   : > { %v1826_v39 = vadd.f32 %v1825_v53, %v1824_v1  ;;  %v7434_v53 = vpack.c.bf16 %v2356_v41, %v2352_v29  ;;  %v2358_v1 = vld [vmem:[#allocation8 + $0x38] sm:$0xff]  ;;  %v2384_v41 = vld [vmem:[#allocation8 + $0x108] sm:$0xff] }
 0x569   : > { %6364 = vtanh.f32 %v1826_v39  ;;  %v7382_v40 = vsel %vm1833_vm11, %v1826_v39, %v7338_v10  ;;  %v2355_v39 = vld [vmem:[#allocation8 + $0x20] sm:$0xff] }
 0x56a   : > { %v7438_v54 = vpack.c.bf16 %v2355_v39, %v2351_v4  ;;  %v2390_v39 = vld [vmem:[#allocation8 + $0x138] sm:$0xff] }
 0x573   : > { %v6365_v13 = vpop.eup %6364 }
 0x574   : > { %v1828_v3 = vmul.f32 %v6365_v13, %v1823_v63  ;;  %v2357_v63 = vld [vmem:[#allocation8 + $0x30] sm:$0xff] }
 0x575   : > { %v7441_v13 = vpack.c.bf16 %v2357_v63, %v2353_v58 }
 0x576   : > { %v7385_v15 = vsel %vm1833_vm11, %v1828_v3, %v7341_v11  ;;  %v1838_v56 = vsel %vm1833_vm11, %v1828_v3, 0.0  ;;  %v2360_v3 = vld [vmem:[#allocation8 + $0x48] sm:$0xff] }
 0x577   : > { %5114 = vst [vmem:[%s7003_s14 + $0x18] sm:$0xff] %v1838_v56  ;;  %1980 = vmatmul.mubr.f32.vlgmr.msra.gmra.mrb[8].mxu0 %v7385_v15  ;;  %2051 = vmatmul.mubr.f32.vlgmr.msra.gmra.mrb[8].mxu1 %v7385_v15  ;;  %v2362_v56 = vld [vmem:[#allocation8 + $0x58] sm:$0xff] }
 0x578   : > { %5535 = vmatpush1.bf16.msra.mxu0 %v7242_v32  ;;  %5567 = vmatpush1.bf16.msra.mxu1 %v7245_v37  ;;  %v1842_v32 = vld [vmem:[#allocation2 + $0x80] sm:$0xff]  ;;  %v1843_v37 = vld [vmem:[#allocation2 + $0x88] sm:$0xff] }
 0x579   : > { %5537 = vmatprep.subr.bf16.mxu0 %v7250_v46  ;;  %5569 = vmatprep.subr.bf16.mxu1 %v7252_v51 }
 0x57a   : > { %2229 = vmatprep.mubr.f32.mxu0 %v6701_v59  ;;  %2300 = vmatprep.mubr.f32.mxu1 %v6701_v59 }
 0x57c   : > { %5539 = vmatpush1.bf16.msra.mxu0 %v7254_v57  ;;  %5571 = vmatpush1.bf16.msra.mxu1 %v7257_v6 }
 0x57d   : > { %5541 = vmatprep.subr.bf16.mxu0 %v7262_v20  ;;  %5573 = vmatprep.subr.bf16.mxu1 %v7264_v34  ;;  %v1844_v34 = vld [vmem:[#allocation2 + $0x90] sm:$0xff] }
 0x580   : > { %5543 = vmatpush1.bf16.msra.mxu0 %v7266_v36  ;;  %5575 = vmatpush1.bf16.msra.mxu1 %v7269_v47 }
 0x581   : > { %5545 = vmatprep.subr.bf16.mxu0 %v7274_v62  ;;  %5577 = vmatprep.subr.bf16.mxu1 %v7276_v19 }
 0x584   : > { %5547 = vmatpush1.bf16.msra.mxu0 %v7278_v2  ;;  %5579 = vmatpush1.bf16.msra.mxu1 %v7281_v31  ;;  %v1845_v2 = vld [vmem:[#allocation2 + $0x98] sm:$0xff] }
 0x585   : > { %5549 = vmatprep.subr.bf16.mxu0 %v7286_v52  ;;  %5581 = vmatprep.subr.bf16.mxu1 %v7288_v5 }
 0x588   : > { %5551 = vmatpush1.bf16.msra.mxu0 %v7290_v9  ;;  %5583 = vmatpush1.bf16.msra.mxu1 %v7293_v14 }
 0x589   : > { %5553 = vmatprep.subr.bf16.mxu0 %v7298_v7  ;;  %5585 = vmatprep.subr.bf16.mxu1 %v7300_v33 }
 0x58c   : > { %5555 = vmatpush1.bf16.msra.mxu0 %v7302_v35  ;;  %5587 = vmatpush1.bf16.msra.mxu1 %v7305_v45 }
 0x58d   : > { %5557 = vmatprep.subr.bf16.mxu0 %v7310_v60  ;;  %5589 = vmatprep.subr.bf16.mxu1 %v7312_v16 }
 0x590   : > { %5559 = vmatpush1.bf16.msra.mxu0 %v7314_v22  ;;  %5591 = vmatpush1.bf16.msra.mxu1 %v7317_v38 }
 0x591   : > { %5561 = vmatprep.subr.bf16.mxu0 %v7322_v49  ;;  %5593 = vmatprep.subr.bf16.mxu1 %v7324_v24 }
 0x594   : > { %5563 = vmatpush1.bf16.msra.mxu0 %v7326_v25  ;;  %5595 = vmatpush1.bf16.msra.mxu1 %v7329_v42 }
 0x595   : > { %5597 = vmatprep.subr.bf16.mxu0 %v7434_v53 }
 0x64a   : > { %v1981_v46 = vpop.f32.mrb[8].mxu0  ;;  %v2052_v51 = vpop.f32.mrb[8].mxu1 }
 0x64b   : > { %v2057_v57 = vadd.f32 %v1981_v46, %v1842_v32  ;;  %v1983_v6 = vpop.f32.mrb[9].mxu0  ;;  %v2054_v20 = vpop.f32.mrb[9].mxu1  ;;  %v2059_v19 = vadd.f32 %v2052_v51, %v1844_v34  ;;  %v2359_v46 = vld [vmem:[#allocation8 + $0x40] sm:$0xff]  ;;  %v2365_v34 = vld [vmem:[#allocation8 + $0x70] sm:$0xff] }
 0x64c   : > { %v2058_v36 = vadd.f32 %v1983_v6, %v1843_v37  ;;  %v2060_v31 = vadd.f32 %v2054_v20, %v1845_v2  ;;  %v2366_v37 = vld [vmem:[#allocation8 + $0x78] sm:$0xff]  ;;  %v2363_v51 = vld [vmem:[#allocation8 + $0x60] sm:$0xff]  ;;  %v2361_v20 = vld [vmem:[#allocation8 + $0x50] sm:$0xff] }
 0x64d   : > { %v2061_v47 = vmul.f32 0.5, %v2057_v57  ;;  %v7448_v57 = vpack.c.bf16 %v2366_v37, %v2362_v56  ;;  %v7450_v6 = vpack.c.bf16 %v2363_v51, %v2359_v46 }
 0x64e   : > { %v2065_v62 = vmul.f32 0.5, %v2058_v36  ;;  %v2070_v52 = vmul.f32 0.5, %v2060_v31  ;;  %v7453_v36 = vpack.c.bf16 %v2365_v34, %v2361_v20  ;;  %v2374_v31 = vld [vmem:[#allocation8 + $0xb8] sm:$0xff]  ;;  %v2332_v34 = vpop.permute.xlu1 %2331 }
 0x64f   : > { %6366 = vtanh.f32 %v2061_v47  ;;  %v2368_v47 = vld [vmem:[#allocation8 + $0x88] sm:$0xff]  ;;  %vm2333_vm13 = vcmp.eq.s32.totalorder %v2332_v34, 1 }
 0x650   : > { %6368 = vtanh.f32 %v2065_v62  ;;  %v2372_v62 = vld [vmem:[#allocation8 + $0xa8] sm:$0xff] }
 0x651   : > { %6370 = vtanh.f32 %v2059_v19  ;;  %v2370_v19 = vld [vmem:[#allocation8 + $0x98] sm:$0xff]  ;;  %v7458_v2 = vpack.c.bf16 %v2372_v62, %v2368_v47  ;;  %v2345_v34 = vld [vmem:[#allocation2 + $0xd8] sm:$0xff] }
 0x652   : > { %6372 = vtanh.f32 %v2070_v52  ;;  %v2367_v52 = vld [vmem:[#allocation8 + $0x80] sm:$0xff] }
 0x659   : > { %v6367_v5 = vpop.eup %6366 }
 0x65a   : > { %v6369_v10 = vpop.eup %6368  ;;  %v2063_v11 = vmul.f32 0.5, %v6367_v5  ;;  %v2371_v5 = vld [vmem:[#allocation8 + $0xa0] sm:$0xff] }
 0x65b   : > { %v2067_v17 = vmul.f32 0.5, %v6369_v10  ;;  %v6371_v23 = vpop.eup %6370  ;;  %v7460_v10 = vpack.c.bf16 %v2374_v31, %v2370_v19 }
 0x65c   : > { %v2064_v18 = vadd.f32 0.5, %v2063_v11  ;;  %v6373_v0 = vpop.eup %6372  ;;  %v7462_v11 = vpack.c.bf16 %v2371_v5, %v2367_v52 }
 0x65d   : > { %v2068_v27 = vadd.f32 0.5, %v2067_v17  ;;  %v2072_v61 = vmul.f32 0.5, %v6373_v0  ;;  %v2369_v17 = vld [vmem:[#allocation8 + $0x90] sm:$0xff]  ;;  %v2375_v0 = vld [vmem:[#allocation8 + $0xc0] sm:$0xff] }
 0x65e   : > { %v2075_v28 = vmul.f32 %v6371_v23, %v2064_v18  ;;  %v2373_v18 = vld [vmem:[#allocation8 + $0xb0] sm:$0xff] }
 0x65f   : > { %v2074_v43 = vmul.f32 %v2068_v27, %v7382_v40  ;;  %v2073_v21 = vadd.f32 0.5, %v2072_v61  ;;  %v7465_v23 = vpack.c.bf16 %v2373_v18, %v2369_v17  ;;  %v2376_v27 = vld [vmem:[#allocation8 + $0xc8] sm:$0xff]  ;;  %v2379_v61 = vld [vmem:[#allocation8 + $0xe0] sm:$0xff] }
 0x661   : > { %v2076_v55 = vadd.f32 %v2075_v28, %v2074_v43  ;;  %v2380_v28 = vld [vmem:[#allocation8 + $0xe8] sm:$0xff]  ;;  %v2378_v43 = vld [vmem:[#allocation8 + $0xd8] sm:$0xff] }
 0x662   : > { %v7470_v44 = vpack.c.bf16 %v2380_v28, %v2376_v27 }
 0x663   : > { %6374 = vtanh.f32 %v2076_v55  ;;  %v7424_v50 = vsel %vm2083_vm12, %v2076_v55, %v7382_v40  ;;  %v7436_v40 = vpack.c.bf16 %v2358_v1, %v2354_v48  ;;  %v2382_v55 = vld [vmem:[#allocation8 + $0xf8] sm:$0xff]  ;;  %v2388_v48 = vld [vmem:[#allocation8 + $0x128] sm:$0xff] }
 0x664   : > { %v2386_v1 = vld [vmem:[#allocation8 + $0x118] sm:$0xff]  ;;  %v7482_v4 = vpack.c.bf16 %v2388_v48, %v2384_v41  ;;  %v2653_v41 = vld [vmem:[#allocation8 + $0x1a0] sm:$0xff] }
 0x665   : > { %5629 = vmatprep.subr.bf16.mxu1 %v7436_v40  ;;  %v7484_v58 = vpack.c.bf16 %v2390_v39, %v2386_v1  ;;  %v2655_v39 = vld [vmem:[#allocation8 + $0x1b0] sm:$0xff] }
 0x66d   : > { %v6375_v8 = vpop.eup %6374 }
 0x66e   : > { %v2078_v30 = vmul.f32 %v6375_v8, %v2073_v21  ;;  %v7472_v21 = vpack.c.bf16 %v2382_v55, %v2378_v43  ;;  %v7474_v8 = vpack.c.bf16 %v2379_v61, %v2375_v0  ;;  %v2647_v55 = vld [vmem:[#allocation8 + $0x170] sm:$0xff]  ;;  %v2650_v61 = vld [vmem:[#allocation8 + $0x188] sm:$0xff] }
 0x670   : > { %v7427_v12 = vsel %vm2083_vm12, %v2078_v30, %v7385_v15  ;;  %v2088_v26 = vsel %vm2083_vm12, %v2078_v30, 0.0  ;;  %v2364_v15 = vld [vmem:[#allocation8 + $0x68] sm:$0xff]  ;;  %v2377_v30 = vld [vmem:[#allocation8 + $0xd0] sm:$0xff] }
 0x671   : > { %5116 = vst [vmem:[%s7003_s14 + $0x20] sm:$0xff] %v2088_v26  ;;  %2230 = vmatmul.mubr.f32.vlgmr.msra.gmra.mrb[10].mxu0 %v7427_v12  ;;  %2301 = vmatmul.mubr.f32.vlgmr.msra.gmra.mrb[10].mxu1 %v7427_v12  ;;  %v7446_v32 = vpack.c.bf16 %v2364_v15, %v2360_v3  ;;  %v2381_v26 = vld [vmem:[#allocation8 + $0xf0] sm:$0xff] }
 0x672   : > { %2479 = vmatprep.mubr.f32.mxu0 %v6701_v59  ;;  %2550 = vmatprep.mubr.f32.mxu1 %v6701_v59  ;;  %v7477_v29 = vpack.c.bf16 %v2381_v26, %v2377_v30  ;;  %v2656_v26 = vld [vmem:[#allocation8 + $0x1b8] sm:$0xff] }
 0x673   : > { %5599 = vmatpush1.bf16.msra.mxu0 %v7438_v54  ;;  %5631 = vmatpush1.bf16.msra.mxu1 %v7441_v13 }
 0x674   : > { %5601 = vmatprep.subr.bf16.mxu0 %v7446_v32  ;;  %5633 = vmatprep.subr.bf16.mxu1 %v7448_v57 }
 0x677   : > { %5603 = vmatpush1.bf16.msra.mxu0 %v7450_v6  ;;  %5635 = vmatpush1.bf16.msra.mxu1 %v7453_v36 }
 0x678   : > { %5605 = vmatprep.subr.bf16.mxu0 %v7458_v2  ;;  %5637 = vmatprep.subr.bf16.mxu1 %v7460_v10 }
 0x67b   : > { %5607 = vmatpush1.bf16.msra.mxu0 %v7462_v11  ;;  %5639 = vmatpush1.bf16.msra.mxu1 %v7465_v23 }
 0x67c   : > { %5609 = vmatprep.subr.bf16.mxu0 %v7470_v44  ;;  %5641 = vmatprep.subr.bf16.mxu1 %v7472_v21 }
 0x67f   : > { %5611 = vmatpush1.bf16.msra.mxu0 %v7474_v8  ;;  %5643 = vmatpush1.bf16.msra.mxu1 %v7477_v29 }
 0x680   : > { %5613 = vmatprep.subr.bf16.mxu0 %v7482_v4  ;;  %5645 = vmatprep.subr.bf16.mxu1 %v7484_v58 }
 0x683   : > { %5615 = vmatpush1.bf16.msra.mxu0 %v7290_v9  ;;  %5647 = vmatpush1.bf16.msra.mxu1 %v7293_v14  ;;  %v2092_v9 = vld [vmem:[#allocation2 + $0xa0] sm:$0xff]  ;;  %v2093_v14 = vld [vmem:[#allocation2 + $0xa8] sm:$0xff] }
 0x684   : > { %5617 = vmatprep.subr.bf16.mxu0 %v7298_v7  ;;  %5649 = vmatprep.subr.bf16.mxu1 %v7300_v33 }
 0x687   : > { %5619 = vmatpush1.bf16.msra.mxu0 %v7302_v35  ;;  %5651 = vmatpush1.bf16.msra.mxu1 %v7305_v45 }
 0x688   : > { %5621 = vmatprep.subr.bf16.mxu0 %v7310_v60  ;;  %5653 = vmatprep.subr.bf16.mxu1 %v7312_v16  ;;  %v2094_v16 = vld [vmem:[#allocation2 + $0xb0] sm:$0xff] }
 0x68b   : > { %5623 = vmatpush1.bf16.msra.mxu0 %v7314_v22  ;;  %5655 = vmatpush1.bf16.msra.mxu1 %v7317_v38 }
 0x68c   : > { %5625 = vmatprep.subr.bf16.mxu0 %v7322_v49  ;;  %5657 = vmatprep.subr.bf16.mxu1 %v7324_v24 }
 0x68f   : > { %5627 = vmatpush1.bf16.msra.mxu0 %v7326_v25  ;;  %5659 = vmatpush1.bf16.msra.mxu1 %v7329_v42  ;;  %v2095_v25 = vld [vmem:[#allocation2 + $0xb8] sm:$0xff] }
 0x690   : > { %5661 = vmatprep.subr.bf16.mxu0 %v7434_v53  ;;  %5693 = vmatprep.subr.bf16.mxu1 %v7436_v40 }
 0x744   : > { %v2231_v7 = vpop.f32.mrb[10].mxu0  ;;  %v2302_v33 = vpop.f32.mrb[10].mxu1 }
 0x745   : > { %v2307_v35 = vadd.f32 %v2231_v7, %v2092_v9  ;;  %v2233_v45 = vpop.f32.mrb[11].mxu0  ;;  %v2304_v60 = vpop.f32.mrb[11].mxu1  ;;  %v2309_v24 = vadd.f32 %v2302_v33, %v2094_v16  ;;  %v2658_v9 = vld [vmem:[#allocation8 + $0x1c8] sm:$0xff]  ;;  %v2660_v7 = vld [vmem:[#allocation8 + $0x1d8] sm:$0xff] }
 0x746   : > { %v2308_v22 = vadd.f32 %v2233_v45, %v2093_v14  ;;  %v2310_v42 = vadd.f32 %v2304_v60, %v2095_v25  ;;  %v2662_v14 = vld [vmem:[#allocation8 + $0x1e8] sm:$0xff]  ;;  %v2657_v45 = vld [vmem:[#allocation8 + $0x1c0] sm:$0xff]  ;;  %v2342_v25 = vld [vmem:[#allocation2 + $0xc0] sm:$0xff] }
 0x747   : > { %v2311_v38 = vmul.f32 0.5, %v2307_v35  ;;  %v5688_v33 = vpack.c.bf16 %v2662_v14, %v2658_v9  ;;  %v2664_v35 = vld [vmem:[#allocation8 + $0x1f8] sm:$0xff]  ;;  %v2661_v60 = vld [vmem:[#allocation8 + $0x1e0] sm:$0xff] }
 0x748   : > { %v2315_v49 = vmul.f32 0.5, %v2308_v22  ;;  %v2320_v53 = vmul.f32 0.5, %v2310_v42  ;;  %v5720_v16 = vpack.c.bf16 %v2664_v35, %v2660_v7  ;;  %v5690_v22 = vpack.c.bf16 %v2661_v60, %v2657_v45  ;;  %v2343_v42 = vld [vmem:[#allocation2 + $0xc8] sm:$0xff]  ;;  %v2832_v45 = vpop.permute.xlu1 %2831 }
 0x749   : > { %6376 = vtanh.f32 %v2311_v38  ;;  %v2659_v38 = vld [vmem:[#allocation8 + $0x1d0] sm:$0xff]  ;;  %vm2833_vm15 = vcmp.eq.s32.totalorder %v2832_v45, 1 }
 0x74a   : > { %6378 = vtanh.f32 %v2315_v49  ;;  %v2663_v49 = vld [vmem:[#allocation8 + $0x1f0] sm:$0xff] }
 0x74b   : > { %6380 = vtanh.f32 %v2309_v24  ;;  %v5722_v24 = vpack.c.bf16 %v2663_v49, %v2659_v38 }
 0x74c   : > { %6382 = vtanh.f32 %v2320_v53 }
 0x753   : > { %v6377_v63 = vpop.eup %6376 }
 0x754   : > { %v6379_v40 = vpop.eup %6378  ;;  %v2313_v3 = vmul.f32 0.5, %v6377_v63 }
 0x755   : > { %v2317_v15 = vmul.f32 0.5, %v6379_v40  ;;  %v6381_v37 = vpop.eup %6380 }
 0x756   : > { %v2314_v56 = vadd.f32 0.5, %v2313_v3  ;;  %v6383_v19 = vpop.eup %6382 }
 0x757   : > { %v2318_v46 = vadd.f32 0.5, %v2317_v15  ;;  %v2322_v31 = vmul.f32 0.5, %v6383_v19 }
 0x758   : > { %v2325_v51 = vmul.f32 %v6381_v37, %v2314_v56  ;;  %v2344_v56 = vld [vmem:[#allocation2 + $0xd0] sm:$0xff] }
 0x759   : > { %v2324_v20 = vmul.f32 %v2318_v46, %v7424_v50  ;;  %v2323_v52 = vadd.f32 0.5, %v2322_v31 }
 0x75b   : > { %v2326_v47 = vadd.f32 %v2325_v51, %v2324_v20 }
 0x75d   : > { %6384 = vtanh.f32 %v2326_v47  ;;  %v7506_v62 = vsel %vm2333_vm13, %v2326_v47, %v7424_v50  ;;  %v2637_v50 = vld [vmem:[#allocation8 + $0x120] sm:$0xff] }
 0x767   : > { %v6385_v5 = vpop.eup %6384 }
 0x768   : > { %v2328_v17 = vmul.f32 %v6385_v5, %v2323_v52 }
 0x76a   : > { %v7509_v18 = vsel %vm2333_vm13, %v2328_v17, %v7427_v12  ;;  %v2338_v27 = vsel %vm2333_vm13, %v2328_v17, 0.0  ;;  %v2635_v12 = vld [vmem:[#allocation8 + $0x110] sm:$0xff] }
 0x76b   : > { %5118 = vst [vmem:[%s7003_s14 + $0x28] sm:$0xff] %v2338_v27  ;;  %2480 = vmatmul.mubr.f32.vlgmr.msra.gmra.mrb[12].mxu0 %v7509_v18  ;;  %2551 = vmatmul.mubr.f32.vlgmr.msra.gmra.mrb[12].mxu1 %v7509_v18 }
 0x76c   : > { %5663 = vmatpush1.bf16.msra.mxu0 %v7438_v54  ;;  %5695 = vmatpush1.bf16.msra.mxu1 %v7441_v13  ;;  %v2639_v13 = vld [vmem:[#allocation8 + $0x130] sm:$0xff] }
 0x76d   : > { %5665 = vmatprep.subr.bf16.mxu0 %v7446_v32  ;;  %5697 = vmatprep.subr.bf16.mxu1 %v7448_v57  ;;  %v5710_v32 = vpack.c.bf16 %v2639_v13, %v2635_v12  ;;  %v2642_v57 = vld [vmem:[#allocation8 + $0x148] sm:$0xff] }
 0x76e   : > { %2729 = vmatprep.mubr.f32.mxu0 %v6701_v59  ;;  %2800 = vmatprep.mubr.f32.mxu1 %v6701_v59  ;;  %v2633_v59 = vld [vmem:[#allocation8 + $0x100] sm:$0xff] }
 0x76f   : > { %v5678_v54 = vpack.c.bf16 %v2637_v50, %v2633_v59 }
 0x770   : > { %5667 = vmatpush1.bf16.msra.mxu0 %v7450_v6  ;;  %5699 = vmatpush1.bf16.msra.mxu1 %v7453_v36  ;;  %v2646_v6 = vld [vmem:[#allocation8 + $0x168] sm:$0xff]  ;;  %v2644_v36 = vld [vmem:[#allocation8 + $0x158] sm:$0xff] }
 0x771   : > { %5669 = vmatprep.subr.bf16.mxu0 %v7458_v2  ;;  %5701 = vmatprep.subr.bf16.mxu1 %v7460_v10  ;;  %v5680_v2 = vpack.c.bf16 %v2646_v6, %v2642_v57  ;;  %v2648_v10 = vld [vmem:[#allocation8 + $0x178] sm:$0xff] }
 0x772   : > { %v5712_v28 = vpack.c.bf16 %v2648_v10, %v2644_v36 }
 0x774   : > { %5671 = vmatpush1.bf16.msra.mxu0 %v7462_v11  ;;  %5703 = vmatpush1.bf16.msra.mxu1 %v7465_v23  ;;  %v2641_v11 = vld [vmem:[#allocation8 + $0x140] sm:$0xff] }
 0x775   : > { %5673 = vmatprep.subr.bf16.mxu0 %v7470_v44  ;;  %5705 = vmatprep.subr.bf16.mxu1 %v7472_v21  ;;  %v2645_v23 = vld [vmem:[#allocation8 + $0x160] sm:$0xff]  ;;  %v2643_v44 = vld [vmem:[#allocation8 + $0x150] sm:$0xff]  ;;  %v2654_v21 = vld [vmem:[#allocation8 + $0x1a8] sm:$0xff] }
 0x776   : > { %v5682_v43 = vpack.c.bf16 %v2645_v23, %v2641_v11  ;;  %v5714_v0 = vpack.c.bf16 %v2647_v55, %v2643_v44  ;;  %v5684_v30 = vpack.c.bf16 %v2654_v21, %v2650_v61  ;;  %v2593_v44 = vld [vmem:[#allocation2 + $0xe8] sm:$0xff] }
 0x778   : > { %5675 = vmatpush1.bf16.msra.mxu0 %v7474_v8  ;;  %5707 = vmatpush1.bf16.msra.mxu1 %v7477_v29  ;;  %v2652_v8 = vld [vmem:[#allocation8 + $0x198] sm:$0xff]  ;;  %v2649_v29 = vld [vmem:[#allocation8 + $0x180] sm:$0xff] }
 0x779   : > { %5677 = vmatprep.subr.bf16.mxu0 %v7482_v4  ;;  %5709 = vmatprep.subr.bf16.mxu1 %v7484_v58  ;;  %v5716_v48 = vpack.c.bf16 %v2656_v26, %v2652_v8  ;;  %v5686_v1 = vpack.c.bf16 %v2653_v41, %v2649_v29  ;;  %v2651_v4 = vld [vmem:[#allocation8 + $0x190] sm:$0xff] }
 0x77a   : > { %v5718_v58 = vpack.c.bf16 %v2655_v39, %v2651_v4 }
 0x77c   : > { %5679 = vmatpush1.bf16.msra.mxu0 %v5678_v54  ;;  %5711 = vmatpush1.bf16.msra.mxu1 %v5710_v32  ;;  %v2582_v54 = vpop.permute.xlu0 %2581 }
 0x77d   : > { %5681 = vmatprep.subr.bf16.mxu0 %v5680_v2  ;;  %5713 = vmatprep.subr.bf16.mxu1 %v5712_v28  ;;  %vm2583_vm14 = vcmp.eq.s32.totalorder %v2582_v54, 1 }
 0x780   : > { %5683 = vmatpush1.bf16.msra.mxu0 %v5682_v43  ;;  %5715 = vmatpush1.bf16.msra.mxu1 %v5714_v0  ;;  %v2592_v43 = vld [vmem:[#allocation2 + $0xe0] sm:$0xff] }
 0x781   : > { %5685 = vmatprep.subr.bf16.mxu0 %v5684_v30  ;;  %5717 = vmatprep.subr.bf16.mxu1 %v5716_v48  ;;  %v2594_v30 = vld [vmem:[#allocation2 + $0xf0] sm:$0xff]  ;;  %v2595_v48 = vld [vmem:[#allocation2 + $0xf8] sm:$0xff] }
 0x784   : > { %5687 = vmatpush1.bf16.msra.mxu0 %v5686_v1  ;;  %5719 = vmatpush1.bf16.msra.mxu1 %v5718_v58 }
 0x785   : > { %5689 = vmatprep.subr.bf16.mxu0 %v5688_v33  ;;  %5721 = vmatprep.subr.bf16.mxu1 %v5720_v16 }
 0x788   : > { %5691 = vmatpush1.bf16.msra.mxu0 %v5690_v22  ;;  %5723 = vmatpush1.bf16.msra.mxu1 %v5722_v24 }
 0x83e   : > { %v2481_v53 = vpop.f32.mrb[12].mxu0  ;;  %v2552_v63 = vpop.f32.mrb[12].mxu1 }
 0x83f   : > { %v2557_v40 = vadd.f32 %v2481_v53, %v2342_v25  ;;  %v2483_v3 = vpop.f32.mrb[13].mxu0  ;;  %v2554_v15 = vpop.f32.mrb[13].mxu1  ;;  %v2559_v20 = vadd.f32 %v2552_v63, %v2344_v56 }
 0x840   : > { %v2558_v37 = vadd.f32 %v2483_v3, %v2343_v42  ;;  %v2560_v47 = vadd.f32 %v2554_v15, %v2345_v34 }
 0x841   : > { %v2561_v46 = vmul.f32 0.5, %v2557_v40 }
 0x842   : > { %v2565_v51 = vmul.f32 0.5, %v2558_v37  ;;  %v2570_v19 = vmul.f32 0.5, %v2560_v47 }
 0x843   : > { %6386 = vtanh.f32 %v2561_v46 }
 0x844   : > { %6388 = vtanh.f32 %v2565_v51 }
 0x845   : > { %6390 = vtanh.f32 %v2559_v20 }
 0x846   : > { %6392 = vtanh.f32 %v2570_v19 }
 0x84d   : > { %v6387_v31 = vpop.eup %6386 }
 0x84e   : > { %v6389_v52 = vpop.eup %6388  ;;  %v2563_v5 = vmul.f32 0.5, %v6387_v31 }
 0x84f   : > { %v2567_v17 = vmul.f32 0.5, %v6389_v52  ;;  %v6391_v59 = vpop.eup %6390 }
 0x850   : > { %v2564_v27 = vadd.f32 0.5, %v2563_v5  ;;  %v6393_v6 = vpop.eup %6392 }
 0x851   : > { %v2568_v50 = vadd.f32 0.5, %v2567_v17  ;;  %v2572_v36 = vmul.f32 0.5, %v6393_v6 }
 0x852   : > { %v2575_v12 = vmul.f32 %v6391_v59, %v2564_v27 }
 0x853   : > { %v2574_v13 = vmul.f32 %v2568_v50, %v7506_v62  ;;  %v2573_v2 = vadd.f32 0.5, %v2572_v36 }
 0x855   : > { %v2576_v32 = vadd.f32 %v2575_v12, %v2574_v13 }
 0x857   : > { %6394 = vtanh.f32 %v2576_v32  ;;  %v2584_v57 = vsel %vm2583_vm14, %v2576_v32, %v7506_v62 }
 0x861   : > { %v6395_v10 = vpop.eup %6394 }
 0x862   : > { %v2578_v11 = vmul.f32 %v6395_v10, %v2573_v2 }
 0x864   : > { %v2586_v23 = vsel %vm2583_vm14, %v2578_v11, %v7509_v18  ;;  %v2588_v28 = vsel %vm2583_vm14, %v2578_v11, 0.0 }
 0x865   : > { %5120 = vst [vmem:[%s7003_s14 + $0x30] sm:$0xff] %v2588_v28  ;;  %2730 = vmatmul.mubr.f32.vlgmr.msra.gmra.mrb[14].mxu0 %v2586_v23  ;;  %2801 = vmatmul.mubr.f32.vlgmr.msra.gmra.mrb[14].mxu1 %v2586_v23 }
 0x938   : > { %v2731_v55 = vpop.f32.mrb[14].mxu0  ;;  %v2802_v0 = vpop.f32.mrb[14].mxu1 }
 0x939   : > { %v2807_v61 = vadd.f32 %v2731_v55, %v2592_v43  ;;  %v2733_v21 = vpop.f32.mrb[15].mxu0  ;;  %v2804_v8 = vpop.f32.mrb[15].mxu1  ;;  %v2809_v41 = vadd.f32 %v2802_v0, %v2594_v30 }
 0x93a   : > { %v2808_v62 = vadd.f32 %v2733_v21, %v2593_v44  ;;  %v2810_v18 = vadd.f32 %v2804_v8, %v2595_v48 }
 0x93b   : > { %v2811_v26 = vmul.f32 0.5, %v2807_v61 }
 0x93c   : > { %v2815_v29 = vmul.f32 0.5, %v2808_v62  ;;  %v2820_v1 = vmul.f32 0.5, %v2810_v18 }
 0x93d   : > { %6396 = vtanh.f32 %v2811_v26 }
 0x93e   : > { %6398 = vtanh.f32 %v2815_v29 }
 0x93f   : > { %6400 = vtanh.f32 %v2809_v41 }
 0x940   : > { %6402 = vtanh.f32 %v2820_v1 }
 0x947   : > { %v6397_v4 = vpop.eup %6396 }
 0x948   : > { %v6399_v39 = vpop.eup %6398  ;;  %v2813_v58 = vmul.f32 0.5, %v6397_v4 }
 0x949   : > { %v2817_v9 = vmul.f32 0.5, %v6399_v39  ;;  %v6401_v7 = vpop.eup %6400 }
 0x94a   : > { %v2814_v14 = vadd.f32 0.5, %v2813_v58  ;;  %v6403_v38 = vpop.eup %6402 }
 0x94b   : > { %v2818_v33 = vadd.f32 0.5, %v2817_v9  ;;  %v2822_v49 = vmul.f32 0.5, %v6403_v38 }
 0x94c   : > { %v2825_v35 = vmul.f32 %v6401_v7, %v2814_v14 }
 0x94d   : > { %v2824_v60 = vmul.f32 %v2818_v33, %v2584_v57  ;;  %v2823_v24 = vadd.f32 0.5, %v2822_v49 }
 0x94f   : > { %v2826_v16 = vadd.f32 %v2825_v35, %v2824_v60 }
 0x951   : > { %6404 = vtanh.f32 %v2826_v16  ;;  %v2834_v22 = vsel %vm2833_vm15, %v2826_v16, %v2584_v57 }
 0x952   : > { %2835 = vst [vmem:[#allocation4] sm:$0xff] %v2834_v22 }
 0x95b   : > { %v6405_v25 = vpop.eup %6404 }
 0x95c   : > { %v2828_v42 = vmul.f32 %v6405_v25, %v2823_v24 }
 0x95e   : > { %v2836_v53 = vsel %vm2833_vm15, %v2828_v42, %v2586_v23  ;;  %v2838_v63 = vsel %vm2833_vm15, %v2828_v42, 0.0 }
 0x95f   : > { %2837 = vst [vmem:[#allocation3] sm:$0xff] %v2836_v53  ;;  %5122 = vst [vmem:[%s7003_s14 + $0x38] sm:$0xff] %v2838_v63 }
 0x960 PF: > { %p5123_p10 = scmp.ne.s32.totalorder %s6686_s27, 1 }
 0x961   : > { %v2856_v40 = vld [vmem:[#allocation8 + $0x8] sm:$0xff] (!%p5123_p10)  ;;  %v2855_v15 = vld [vmem:[#allocation8] sm:$0xff] (!%p5123_p10)  ;;  %v6703_v20 = vmov (!%p5123_p10), 0.0   ;;  %v2858_v52 = vld [vmem:[#allocation8 + $0x18] sm:$0xff] (!%p5123_p10)  ;;  %v6704_v5 = vmov (!%p5123_p10), 0  }
 0x962   : > { %2844 = sbr.rel (%p5123_p10) target bundleno = 4438 (0x1156), region = 60  ;;  %v2860_v3 = vld [vmem:[#allocation8 + $0x28] sm:$0xff] (!%p5123_p10)  ;;  %v2859_v37 = vld [vmem:[#allocation8 + $0x20] sm:$0xff] (!%p5123_p10)  ;;  %2983 = vmatprep.mubr.f32.mxu0 (!%p5123_p10), %v6703_v20  ;;  %3054 = vmatprep.mubr.f32.mxu1 (!%p5123_p10), %v6703_v20  ;;  %v2862_v17 = vld [vmem:[#allocation8 + $0x38] sm:$0xff] (!%p5123_p10) }
 0x963   : > { %v7538_v56 = vpack.c.bf16 (!%p5123_p10), %v2860_v3, %v2856_v40  ;;  %v2864_v46 = vld [vmem:[#allocation8 + $0x48] sm:$0xff] (!%p5123_p10)  ;;  %v7542_v34 = vpack.c.bf16 (!%p5123_p10), %v2859_v37, %v2855_v15  ;;  %v2863_v19 = vld [vmem:[#allocation8 + $0x40] sm:$0xff] (!%p5123_p10)  ;;  %6406 = vset.pattern.permute.xlu0 (!%p5123_p10), %v6704_v5  ;;  %6407 = vset.pattern.permute.xlu1 (!%p5123_p10), %v6704_v5  ;;  %v2857_v27 = vld [vmem:[#allocation8 + $0x10] sm:$0xff] (!%p5123_p10)  ;;  %v7552_v12 = vpack.c.bf16 (!%p5123_p10), %v2862_v17, %v2858_v52 }
 0x964   : > { %v2868_v51 = vld [vmem:[#allocation8 + $0x68] sm:$0xff] (!%p5123_p10)  ;;  %v2867_v31 = vld [vmem:[#allocation8 + $0x60] sm:$0xff] (!%p5123_p10)  ;;  %v2861_v59 = vld [vmem:[#allocation8 + $0x30] sm:$0xff] (!%p5123_p10) }
 0x965   : > { %v7544_v47 = vpack.c.bf16 (!%p5123_p10), %v2868_v51, %v2864_v46  ;;  %5725 = vmatprep.subr.bf16.mxu0 (!%p5123_p10), %v7538_v56  ;;  %v7550_v50 = vpack.c.bf16 (!%p5123_p10), %v2867_v31, %v2863_v19  ;;  %v7554_v54 = vpack.c.bf16 (!%p5123_p10), %v2861_v59, %v2857_v27  ;;  %v2872_v13 = vld [vmem:[#allocation8 + $0x88] sm:$0xff] (!%p5123_p10)  ;;  %v2871_v57 = vld [vmem:[#allocation8 + $0x80] sm:$0xff] (!%p5123_p10)  ;;  %v2866_v2 = vld [vmem:[#allocation8 + $0x58] sm:$0xff] (!%p5123_p10)  ;;  %5757 = vmatprep.subr.bf16.mxu1 (!%p5123_p10), %v7552_v12 }
 0x966   : > { %5727 = vmatpush1.bf16.msra.mxu0 (!%p5123_p10), %v7542_v34  ;;  %v2876_v32 = vld [vmem:[#allocation8 + $0xa8] sm:$0xff] (!%p5123_p10)  ;;  %v2875_v36 = vld [vmem:[#allocation8 + $0xa0] sm:$0xff] (!%p5123_p10)  ;;  %v2870_v10 = vld [vmem:[#allocation8 + $0x78] sm:$0xff] (!%p5123_p10) }
 0x967   : > { %5729 = vmatprep.subr.bf16.mxu0 (!%p5123_p10), %v7544_v47  ;;  %v7557_v6 = vpack.c.bf16 (!%p5123_p10), %v2876_v32, %v2872_v13  ;;  %v7560_v11 = vpack.c.bf16 (!%p5123_p10), %v2870_v10, %v2866_v2  ;;  %v2865_v23 = vld [vmem:[#allocation8 + $0x50] sm:$0xff] (!%p5123_p10)  ;;  %v2880_v43 = vld [vmem:[#allocation8 + $0xc8] sm:$0xff] (!%p5123_p10)  ;;  %5759 = vmatpush1.bf16.msra.mxu1 (!%p5123_p10), %v7554_v54  ;;  %v7566_v0 = vpack.c.bf16 (!%p5123_p10), %v2875_v36, %v2871_v57  ;;  %v2874_v61 = vld [vmem:[#allocation8 + $0x98] sm:$0xff] (!%p5123_p10) }
 0x968   : > { %v2869_v28 = vld [vmem:[#allocation8 + $0x70] sm:$0xff] (!%p5123_p10)  ;;  %v2884_v55 = vld [vmem:[#allocation8 + $0xe8] sm:$0xff] (!%p5123_p10)  ;;  %v2878_v21 = vld [vmem:[#allocation8 + $0xb8] sm:$0xff] (!%p5123_p10) }
 0x969   : > { %v7563_v44 = vpack.c.bf16 %v2869_v28, %v2865_v23  ;;  %5761 = vmatprep.subr.bf16.mxu1 %v7560_v11  ;;  %v2873_v8 = vld [vmem:[#allocation8 + $0x90] sm:$0xff]  ;;  %v7570_v30 = vpack.c.bf16 %v2884_v55, %v2880_v43  ;;  %v2879_v62 = vld [vmem:[#allocation8 + $0xc0] sm:$0xff]  ;;  %v7572_v29 = vpack.c.bf16 %v2878_v21, %v2874_v61  ;;  %v2888_v48 = vld [vmem:[#allocation8 + $0x108] sm:$0xff] }
 0x96a   : > { %5731 = vmatpush1.bf16.msra.mxu0 %v7550_v50  ;;  %v2883_v26 = vld [vmem:[#allocation8 + $0xe0] sm:$0xff]  ;;  %v2877_v41 = vld [vmem:[#allocation8 + $0xb0] sm:$0xff]  ;;  %v2892_v18 = vld [vmem:[#allocation8 + $0x128] sm:$0xff] }
 0x96b   : > { %5733 = vmatprep.subr.bf16.mxu0 %v7557_v6  ;;  %v2882_v1 = vld [vmem:[#allocation8 + $0xd8] sm:$0xff]  ;;  %5763 = vmatpush1.bf16.msra.mxu1 %v7563_v44  ;;  %v7575_v4 = vpack.c.bf16 %v2877_v41, %v2873_v8  ;;  %v7578_v58 = vpack.c.bf16 %v2883_v26, %v2879_v62  ;;  %v2887_v9 = vld [vmem:[#allocation8 + $0x100] sm:$0xff]  ;;  %v2881_v7 = vld [vmem:[#allocation8 + $0xd0] sm:$0xff]  ;;  %v7584_v35 = vpack.c.bf16 %v2892_v18, %v2888_v48 }
 0x96c   : > { %v2886_v39 = vld [vmem:[#allocation8 + $0xf8] sm:$0xff]  ;;  %5765 = vmatprep.subr.bf16.mxu1 %v7572_v29  ;;  %v2885_v33 = vld [vmem:[#allocation8 + $0xf0] sm:$0xff]  ;;  %v2891_v45 = vld [vmem:[#allocation8 + $0x120] sm:$0xff] }
 0x96d   : > { %v7581_v14 = vpack.c.bf16 %v2886_v39, %v2882_v1  ;;  %v2890_v60 = vld [vmem:[#allocation8 + $0x118] sm:$0xff]  ;;  %v2896_v22 = vld [vmem:[#allocation8 + $0x148] sm:$0xff]  ;;  %v7587_v49 = vpack.c.bf16 %v2885_v33, %v2881_v7  ;;  %v7590_v24 = vpack.c.bf16 %v2891_v45, %v2887_v9  ;;  %v2895_v25 = vld [vmem:[#allocation8 + $0x140] sm:$0xff] }
 0x96e   : > { %5735 = vmatpush1.bf16.msra.mxu0 %v7566_v0  ;;  %v2894_v16 = vld [vmem:[#allocation8 + $0x138] sm:$0xff]  ;;  %v2900_v38 = vld [vmem:[#allocation8 + $0x168] sm:$0xff]  ;;  %v2889_v53 = vld [vmem:[#allocation8 + $0x110] sm:$0xff] }
 0x96f   : > { %5737 = vmatprep.subr.bf16.mxu0 %v7570_v30  ;;  %5767 = vmatpush1.bf16.msra.mxu1 %v7575_v4  ;;  %v7593_v42 = vpack.c.bf16 %v2894_v16, %v2890_v60  ;;  %v2893_v63 = vld [vmem:[#allocation8 + $0x130] sm:$0xff]  ;;  %v7596_v40 = vpack.c.bf16 %v2900_v38, %v2896_v22  ;;  %v2899_v3 = vld [vmem:[#allocation8 + $0x160] sm:$0xff]  ;;  %v2898_v15 = vld [vmem:[#allocation8 + $0x158] sm:$0xff] }
 0x970   : > { %5769 = vmatprep.subr.bf16.mxu1 %v7581_v14  ;;  %v2902_v37 = vld [vmem:[#allocation8 + $0x178] sm:$0xff]  ;;  %v2904_v46 = vld [vmem:[#allocation8 + $0x188] sm:$0xff]  ;;  %v7599_v19 = vpack.c.bf16 %v2893_v63, %v2889_v53  ;;  %v2903_v31 = vld [vmem:[#allocation8 + $0x180] sm:$0xff]  ;;  %v7602_v52 = vpack.c.bf16 %v2899_v3, %v2895_v25 }
 0x971   : > { %v2908_v51 = vld [vmem:[#allocation8 + $0x1a8] sm:$0xff]  ;;  %v2907_v17 = vld [vmem:[#allocation8 + $0x1a0] sm:$0xff]  ;;  %v7605_v27 = vpack.c.bf16 %v2902_v37, %v2898_v15  ;;  %v2897_v59 = vld [vmem:[#allocation8 + $0x150] sm:$0xff] }
 0x972   : > { %5739 = vmatpush1.bf16.msra.mxu0 %v7578_v58  ;;  %v2901_v13 = vld [vmem:[#allocation8 + $0x170] sm:$0xff]  ;;  %v7608_v32 = vpack.c.bf16 %v2908_v51, %v2904_v46  ;;  %v2906_v57 = vld [vmem:[#allocation8 + $0x198] sm:$0xff]  ;;  %v5124_v2 = vld [vmem:[%s8177_s1 + $0x38] sm:$0xff]  ;;  %v7621_v21 = vpack.c.bf16 %v2907_v17, %v2903_v31 }
 0x973   : > { %5741 = vmatprep.subr.bf16.mxu0 %v7584_v35  ;;  %5771 = vmatpush1.bf16.msra.mxu1 %v7587_v49  ;;  %v2910_v36 = vld [vmem:[#allocation8 + $0x1b8] sm:$0xff]  ;;  %v2912_v10 = vld [vmem:[#allocation8 + $0x1c8] sm:$0xff]  ;;  %vm2852_vm0 = vcmp.gt.f32.partialorder %v5124_v2, 0.0  ;;  %v5126_v28 = vld [vmem:[%s8177_s1 + $0x30] sm:$0xff]  ;;  %v7617_v43 = vpack.c.bf16 %v2901_v13, %v2897_v59 }
 0x974   : > { %5773 = vmatprep.subr.bf16.mxu1 %v7593_v42  ;;  %v2916_v23 = vld [vmem:[#allocation8 + $0x1e8] sm:$0xff]  ;;  %v2911_v55 = vld [vmem:[#allocation8 + $0x1c0] sm:$0xff]  ;;  %v3083_v61 = vsel %vm2852_vm0, 1, %v6704_v5  ;;  %vm3102_vm1 = vcmp.gt.f32.partialorder %v5126_v28, 0.0  ;;  %v7624_v8 = vpack.c.bf16 %v2910_v36, %v2906_v57  ;;  %v2905_v62 = vld [vmem:[#allocation8 + $0x190] sm:$0xff] }
 0x975   : > { %v2909_v26 = vld [vmem:[#allocation8 + $0x1b0] sm:$0xff]  ;;  %v5132_v41 = vld [vmem:[%s8177_s1 + $0x18] sm:$0xff]  ;;  %v7630_v48 = vpack.c.bf16 %v2916_v23, %v2912_v10  ;;  %v2915_v18 = vld [vmem:[#allocation8 + $0x1e0] sm:$0xff]  ;;  %3085 = vperm.xlu0 %6406, %v3083_v61   ;;  %v3333_v9 = vsel %vm3102_vm1, 1, %v6704_v5 }
 0x976   : > { %5743 = vmatpush1.bf16.msra.mxu0 %v7590_v24  ;;  %v2914_v1 = vld [vmem:[#allocation8 + $0x1d8] sm:$0xff]  ;;  %v7634_v7 = vpack.c.bf16 %v2909_v26, %v2905_v62  ;;  %vm3852_vm2 = vcmp.gt.f32.partialorder %v5132_v41, 0.0  ;;  %v7637_v33 = vpack.c.bf16 %v2915_v18, %v2911_v55  ;;  %v2913_v60 = vld [vmem:[#allocation8 + $0x1d0] sm:$0xff]  ;;  %v2848_v31 = vld [vmem:[#allocation2 + $0xf0] sm:$0xff] }
 0x977   : > { %5745 = vmatprep.subr.bf16.mxu0 %v7596_v40  ;;  %5775 = vmatpush1.bf16.msra.mxu1 %v7599_v19  ;;  %v2918_v39 = vld [vmem:[#allocation8 + $0x1f8] sm:$0xff]  ;;  %v2917_v16 = vld [vmem:[#allocation8 + $0x1f0] sm:$0xff]  ;;  %v4083_v38 = vsel %vm3852_vm2, 1, %v6704_v5  ;;  %v2849_v10 = vld [vmem:[#allocation2 + $0xf8] sm:$0xff] }
 0x978   : > { %5777 = vmatprep.subr.bf16.mxu1 %v7605_v27  ;;  %v7640_v45 = vpack.c.bf16 %v2918_v39, %v2914_v1  ;;  %v5136_v22 = vld [vmem:[%s8177_s1 + $0x8] sm:$0xff]  ;;  %v7648_v25 = vpack.c.bf16 %v2917_v16, %v2913_v60  ;;  %v7651_v53 = vld [vmem:[#allocation3] sm:$0xff] }
 0x979   : > { %3335 = vperm.xlu0 %6406, %v3333_v9   ;;  %vm4352_vm3 = vcmp.gt.f32.partialorder %v5136_v22, 0.0  ;;  %v2846_v3 = vld [vmem:[#allocation2 + $0xe0] sm:$0xff]  ;;  %v2847_v15 = vld [vmem:[#allocation2 + $0xe8] sm:$0xff] }
 0x97a   : > { %5747 = vmatpush1.bf16.msra.mxu0 %v7602_v52  ;;  %v4583_v63 = vsel %vm4352_vm3, 1, %v6704_v5  ;;  %v2854_v41 = vld [vmem:[#allocation4] sm:$0xff] }
 0x97b   : > { %5749 = vmatprep.subr.bf16.mxu0 %v7608_v32  ;;  %5779 = vmatpush1.bf16.msra.mxu1 %v7617_v43 }
 0x97c   : > { %5781 = vmatprep.subr.bf16.mxu1 %v7624_v8 }
 0x97d   : > { %4085 = vperm.xlu0 %6406, %v4083_v38  }
 0x97e   : > { %5751 = vmatpush1.bf16.msra.mxu0 %v7621_v21 }
 0x97f   : > { %5753 = vmatprep.subr.bf16.mxu0 %v7630_v48  ;;  %5783 = vmatpush1.bf16.msra.mxu1 %v7634_v7 }
 0x980   : > { %5785 = vmatprep.subr.bf16.mxu1 %v7640_v45 }
 0x981   : > { %4585 = vperm.xlu0 %6406, %v4583_v63  }
 0x982   : > { %5755 = vmatpush1.bf16.msra.mxu0 %v7637_v33 }
 0x983   : > { %5789 = vmatprep.subr.bf16.mxu0 %v7538_v56  ;;  %5787 = vmatpush1.bf16.msra.mxu1 %v7648_v25 }
 0x984   : > { %5821 = vmatprep.subr.bf16.mxu1 %v7552_v12 }
 0x985   : > { %2984 = vmatmul.mubr.f32.vlgmr.msra.gmra.mrb[0].mxu0 %v7651_v53 }
 0x986   : > { %5791 = vmatpush1.bf16.msra.mxu0 %v7542_v34  ;;  %3055 = vmatmul.mubr.f32.vlgmr.msra.gmra.mrb[0].mxu1 %v7651_v53 }
 0x987   : > { %5793 = vmatprep.subr.bf16.mxu0 %v7544_v47  ;;  %3233 = vmatprep.mubr.f32.mxu0 %v6703_v20 }
 0x988   : > { %5823 = vmatpush1.bf16.msra.mxu1 %v7554_v54  ;;  %3304 = vmatprep.mubr.f32.mxu1 %v6703_v20 }
 0x989   : > { %5825 = vmatprep.subr.bf16.mxu1 %v7560_v11 }
 0x98a   : > { %5795 = vmatpush1.bf16.msra.mxu0 %v7550_v50 }
 0x98b   : > { %5797 = vmatprep.subr.bf16.mxu0 %v7557_v6 }
 0x98c   : > { %5827 = vmatpush1.bf16.msra.mxu1 %v7563_v44 }
 0x98d   : > { %5829 = vmatprep.subr.bf16.mxu1 %v7572_v29 }
 0x98e   : > { %5799 = vmatpush1.bf16.msra.mxu0 %v7566_v0 }
 0x98f   : > { %5801 = vmatprep.subr.bf16.mxu0 %v7570_v30 }
 0x990   : > { %5831 = vmatpush1.bf16.msra.mxu1 %v7575_v4 }
 0x991   : > { %5833 = vmatprep.subr.bf16.mxu1 %v7581_v14 }
 0x992   : > { %5803 = vmatpush1.bf16.msra.mxu0 %v7578_v58 }
 0x993   : > { %5805 = vmatprep.subr.bf16.mxu0 %v7584_v35 }
 0x994   : > { %5835 = vmatpush1.bf16.msra.mxu1 %v7587_v49 }
 0x995   : > { %5837 = vmatprep.subr.bf16.mxu1 %v7593_v42 }
 0x996   : > { %5807 = vmatpush1.bf16.msra.mxu0 %v7590_v24 }
 0x997   : > { %5809 = vmatprep.subr.bf16.mxu0 %v7596_v40 }
 0x998   : > { %5839 = vmatpush1.bf16.msra.mxu1 %v7599_v19 }
 0x999   : > { %5841 = vmatprep.subr.bf16.mxu1 %v7605_v27 }
 0x99a   : > { %5811 = vmatpush1.bf16.msra.mxu0 %v7602_v52 }
 0x99b   : > { %5813 = vmatprep.subr.bf16.mxu0 %v7608_v32 }
 0x99c   : > { %5843 = vmatpush1.bf16.msra.mxu1 %v7617_v43 }
 0x99d   : > { %5845 = vmatprep.subr.bf16.mxu1 %v7624_v8 }
 0x99e   : > { %5815 = vmatpush1.bf16.msra.mxu0 %v7621_v21 }
 0x99f   : > { %5817 = vmatprep.subr.bf16.mxu0 %v7630_v48 }
 0x9a0   : > { %5847 = vmatpush1.bf16.msra.mxu1 %v7634_v7 }
 0x9a1   : > { %5849 = vmatprep.subr.bf16.mxu1 %v7640_v45 }
 0x9a2   : > { %5819 = vmatpush1.bf16.msra.mxu0 %v7637_v33 }
 0x9a3   : > { %5853 = vmatprep.subr.bf16.mxu0 %v7538_v56 }
 0x9a4   : > { %5851 = vmatpush1.bf16.msra.mxu1 %v7648_v25 }
 0x9a5   : > { %5885 = vmatprep.subr.bf16.mxu1 %v7552_v12 }
 0x9f4   : > { %v3086_v1 = vpop.permute.xlu0 %3085 }
 0x9f5   : > { %vm3087_vm4 = vcmp.eq.s32.totalorder %v3086_v1, 1  ;;  %v3607_v1 = vld [vmem:[#allocation8 + $0x10] sm:$0xff] }
 0xa58   : > { %v2985_v37 = vpop.f32.mrb[0].mxu0 }
 0xa59   : > { %v3061_v46 = vadd.f32 %v2985_v37, %v2846_v3  ;;  %v2987_v51 = vpop.f32.mrb[1].mxu0  ;;  %v3056_v13 = vpop.f32.mrb[0].mxu1 }
 0xa5a   : > { %v3062_v17 = vadd.f32 %v2987_v51, %v2847_v15  ;;  %v3063_v36 = vadd.f32 %v3056_v13, %v2848_v31  ;;  %v3058_v2 = vpop.f32.mrb[1].mxu1  ;;  %v3336_v51 = vpop.permute.xlu0 %3335 }
 0xa5b   : > { %v3065_v59 = vmul.f32 0.5, %v3061_v46  ;;  %v3064_v56 = vadd.f32 %v3058_v2, %v2849_v10  ;;  %vm3337_vm9 = vcmp.eq.s32.totalorder %v3336_v51, 1  ;;  %v3637_v51 = vld [vmem:[#allocation8 + $0x100] sm:$0xff] }
 0xa5c   : > { %v3069_v57 = vmul.f32 0.5, %v3062_v17 }
 0xa5d   : > { %6408 = vtanh.f32 %v3065_v59  ;;  %v3074_v23 = vmul.f32 0.5, %v3064_v56 }
 0xa5e   : > { %6410 = vtanh.f32 %v3069_v57 }
 0xa5f   : > { %6412 = vtanh.f32 %v3063_v36 }
 0xa60   : > { %6414 = vtanh.f32 %v3074_v23  ;;  %v3606_v23 = vld [vmem:[#allocation8 + $0x8] sm:$0xff] }
 0xa67   : > { %v6409_v28 = vpop.eup %6408 }
 0xa68   : > { %v6411_v12 = vpop.eup %6410  ;;  %v3067_v55 = vmul.f32 0.5, %v6409_v28  ;;  %v3610_v28 = vld [vmem:[#allocation8 + $0x28] sm:$0xff] }
 0xa69   : > { %v6413_v61 = vpop.eup %6412  ;;  %v3071_v62 = vmul.f32 0.5, %v6411_v12  ;;  %v3608_v12 = vld [vmem:[#allocation8 + $0x18] sm:$0xff] }
 0xa6a   : > { %v3068_v26 = vadd.f32 0.5, %v3067_v55  ;;  %v6415_v22 = vpop.eup %6414  ;;  %v7762_v55 = vpack.c.bf16 %v3610_v28, %v3606_v23  ;;  %v3650_v23 = vld [vmem:[#allocation8 + $0x168] sm:$0xff]  ;;  %v3648_v28 = vld [vmem:[#allocation8 + $0x158] sm:$0xff] }
 0xa6b   : > { %v3072_v18 = vadd.f32 0.5, %v3071_v62  ;;  %v3076_v38 = vmul.f32 0.5, %v6415_v22  ;;  %v3605_v62 = vld [vmem:[#allocation8] sm:$0xff]  ;;  %v3616_v22 = vld [vmem:[#allocation8 + $0x58] sm:$0xff] }
 0xa6c   : > { %v3079_v39 = vmul.f32 %v6413_v61, %v3068_v26  ;;  %v3612_v61 = vld [vmem:[#allocation8 + $0x38] sm:$0xff]  ;;  %v3609_v26 = vld [vmem:[#allocation8 + $0x20] sm:$0xff] }
 0xa6d   : > { %v3078_v9 = vmul.f32 %v3072_v18, %v2854_v41  ;;  %v3077_v63 = vadd.f32 0.5, %v3076_v38  ;;  %v7766_v18 = vpack.c.bf16 %v3609_v26, %v3605_v62  ;;  %v3645_v62 = vld [vmem:[#allocation8 + $0x140] sm:$0xff] }
 0xa6e   : > { %v3649_v26 = vld [vmem:[#allocation8 + $0x160] sm:$0xff] }
 0xa6f   : > { %v3080_v60 = vadd.f32 %v3079_v39, %v3078_v9  ;;  %v3611_v39 = vld [vmem:[#allocation8 + $0x30] sm:$0xff] }
 0xa70   : > { %v7769_v9 = vpack.c.bf16 %v3611_v39, %v3607_v1  ;;  %v7826_v39 = vpack.c.bf16 %v3649_v26, %v3645_v62 }
 0xa71   : > { %6416 = vtanh.f32 %v3080_v60  ;;  %v7694_v16 = vsel %vm3087_vm4, %v3080_v60, %v2854_v41  ;;  %v7764_v41 = vpack.c.bf16 %v3612_v61, %v3608_v12  ;;  %v3614_v60 = vld [vmem:[#allocation8 + $0x48] sm:$0xff]  ;;  %v3652_v61 = vld [vmem:[#allocation8 + $0x178] sm:$0xff] }
 0xa72   : > { %v7824_v1 = vpack.c.bf16 %v3652_v61, %v3648_v28  ;;  %v3348_v28 = vld [vmem:[#allocation2 + $0xb0] sm:$0xff] }
 0xa7b   : > { %v6417_v3 = vpop.eup %6416 }
 0xa7c   : > { %v3082_v15 = vmul.f32 %v6417_v3, %v3077_v63  ;;  %v3620_v63 = vld [vmem:[#allocation8 + $0x78] sm:$0xff]  ;;  %v3613_v3 = vld [vmem:[#allocation8 + $0x40] sm:$0xff] }
 0xa7e   : > { %v7697_v37 = vsel %vm3087_vm4, %v3082_v15, %v7651_v53  ;;  %v3092_v46 = vsel %vm3087_vm4, %v3082_v15, 0.0  ;;  %v3617_v15 = vld [vmem:[#allocation8 + $0x60] sm:$0xff] }
 0xa7f   : > { %5125 = vst [vmem:[%s7003_s14 + $0x38] sm:$0xff] %v3092_v46  ;;  %3234 = vmatmul.mubr.f32.vlgmr.msra.gmra.mrb[2].mxu0 %v7697_v37  ;;  %3305 = vmatmul.mubr.f32.vlgmr.msra.gmra.mrb[2].mxu1 %v7697_v37  ;;  %v7778_v46 = vpack.c.bf16 %v3617_v15, %v3613_v3  ;;  %v3658_v3 = vld [vmem:[#allocation8 + $0x1a8] sm:$0xff]  ;;  %v3656_v15 = vld [vmem:[#allocation8 + $0x198] sm:$0xff] }
 0xa80   : > { %5855 = vmatpush1.bf16.msra.mxu0 %v7542_v34  ;;  %5887 = vmatpush1.bf16.msra.mxu1 %v7554_v54  ;;  %v5128_v34 = vld [vmem:[%s8177_s1 + $0x28] sm:$0xff]  ;;  %v5134_v54 = vld [vmem:[%s8177_s1 + $0x10] sm:$0xff] }
 0xa81   : > { %5857 = vmatprep.subr.bf16.mxu0 %v7544_v47  ;;  %5889 = vmatprep.subr.bf16.mxu1 %v7560_v11  ;;  %v5130_v47 = vld [vmem:[%s8177_s1 + $0x20] sm:$0xff]  ;;  %vm3352_vm5 = vcmp.gt.f32.partialorder %v5128_v34, 0.0  ;;  %vm4102_vm7 = vcmp.gt.f32.partialorder %v5134_v54, 0.0  ;;  %v3622_v54 = vld [vmem:[#allocation8 + $0x88] sm:$0xff] }
 0xa82   : > { %3483 = vmatprep.mubr.f32.mxu0 %v6703_v20  ;;  %3554 = vmatprep.mubr.f32.mxu1 %v6703_v20  ;;  %vm3602_vm6 = vcmp.gt.f32.partialorder %v5130_v47, 0.0  ;;  %v4599_v11 = vld [vmem:[%s8177_s1] sm:$0xff] }
 0xa83   : > { %vm4600_vm8 = vcmp.gt.f32.partialorder %v4599_v11, 0.0  ;;  %v3615_v34 = vld [vmem:[#allocation8 + $0x50] sm:$0xff]  ;;  %v3624_v11 = vld [vmem:[#allocation8 + $0x98] sm:$0xff] }
 0xa84   : > { %5859 = vmatpush1.bf16.msra.mxu0 %v7550_v50  ;;  %5891 = vmatpush1.bf16.msra.mxu1 %v7563_v44  ;;  %v3583_v50 = vsel %vm3352_vm5, 1, %v6704_v5  ;;  %v4333_v44 = vsel %vm4102_vm7, 1, %v6704_v5  ;;  %v3619_v47 = vld [vmem:[#allocation8 + $0x70] sm:$0xff] }
 0xa85   : > { %5861 = vmatprep.subr.bf16.mxu0 %v7557_v6  ;;  %5893 = vmatprep.subr.bf16.mxu1 %v7572_v29  ;;  %v3833_v6 = vsel %vm3602_vm6, 1, %v6704_v5  ;;  %v3097_v29 = vld [vmem:[#allocation2 + $0xc8] sm:$0xff] }
 0xa86   : > { %3585 = vperm.xlu1 %6407, %v3583_v50   ;;  %v7781_v50 = vpack.c.bf16 %v3619_v47, %v3615_v34  ;;  %v3660_v47 = vld [vmem:[#allocation8 + $0x1b8] sm:$0xff] }
 0xa88   : > { %5863 = vmatpush1.bf16.msra.mxu0 %v7566_v0  ;;  %5895 = vmatpush1.bf16.msra.mxu1 %v7575_v4  ;;  %v4831_v0 = vsel %vm4600_vm8, 1, %v6704_v5 }
 0xa89   : > { %5865 = vmatprep.subr.bf16.mxu0 %v7570_v30  ;;  %5897 = vmatprep.subr.bf16.mxu1 %v7581_v14  ;;  %v3096_v30 = vld [vmem:[#allocation2 + $0xc0] sm:$0xff] }
 0xa8a   : > { %3835 = vperm.xlu1 %6407, %v3833_v6   ;;  %v3626_v6 = vld [vmem:[#allocation8 + $0xa8] sm:$0xff] }
 0xa8c   : > { %5867 = vmatpush1.bf16.msra.mxu0 %v7578_v58  ;;  %5899 = vmatpush1.bf16.msra.mxu1 %v7587_v49 }
 0xa8d   : > { %5869 = vmatprep.subr.bf16.mxu0 %v7584_v35  ;;  %5901 = vmatprep.subr.bf16.mxu1 %v7593_v42 }
 0xa8e   : > { %4335 = vperm.xlu1 %6407, %v4333_v44   ;;  %v7786_v44 = vpack.c.bf16 %v3626_v6, %v3622_v54  ;;  %v3653_v54 = vld [vmem:[#allocation8 + $0x180] sm:$0xff] }
 0xa8f   : > { %v3657_v6 = vld [vmem:[#allocation8 + $0x1a0] sm:$0xff] }
 0xa90   : > { %5871 = vmatpush1.bf16.msra.mxu0 %v7590_v24  ;;  %5903 = vmatpush1.bf16.msra.mxu1 %v7599_v19  ;;  %v3098_v24 = vld [vmem:[#allocation2 + $0xd0] sm:$0xff] }
 0xa91   : > { %5873 = vmatprep.subr.bf16.mxu0 %v7596_v40  ;;  %5905 = vmatprep.subr.bf16.mxu1 %v7605_v27  ;;  %v3099_v27 = vld [vmem:[#allocation2 + $0xd8] sm:$0xff] }
 0xa92   : > { %4833 = vperm.xlu1 %6407, %v4831_v0   ;;  %v3628_v0 = vld [vmem:[#allocation8 + $0xb8] sm:$0xff] }
 0xa94   : > { %5875 = vmatpush1.bf16.msra.mxu0 %v7602_v52  ;;  %5907 = vmatpush1.bf16.msra.mxu1 %v7617_v43 }
 0xa95   : > { %5877 = vmatprep.subr.bf16.mxu0 %v7608_v32  ;;  %5909 = vmatprep.subr.bf16.mxu1 %v7624_v8 }
 0xa98   : > { %5879 = vmatpush1.bf16.msra.mxu0 %v7621_v21  ;;  %5911 = vmatpush1.bf16.msra.mxu1 %v7634_v7 }
 0xa99   : > { %5881 = vmatprep.subr.bf16.mxu0 %v7630_v48  ;;  %5913 = vmatprep.subr.bf16.mxu1 %v7640_v45 }
 0xa9c   : > { %5883 = vmatpush1.bf16.msra.mxu0 %v7637_v33  ;;  %5915 = vmatpush1.bf16.msra.mxu1 %v7648_v25 }
 0xa9d   : > { %5917 = vmatprep.subr.bf16.mxu0 %v7762_v55  ;;  %5949 = vmatprep.subr.bf16.mxu1 %v7764_v41 }
 0xb52   : > { %v3235_v4 = vpop.f32.mrb[2].mxu0  ;;  %v3306_v58 = vpop.f32.mrb[2].mxu1 }
 0xb53   : > { %v3311_v14 = vadd.f32 %v3235_v4, %v3096_v30  ;;  %v3237_v35 = vpop.f32.mrb[3].mxu0  ;;  %v3308_v49 = vpop.f32.mrb[3].mxu1  ;;  %v3313_v52 = vadd.f32 %v3306_v58, %v3098_v24  ;;  %v3621_v30 = vld [vmem:[#allocation8 + $0x80] sm:$0xff]  ;;  %v7788_v4 = vpack.c.bf16 %v3628_v0, %v3624_v11  ;;  %v3630_v24 = vld [vmem:[#allocation8 + $0xc8] sm:$0xff]  ;;  %v7836_v11 = vpack.c.bf16 %v3660_v47, %v3656_v15 }
 0xb54   : > { %v3312_v42 = vadd.f32 %v3237_v35, %v3097_v29  ;;  %v3314_v32 = vadd.f32 %v3308_v49, %v3099_v27  ;;  %v3625_v29 = vld [vmem:[#allocation8 + $0xa0] sm:$0xff]  ;;  %v3627_v35 = vld [vmem:[#allocation8 + $0xb0] sm:$0xff]  ;;  %v7838_v0 = vpack.c.bf16 %v3657_v6, %v3653_v54 }
 0xb55   : > { %v3315_v40 = vmul.f32 0.5, %v3311_v14  ;;  %v7790_v58 = vpack.c.bf16 %v3625_v29, %v3621_v30  ;;  %v3623_v14 = vld [vmem:[#allocation8 + $0x90] sm:$0xff]  ;;  %v3629_v27 = vld [vmem:[#allocation8 + $0xc0] sm:$0xff] }
 0xb56   : > { %v3319_v19 = vmul.f32 0.5, %v3312_v42  ;;  %v3324_v43 = vmul.f32 0.5, %v3314_v32  ;;  %v7793_v49 = vpack.c.bf16 %v3627_v35, %v3623_v14  ;;  %v3634_v42 = vld [vmem:[#allocation8 + $0xe8] sm:$0xff]  ;;  %v3633_v32 = vld [vmem:[#allocation8 + $0xe0] sm:$0xff]  ;;  %v3655_v30 = vld [vmem:[#allocation8 + $0x190] sm:$0xff] }
 0xb57   : > { %6418 = vtanh.f32 %v3315_v40  ;;  %v3632_v40 = vld [vmem:[#allocation8 + $0xd8] sm:$0xff]  ;;  %v3659_v29 = vld [vmem:[#allocation8 + $0x1b0] sm:$0xff]  ;;  %v3662_v35 = vld [vmem:[#allocation8 + $0x1c8] sm:$0xff] }
 0xb58   : > { %6420 = vtanh.f32 %v3319_v19  ;;  %v7798_v19 = vpack.c.bf16 %v3634_v42, %v3630_v24  ;;  %v7841_v14 = vpack.c.bf16 %v3659_v29, %v3655_v30  ;;  %v3666_v24 = vld [vmem:[#allocation8 + $0x1e8] sm:$0xff]  ;;  %v3664_v42 = vld [vmem:[#allocation8 + $0x1d8] sm:$0xff] }
 0xb59   : > { %6422 = vtanh.f32 %v3313_v52  ;;  %v3636_v52 = vld [vmem:[#allocation8 + $0xf8] sm:$0xff] }
 0xb5a   : > { %6424 = vtanh.f32 %v3324_v43  ;;  %v7800_v43 = vpack.c.bf16 %v3636_v52, %v3632_v40  ;;  %v7846_v40 = vpack.c.bf16 %v3666_v24, %v3662_v35  ;;  %v3668_v52 = vld [vmem:[#allocation8 + $0x1f8] sm:$0xff]  ;;  %v3586_v24 = vpop.permute.xlu1 %3585 }
 0xb5b   : > { %vm3587_vm10 = vcmp.eq.s32.totalorder %v3586_v24, 1 }
 0xb61   : > { %v6419_v5 = vpop.eup %6418 }
 0xb62   : > { %v6421_v21 = vpop.eup %6420  ;;  %v3317_v8 = vmul.f32 0.5, %v6419_v5  ;;  %v7802_v5 = vpack.c.bf16 %v3633_v32, %v3629_v27  ;;  %v3661_v27 = vld [vmem:[#allocation8 + $0x1c0] sm:$0xff] }
 0xb63   : > { %v3321_v48 = vmul.f32 0.5, %v6421_v21  ;;  %v6423_v33 = vpop.eup %6422  ;;  %v3631_v21 = vld [vmem:[#allocation8 + $0xd0] sm:$0xff]  ;;  %v3665_v32 = vld [vmem:[#allocation8 + $0x1e0] sm:$0xff] }
 0xb64   : > { %v3318_v7 = vadd.f32 0.5, %v3317_v8  ;;  %v6425_v59 = vpop.eup %6424  ;;  %v3635_v8 = vld [vmem:[#allocation8 + $0xf0] sm:$0xff] }
 0xb65   : > { %v3322_v45 = vadd.f32 0.5, %v3321_v48  ;;  %v3326_v13 = vmul.f32 0.5, %v6425_v59  ;;  %v7805_v48 = vpack.c.bf16 %v3635_v8, %v3631_v21  ;;  %v7848_v21 = vpack.c.bf16 %v3668_v52, %v3664_v42 }
 0xb66   : > { %v3329_v25 = vmul.f32 %v6423_v33, %v3318_v7  ;;  %v3638_v7 = vld [vmem:[#allocation8 + $0x108] sm:$0xff]  ;;  %v7850_v8 = vpack.c.bf16 %v3665_v32, %v3661_v27 }
 0xb67   : > { %v3328_v53 = vmul.f32 %v3322_v45, %v7694_v16  ;;  %v3327_v57 = vadd.f32 0.5, %v3326_v13  ;;  %v3642_v33 = vld [vmem:[#allocation8 + $0x128] sm:$0xff]  ;;  %v3640_v45 = vld [vmem:[#allocation8 + $0x118] sm:$0xff] }
 0xb69   : > { %v3330_v31 = vadd.f32 %v3329_v25, %v3328_v53  ;;  %v7810_v25 = vpack.c.bf16 %v3642_v33, %v3638_v7  ;;  %v3644_v53 = vld [vmem:[#allocation8 + $0x138] sm:$0xff]  ;;  %v3663_v7 = vld [vmem:[#allocation8 + $0x1d0] sm:$0xff] }
 0xb6a   : > { %v7812_v59 = vpack.c.bf16 %v3644_v53, %v3640_v45  ;;  %v3667_v33 = vld [vmem:[#allocation8 + $0x1f0] sm:$0xff] }
 0xb6b   : > { %6426 = vtanh.f32 %v3330_v31  ;;  %v7752_v17 = vsel %vm3337_vm9, %v3330_v31, %v7694_v16  ;;  %v3618_v16 = vld [vmem:[#allocation8 + $0x68] sm:$0xff]  ;;  %v3641_v31 = vld [vmem:[#allocation8 + $0x120] sm:$0xff]  ;;  %v7853_v45 = vpack.c.bf16 %v3667_v33, %v3663_v7  ;;  %v3346_v53 = vld [vmem:[#allocation2 + $0xa0] sm:$0xff] }
 0xb6c   : > { %v7774_v38 = vpack.c.bf16 %v3618_v16, %v3614_v60  ;;  %v7814_v13 = vpack.c.bf16 %v3641_v31, %v3637_v51  ;;  %v3647_v60 = vld [vmem:[#allocation8 + $0x150] sm:$0xff]  ;;  %v3347_v51 = vld [vmem:[#allocation2 + $0xa8] sm:$0xff] }
 0xb6d   : > { %v3651_v16 = vld [vmem:[#allocation8 + $0x170] sm:$0xff] }
 0xb75   : > { %v6427_v36 = vpop.eup %6426 }
 0xb76   : > { %v3332_v2 = vmul.f32 %v6427_v36, %v3327_v57  ;;  %v3639_v57 = vld [vmem:[#allocation8 + $0x110] sm:$0xff] }
 0xb77   : > { %v3643_v36 = vld [vmem:[#allocation8 + $0x130] sm:$0xff] }
 0xb78   : > { %v7755_v10 = vsel %vm3337_vm9, %v3332_v2, %v7697_v37  ;;  %v3342_v56 = vsel %vm3337_vm9, %v3332_v2, 0.0  ;;  %v7776_v37 = vpack.c.bf16 %v3620_v63, %v3616_v22  ;;  %v7817_v2 = vpack.c.bf16 %v3643_v36, %v3639_v57  ;;  %v3654_v63 = vld [vmem:[#allocation8 + $0x188] sm:$0xff] }
 0xb79   : > { %5127 = vst [vmem:[%s7003_s14 + $0x30] sm:$0xff] %v3342_v56  ;;  %3484 = vmatmul.mubr.f32.vlgmr.msra.gmra.mrb[4].mxu0 %v7755_v10  ;;  %3555 = vmatmul.mubr.f32.vlgmr.msra.gmra.mrb[4].mxu1 %v7755_v10  ;;  %v3646_v56 = vld [vmem:[#allocation8 + $0x148] sm:$0xff]  ;;  %v7829_v22 = vpack.c.bf16 %v3651_v16, %v3647_v60  ;;  %v7834_v34 = vpack.c.bf16 %v3658_v3, %v3654_v63 }
 0xb7a   : > { %3733 = vmatprep.mubr.f32.mxu0 %v6703_v20  ;;  %3804 = vmatprep.mubr.f32.mxu1 %v6703_v20  ;;  %v7822_v12 = vpack.c.bf16 %v3650_v23, %v3646_v56  ;;  %v3349_v16 = vld [vmem:[#allocation2 + $0xb8] sm:$0xff] }
 0xb7b   : > { %5919 = vmatpush1.bf16.msra.mxu0 %v7766_v18  ;;  %5951 = vmatpush1.bf16.msra.mxu1 %v7769_v9 }
 0xb7c   : > { %5921 = vmatprep.subr.bf16.mxu0 %v7774_v38  ;;  %5953 = vmatprep.subr.bf16.mxu1 %v7776_v37 }
 0xb7f   : > { %5923 = vmatpush1.bf16.msra.mxu0 %v7778_v46  ;;  %5955 = vmatpush1.bf16.msra.mxu1 %v7781_v50 }
 0xb80   : > { %5925 = vmatprep.subr.bf16.mxu0 %v7786_v44  ;;  %5957 = vmatprep.subr.bf16.mxu1 %v7788_v4 }
 0xb83   : > { %5927 = vmatpush1.bf16.msra.mxu0 %v7790_v58  ;;  %5959 = vmatpush1.bf16.msra.mxu1 %v7793_v49 }
 0xb84   : > { %5929 = vmatprep.subr.bf16.mxu0 %v7798_v19  ;;  %5961 = vmatprep.subr.bf16.mxu1 %v7800_v43 }
 0xb87   : > { %5931 = vmatpush1.bf16.msra.mxu0 %v7802_v5  ;;  %5963 = vmatpush1.bf16.msra.mxu1 %v7805_v48 }
 0xb88   : > { %5933 = vmatprep.subr.bf16.mxu0 %v7810_v25  ;;  %5965 = vmatprep.subr.bf16.mxu1 %v7812_v59 }
 0xb8b   : > { %5935 = vmatpush1.bf16.msra.mxu0 %v7814_v13  ;;  %5967 = vmatpush1.bf16.msra.mxu1 %v7817_v2 }
 0xb8c   : > { %5937 = vmatprep.subr.bf16.mxu0 %v7822_v12  ;;  %5969 = vmatprep.subr.bf16.mxu1 %v7824_v1 }
 0xb8f   : > { %5939 = vmatpush1.bf16.msra.mxu0 %v7826_v39  ;;  %5971 = vmatpush1.bf16.msra.mxu1 %v7829_v22 }
 0xb90   : > { %5941 = vmatprep.subr.bf16.mxu0 %v7834_v34  ;;  %5973 = vmatprep.subr.bf16.mxu1 %v7836_v11 }
 0xb93   : > { %5943 = vmatpush1.bf16.msra.mxu0 %v7838_v0  ;;  %5975 = vmatpush1.bf16.msra.mxu1 %v7841_v14 }
 0xb94   : > { %5945 = vmatprep.subr.bf16.mxu0 %v7846_v40  ;;  %5977 = vmatprep.subr.bf16.mxu1 %v7848_v21 }
 0xb97   : > { %5947 = vmatpush1.bf16.msra.mxu0 %v7850_v8  ;;  %5979 = vmatpush1.bf16.msra.mxu1 %v7853_v45 }
 0xb98   : > { %5981 = vmatprep.subr.bf16.mxu0 %v7762_v55  ;;  %6013 = vmatprep.subr.bf16.mxu1 %v7764_v41 }
 0xc4c   : > { %v3485_v31 = vpop.f32.mrb[4].mxu0  ;;  %v3556_v57 = vpop.f32.mrb[4].mxu1 }
 0xc4d   : > { %v3561_v36 = vadd.f32 %v3485_v31, %v3346_v53  ;;  %v3487_v56 = vpop.f32.mrb[5].mxu0  ;;  %v3558_v23 = vpop.f32.mrb[5].mxu1  ;;  %v3563_v60 = vadd.f32 %v3556_v57, %v3348_v28 }
 0xc4e   : > { %v3562_v61 = vadd.f32 %v3487_v56, %v3347_v51  ;;  %v3564_v63 = vadd.f32 %v3558_v23, %v3349_v16 }
 0xc4f   : > { %v3565_v62 = vmul.f32 0.5, %v3561_v36 }
 0xc50   : > { %v3569_v26 = vmul.f32 0.5, %v3562_v61  ;;  %v3574_v3 = vmul.f32 0.5, %v3564_v63 }
 0xc51   : > { %6428 = vtanh.f32 %v3565_v62 }
 0xc52   : > { %6430 = vtanh.f32 %v3569_v26  ;;  %v3598_v26 = vld [vmem:[#allocation2 + $0x90] sm:$0xff] }
 0xc53   : > { %6432 = vtanh.f32 %v3563_v60 }
 0xc54   : > { %6434 = vtanh.f32 %v3574_v3 }
 0xc5b   : > { %v6429_v15 = vpop.eup %6428 }
 0xc5c   : > { %v6431_v47 = vpop.eup %6430  ;;  %v3567_v54 = vmul.f32 0.5, %v6429_v15  ;;  %v3599_v15 = vld [vmem:[#allocation2 + $0x98] sm:$0xff] }
 0xc5d   : > { %v3571_v6 = vmul.f32 0.5, %v6431_v47  ;;  %v6433_v29 = vpop.eup %6432 }
 0xc5e   : > { %v3568_v30 = vadd.f32 0.5, %v3567_v54  ;;  %v6435_v7 = vpop.eup %6434 }
 0xc5f   : > { %v3572_v35 = vadd.f32 0.5, %v3571_v6  ;;  %v3576_v33 = vmul.f32 0.5, %v6435_v7 }
 0xc60   : > { %v3579_v42 = vmul.f32 %v6433_v29, %v3568_v30 }
 0xc61   : > { %v3578_v52 = vmul.f32 %v3572_v35, %v7752_v17  ;;  %v3577_v53 = vadd.f32 0.5, %v3576_v33 }
 0xc63   : > { %v3580_v27 = vadd.f32 %v3579_v42, %v3578_v52 }
 0xc65   : > { %6436 = vtanh.f32 %v3580_v27  ;;  %v7862_v32 = vsel %vm3587_vm10, %v3580_v27, %v7752_v17  ;;  %v3596_v17 = vld [vmem:[#allocation2 + $0x80] sm:$0xff]  ;;  %v3836_v27 = vpop.permute.xlu1 %3835 }
 0xc66   : > { %vm3837_vm11 = vcmp.eq.s32.totalorder %v3836_v27, 1  ;;  %v4355_v27 = vld [vmem:[#allocation8] sm:$0xff] }
 0xc6f   : > { %v6437_v51 = vpop.eup %6436 }
 0xc70   : > { %v3582_v31 = vmul.f32 %v6437_v51, %v3577_v53 }
 0xc72   : > { %v7865_v57 = vsel %vm3587_vm10, %v3582_v31, %v7755_v10  ;;  %v3592_v36 = vsel %vm3587_vm10, %v3582_v31, 0.0  ;;  %v3597_v10 = vld [vmem:[#allocation2 + $0x88] sm:$0xff] }
 0xc73   : > { %5129 = vst [vmem:[%s7003_s14 + $0x28] sm:$0xff] %v3592_v36  ;;  %3734 = vmatmul.mubr.f32.vlgmr.msra.gmra.mrb[6].mxu0 %v7865_v57  ;;  %3805 = vmatmul.mubr.f32.vlgmr.msra.gmra.mrb[6].mxu1 %v7865_v57 }
 0xc74   : > { %5983 = vmatpush1.bf16.msra.mxu0 %v7766_v18  ;;  %6015 = vmatpush1.bf16.msra.mxu1 %v7769_v9 }
 0xc75   : > { %5985 = vmatprep.subr.bf16.mxu0 %v7774_v38  ;;  %6017 = vmatprep.subr.bf16.mxu1 %v7776_v37 }
 0xc76   : > { %3983 = vmatprep.mubr.f32.mxu0 %v6703_v20  ;;  %4054 = vmatprep.mubr.f32.mxu1 %v6703_v20 }
 0xc78   : > { %5987 = vmatpush1.bf16.msra.mxu0 %v7778_v46  ;;  %6019 = vmatpush1.bf16.msra.mxu1 %v7781_v50 }
 0xc79   : > { %5989 = vmatprep.subr.bf16.mxu0 %v7786_v44  ;;  %6021 = vmatprep.subr.bf16.mxu1 %v7788_v4 }
 0xc7c   : > { %5991 = vmatpush1.bf16.msra.mxu0 %v7790_v58  ;;  %6023 = vmatpush1.bf16.msra.mxu1 %v7793_v49 }
 0xc7d   : > { %5993 = vmatprep.subr.bf16.mxu0 %v7798_v19  ;;  %6025 = vmatprep.subr.bf16.mxu1 %v7800_v43 }
 0xc80   : > { %5995 = vmatpush1.bf16.msra.mxu0 %v7802_v5  ;;  %6027 = vmatpush1.bf16.msra.mxu1 %v7805_v48 }
 0xc81   : > { %5997 = vmatprep.subr.bf16.mxu0 %v7810_v25  ;;  %6029 = vmatprep.subr.bf16.mxu1 %v7812_v59 }
 0xc84   : > { %5999 = vmatpush1.bf16.msra.mxu0 %v7814_v13  ;;  %6031 = vmatpush1.bf16.msra.mxu1 %v7817_v2 }
 0xc85   : > { %6001 = vmatprep.subr.bf16.mxu0 %v7822_v12  ;;  %6033 = vmatprep.subr.bf16.mxu1 %v7824_v1 }
 0xc88   : > { %6003 = vmatpush1.bf16.msra.mxu0 %v7826_v39  ;;  %6035 = vmatpush1.bf16.msra.mxu1 %v7829_v22 }
 0xc89   : > { %6005 = vmatprep.subr.bf16.mxu0 %v7834_v34  ;;  %6037 = vmatprep.subr.bf16.mxu1 %v7836_v11 }
 0xc8c   : > { %6007 = vmatpush1.bf16.msra.mxu0 %v7838_v0  ;;  %6039 = vmatpush1.bf16.msra.mxu1 %v7841_v14 }
 0xc8d   : > { %6009 = vmatprep.subr.bf16.mxu0 %v7846_v40  ;;  %6041 = vmatprep.subr.bf16.mxu1 %v7848_v21 }
 0xc90   : > { %6011 = vmatpush1.bf16.msra.mxu0 %v7850_v8  ;;  %6043 = vmatpush1.bf16.msra.mxu1 %v7853_v45 }
 0xc91   : > { %6045 = vmatprep.subr.bf16.mxu0 %v7762_v55  ;;  %6077 = vmatprep.subr.bf16.mxu1 %v7764_v41 }
 0xd46   : > { %v3735_v56 = vpop.f32.mrb[6].mxu0  ;;  %v3806_v23 = vpop.f32.mrb[6].mxu1 }
 0xd47   : > { %v3811_v28 = vadd.f32 %v3735_v56, %v3596_v17  ;;  %v3737_v61 = vpop.f32.mrb[7].mxu0  ;;  %v3808_v62 = vpop.f32.mrb[7].mxu1  ;;  %v3813_v3 = vadd.f32 %v3806_v23, %v3598_v26 }
 0xd48   : > { %v3812_v60 = vadd.f32 %v3737_v61, %v3597_v10  ;;  %v3814_v47 = vadd.f32 %v3808_v62, %v3599_v15 }
 0xd49   : > { %v3815_v16 = vmul.f32 0.5, %v3811_v28 }
 0xd4a   : > { %v3819_v63 = vmul.f32 0.5, %v3812_v60  ;;  %v3824_v55 = vmul.f32 0.5, %v3814_v47 }
 0xd4b   : > { %6438 = vtanh.f32 %v3815_v16  ;;  %v4086_v16 = vpop.permute.xlu0 %4085 }
 0xd4c   : > { %6440 = vtanh.f32 %v3819_v63  ;;  %vm4087_vm12 = vcmp.eq.s32.totalorder %v4086_v16, 1 }
 0xd4d   : > { %6442 = vtanh.f32 %v3813_v3 }
 0xd4e   : > { %6444 = vtanh.f32 %v3824_v55 }
 0xd55   : > { %v6439_v54 = vpop.eup %6438 }
 0xd56   : > { %v6441_v41 = vpop.eup %6440  ;;  %v3817_v6 = vmul.f32 0.5, %v6439_v54 }
 0xd57   : > { %v3821_v30 = vmul.f32 0.5, %v6441_v41  ;;  %v6443_v35 = vpop.eup %6442 }
 0xd58   : > { %v3818_v29 = vadd.f32 0.5, %v3817_v6  ;;  %v6445_v53 = vpop.eup %6444 }
 0xd59   : > { %v3822_v24 = vadd.f32 0.5, %v3821_v30  ;;  %v3826_v51 = vmul.f32 0.5, %v6445_v53 }
 0xd5a   : > { %v3829_v42 = vmul.f32 %v6443_v35, %v3818_v29  ;;  %v4356_v29 = vld [vmem:[#allocation8 + $0x8] sm:$0xff] }
 0xd5b   : > { %v3828_v52 = vmul.f32 %v3822_v24, %v7862_v32  ;;  %v3827_v31 = vadd.f32 0.5, %v3826_v51  ;;  %v4360_v35 = vld [vmem:[#allocation8 + $0x28] sm:$0xff]  ;;  %v4358_v24 = vld [vmem:[#allocation8 + $0x18] sm:$0xff]  ;;  %v4357_v51 = vld [vmem:[#allocation8 + $0x10] sm:$0xff] }
 0xd5d   : > { %v3830_v7 = vadd.f32 %v3829_v42, %v3828_v52  ;;  %v7958_v42 = vpack.c.bf16 %v4360_v35, %v4356_v29  ;;  %v4362_v52 = vld [vmem:[#allocation8 + $0x38] sm:$0xff]  ;;  %v4388_v35 = vld [vmem:[#allocation8 + $0x108] sm:$0xff] }
 0xd5f   : > { %6446 = vtanh.f32 %v3830_v7  ;;  %v7906_v33 = vsel %vm3837_vm11, %v3830_v7, %v7862_v32  ;;  %v4359_v7 = vld [vmem:[#allocation8 + $0x20] sm:$0xff] }
 0xd60   : > { %v7962_v53 = vpack.c.bf16 %v4359_v7, %v4355_v27  ;;  %v4394_v7 = vld [vmem:[#allocation8 + $0x138] sm:$0xff] }
 0xd69   : > { %v6447_v36 = vpop.eup %6446 }
 0xd6a   : > { %v3832_v17 = vmul.f32 %v6447_v36, %v3827_v31  ;;  %v4361_v31 = vld [vmem:[#allocation8 + $0x30] sm:$0xff] }
 0xd6b   : > { %v7965_v36 = vpack.c.bf16 %v4361_v31, %v4357_v51 }
 0xd6c   : > { %v7909_v10 = vsel %vm3837_vm11, %v3832_v17, %v7865_v57  ;;  %v3842_v56 = vsel %vm3837_vm11, %v3832_v17, 0.0  ;;  %v4364_v17 = vld [vmem:[#allocation8 + $0x48] sm:$0xff] }
 0xd6d   : > { %5131 = vst [vmem:[%s7003_s14 + $0x20] sm:$0xff] %v3842_v56  ;;  %3984 = vmatmul.mubr.f32.vlgmr.msra.gmra.mrb[8].mxu0 %v7909_v10  ;;  %4055 = vmatmul.mubr.f32.vlgmr.msra.gmra.mrb[8].mxu1 %v7909_v10  ;;  %v4366_v56 = vld [vmem:[#allocation8 + $0x58] sm:$0xff] }
 0xd6e   : > { %6047 = vmatpush1.bf16.msra.mxu0 %v7766_v18  ;;  %6079 = vmatpush1.bf16.msra.mxu1 %v7769_v9  ;;  %v3846_v18 = vld [vmem:[#allocation2 + $0x60] sm:$0xff]  ;;  %v3847_v9 = vld [vmem:[#allocation2 + $0x68] sm:$0xff] }
 0xd6f   : > { %6049 = vmatprep.subr.bf16.mxu0 %v7774_v38  ;;  %6081 = vmatprep.subr.bf16.mxu1 %v7776_v37 }
 0xd70   : > { %4233 = vmatprep.mubr.f32.mxu0 %v6703_v20  ;;  %4304 = vmatprep.mubr.f32.mxu1 %v6703_v20 }
 0xd72   : > { %6051 = vmatpush1.bf16.msra.mxu0 %v7778_v46  ;;  %6083 = vmatpush1.bf16.msra.mxu1 %v7781_v50 }
 0xd73   : > { %6053 = vmatprep.subr.bf16.mxu0 %v7786_v44  ;;  %6085 = vmatprep.subr.bf16.mxu1 %v7788_v4  ;;  %v3848_v4 = vld [vmem:[#allocation2 + $0x70] sm:$0xff] }
 0xd76   : > { %6055 = vmatpush1.bf16.msra.mxu0 %v7790_v58  ;;  %6087 = vmatpush1.bf16.msra.mxu1 %v7793_v49 }
 0xd77   : > { %6057 = vmatprep.subr.bf16.mxu0 %v7798_v19  ;;  %6089 = vmatprep.subr.bf16.mxu1 %v7800_v43 }
 0xd7a   : > { %6059 = vmatpush1.bf16.msra.mxu0 %v7802_v5  ;;  %6091 = vmatpush1.bf16.msra.mxu1 %v7805_v48  ;;  %v3849_v5 = vld [vmem:[#allocation2 + $0x78] sm:$0xff] }
 0xd7b   : > { %6061 = vmatprep.subr.bf16.mxu0 %v7810_v25  ;;  %6093 = vmatprep.subr.bf16.mxu1 %v7812_v59 }
 0xd7e   : > { %6063 = vmatpush1.bf16.msra.mxu0 %v7814_v13  ;;  %6095 = vmatpush1.bf16.msra.mxu1 %v7817_v2 }
 0xd7f   : > { %6065 = vmatprep.subr.bf16.mxu0 %v7822_v12  ;;  %6097 = vmatprep.subr.bf16.mxu1 %v7824_v1 }
 0xd82   : > { %6067 = vmatpush1.bf16.msra.mxu0 %v7826_v39  ;;  %6099 = vmatpush1.bf16.msra.mxu1 %v7829_v22 }
 0xd83   : > { %6069 = vmatprep.subr.bf16.mxu0 %v7834_v34  ;;  %6101 = vmatprep.subr.bf16.mxu1 %v7836_v11 }
 0xd86   : > { %6071 = vmatpush1.bf16.msra.mxu0 %v7838_v0  ;;  %6103 = vmatpush1.bf16.msra.mxu1 %v7841_v14 }
 0xd87   : > { %6073 = vmatprep.subr.bf16.mxu0 %v7846_v40  ;;  %6105 = vmatprep.subr.bf16.mxu1 %v7848_v21 }
 0xd8a   : > { %6075 = vmatpush1.bf16.msra.mxu0 %v7850_v8  ;;  %6107 = vmatpush1.bf16.msra.mxu1 %v7853_v45 }
 0xd8b   : > { %6109 = vmatprep.subr.bf16.mxu0 %v7958_v42 }
 0xe40   : > { %v3985_v38 = vpop.f32.mrb[8].mxu0  ;;  %v4056_v37 = vpop.f32.mrb[8].mxu1 }
 0xe41   : > { %v4061_v46 = vadd.f32 %v3985_v38, %v3846_v18  ;;  %v3987_v50 = vpop.f32.mrb[9].mxu0  ;;  %v4058_v44 = vpop.f32.mrb[9].mxu1  ;;  %v4063_v43 = vadd.f32 %v4056_v37, %v3848_v4  ;;  %v4363_v38 = vld [vmem:[#allocation8 + $0x40] sm:$0xff]  ;;  %v4369_v4 = vld [vmem:[#allocation8 + $0x70] sm:$0xff] }
 0xe42   : > { %v4062_v58 = vadd.f32 %v3987_v50, %v3847_v9  ;;  %v4064_v48 = vadd.f32 %v4058_v44, %v3849_v5  ;;  %v4370_v9 = vld [vmem:[#allocation8 + $0x78] sm:$0xff]  ;;  %v4367_v37 = vld [vmem:[#allocation8 + $0x60] sm:$0xff]  ;;  %v4365_v44 = vld [vmem:[#allocation8 + $0x50] sm:$0xff] }
 0xe43   : > { %v4065_v49 = vmul.f32 0.5, %v4061_v46  ;;  %v7972_v46 = vpack.c.bf16 %v4370_v9, %v4366_v56  ;;  %v7974_v50 = vpack.c.bf16 %v4367_v37, %v4363_v38 }
 0xe44   : > { %v4069_v19 = vmul.f32 0.5, %v4062_v58  ;;  %v4074_v25 = vmul.f32 0.5, %v4064_v48  ;;  %v7977_v58 = vpack.c.bf16 %v4369_v4, %v4365_v44  ;;  %v4378_v48 = vld [vmem:[#allocation8 + $0xb8] sm:$0xff]  ;;  %v4336_v4 = vpop.permute.xlu1 %4335 }
 0xe45   : > { %6448 = vtanh.f32 %v4065_v49  ;;  %v4372_v49 = vld [vmem:[#allocation8 + $0x88] sm:$0xff]  ;;  %vm4337_vm13 = vcmp.eq.s32.totalorder %v4336_v4, 1 }
 0xe46   : > { %6450 = vtanh.f32 %v4069_v19  ;;  %v4376_v19 = vld [vmem:[#allocation8 + $0xa8] sm:$0xff] }
 0xe47   : > { %6452 = vtanh.f32 %v4063_v43  ;;  %v4374_v43 = vld [vmem:[#allocation8 + $0x98] sm:$0xff]  ;;  %v7982_v5 = vpack.c.bf16 %v4376_v19, %v4372_v49  ;;  %v4349_v4 = vld [vmem:[#allocation2 + $0x38] sm:$0xff] }
 0xe48   : > { %6454 = vtanh.f32 %v4074_v25  ;;  %v4371_v25 = vld [vmem:[#allocation8 + $0x80] sm:$0xff] }
 0xe4f   : > { %v6449_v59 = vpop.eup %6448 }
 0xe50   : > { %v6451_v32 = vpop.eup %6450  ;;  %v4067_v57 = vmul.f32 0.5, %v6449_v59  ;;  %v4375_v59 = vld [vmem:[#allocation8 + $0xa0] sm:$0xff] }
 0xe51   : > { %v4071_v23 = vmul.f32 0.5, %v6451_v32  ;;  %v6453_v61 = vpop.eup %6452  ;;  %v7984_v32 = vpack.c.bf16 %v4378_v48, %v4374_v43 }
 0xe52   : > { %v4068_v28 = vadd.f32 0.5, %v4067_v57  ;;  %v6455_v15 = vpop.eup %6454  ;;  %v7986_v57 = vpack.c.bf16 %v4375_v59, %v4371_v25 }
 0xe53   : > { %v4072_v62 = vadd.f32 0.5, %v4071_v23  ;;  %v4076_v47 = vmul.f32 0.5, %v6455_v15  ;;  %v4373_v23 = vld [vmem:[#allocation8 + $0x90] sm:$0xff]  ;;  %v4379_v15 = vld [vmem:[#allocation8 + $0xc0] sm:$0xff] }
 0xe54   : > { %v4079_v26 = vmul.f32 %v6453_v61, %v4068_v28  ;;  %v4377_v28 = vld [vmem:[#allocation8 + $0xb0] sm:$0xff] }
 0xe55   : > { %v4078_v60 = vmul.f32 %v4072_v62, %v7906_v33  ;;  %v4077_v55 = vadd.f32 0.5, %v4076_v47  ;;  %v7989_v61 = vpack.c.bf16 %v4377_v28, %v4373_v23  ;;  %v4380_v62 = vld [vmem:[#allocation8 + $0xc8] sm:$0xff]  ;;  %v4383_v47 = vld [vmem:[#allocation8 + $0xe0] sm:$0xff] }
 0xe57   : > { %v4080_v63 = vadd.f32 %v4079_v26, %v4078_v60  ;;  %v4384_v26 = vld [vmem:[#allocation8 + $0xe8] sm:$0xff]  ;;  %v4382_v60 = vld [vmem:[#allocation8 + $0xd8] sm:$0xff] }
 0xe58   : > { %v7994_v16 = vpack.c.bf16 %v4384_v26, %v4380_v62 }
 0xe59   : > { %6456 = vtanh.f32 %v4080_v63  ;;  %v7948_v3 = vsel %vm4087_vm12, %v4080_v63, %v7906_v33  ;;  %v7960_v33 = vpack.c.bf16 %v4362_v52, %v4358_v24  ;;  %v4386_v63 = vld [vmem:[#allocation8 + $0xf8] sm:$0xff]  ;;  %v4392_v24 = vld [vmem:[#allocation8 + $0x128] sm:$0xff] }
 0xe5a   : > { %v4390_v52 = vld [vmem:[#allocation8 + $0x118] sm:$0xff]  ;;  %v8006_v27 = vpack.c.bf16 %v4392_v24, %v4388_v35  ;;  %v4655_v35 = vld [vmem:[#allocation8 + $0x1a0] sm:$0xff] }
 0xe5b   : > { %6141 = vmatprep.subr.bf16.mxu1 %v7960_v33  ;;  %v8008_v51 = vpack.c.bf16 %v4394_v7, %v4390_v52  ;;  %v4657_v7 = vld [vmem:[#allocation8 + $0x1b0] sm:$0xff] }
 0xe63   : > { %v6457_v54 = vpop.eup %6456 }
 0xe64   : > { %v4082_v41 = vmul.f32 %v6457_v54, %v4077_v55  ;;  %v7996_v55 = vpack.c.bf16 %v4386_v63, %v4382_v60  ;;  %v7998_v54 = vpack.c.bf16 %v4383_v47, %v4379_v15  ;;  %v4649_v63 = vld [vmem:[#allocation8 + $0x170] sm:$0xff]  ;;  %v4652_v47 = vld [vmem:[#allocation8 + $0x188] sm:$0xff] }
 0xe66   : > { %v7951_v6 = vsel %vm4087_vm12, %v4082_v41, %v7909_v10  ;;  %v4092_v30 = vsel %vm4087_vm12, %v4082_v41, 0.0  ;;  %v4368_v10 = vld [vmem:[#allocation8 + $0x68] sm:$0xff]  ;;  %v4381_v41 = vld [vmem:[#allocation8 + $0xd0] sm:$0xff] }
 0xe67   : > { %5133 = vst [vmem:[%s7003_s14 + $0x18] sm:$0xff] %v4092_v30  ;;  %4234 = vmatmul.mubr.f32.vlgmr.msra.gmra.mrb[10].mxu0 %v7951_v6  ;;  %4305 = vmatmul.mubr.f32.vlgmr.msra.gmra.mrb[10].mxu1 %v7951_v6  ;;  %v7970_v18 = vpack.c.bf16 %v4368_v10, %v4364_v17  ;;  %v4385_v30 = vld [vmem:[#allocation8 + $0xf0] sm:$0xff] }
 0xe68   : > { %4483 = vmatprep.mubr.f32.mxu0 %v6703_v20  ;;  %4554 = vmatprep.mubr.f32.mxu1 %v6703_v20  ;;  %v8001_v29 = vpack.c.bf16 %v4385_v30, %v4381_v41  ;;  %v4658_v30 = vld [vmem:[#allocation8 + $0x1b8] sm:$0xff] }
 0xe69   : > { %6111 = vmatpush1.bf16.msra.mxu0 %v7962_v53  ;;  %6143 = vmatpush1.bf16.msra.mxu1 %v7965_v36 }
 0xe6a   : > { %6113 = vmatprep.subr.bf16.mxu0 %v7970_v18  ;;  %6145 = vmatprep.subr.bf16.mxu1 %v7972_v46 }
 0xe6d   : > { %6115 = vmatpush1.bf16.msra.mxu0 %v7974_v50  ;;  %6147 = vmatpush1.bf16.msra.mxu1 %v7977_v58 }
 0xe6e   : > { %6117 = vmatprep.subr.bf16.mxu0 %v7982_v5  ;;  %6149 = vmatprep.subr.bf16.mxu1 %v7984_v32 }
 0xe71   : > { %6119 = vmatpush1.bf16.msra.mxu0 %v7986_v57  ;;  %6151 = vmatpush1.bf16.msra.mxu1 %v7989_v61 }
 0xe72   : > { %6121 = vmatprep.subr.bf16.mxu0 %v7994_v16  ;;  %6153 = vmatprep.subr.bf16.mxu1 %v7996_v55 }
 0xe75   : > { %6123 = vmatpush1.bf16.msra.mxu0 %v7998_v54  ;;  %6155 = vmatpush1.bf16.msra.mxu1 %v8001_v29 }
 0xe76   : > { %6125 = vmatprep.subr.bf16.mxu0 %v8006_v27  ;;  %6157 = vmatprep.subr.bf16.mxu1 %v8008_v51 }
 0xe79   : > { %6127 = vmatpush1.bf16.msra.mxu0 %v7814_v13  ;;  %6159 = vmatpush1.bf16.msra.mxu1 %v7817_v2  ;;  %v4096_v13 = vld [vmem:[#allocation2 + $0x40] sm:$0xff]  ;;  %v4097_v2 = vld [vmem:[#allocation2 + $0x48] sm:$0xff] }
 0xe7a   : > { %6129 = vmatprep.subr.bf16.mxu0 %v7822_v12  ;;  %6161 = vmatprep.subr.bf16.mxu1 %v7824_v1 }
 0xe7d   : > { %6131 = vmatpush1.bf16.msra.mxu0 %v7826_v39  ;;  %6163 = vmatpush1.bf16.msra.mxu1 %v7829_v22 }
 0xe7e   : > { %6133 = vmatprep.subr.bf16.mxu0 %v7834_v34  ;;  %6165 = vmatprep.subr.bf16.mxu1 %v7836_v11  ;;  %v4098_v11 = vld [vmem:[#allocation2 + $0x50] sm:$0xff] }
 0xe81   : > { %6135 = vmatpush1.bf16.msra.mxu0 %v7838_v0  ;;  %6167 = vmatpush1.bf16.msra.mxu1 %v7841_v14 }
 0xe82   : > { %6137 = vmatprep.subr.bf16.mxu0 %v7846_v40  ;;  %6169 = vmatprep.subr.bf16.mxu1 %v7848_v21 }
 0xe85   : > { %6139 = vmatpush1.bf16.msra.mxu0 %v7850_v8  ;;  %6171 = vmatpush1.bf16.msra.mxu1 %v7853_v45  ;;  %v4099_v8 = vld [vmem:[#allocation2 + $0x58] sm:$0xff] }
 0xe86   : > { %6173 = vmatprep.subr.bf16.mxu0 %v7958_v42  ;;  %6205 = vmatprep.subr.bf16.mxu1 %v7960_v33 }
 0xf3a   : > { %v4235_v12 = vpop.f32.mrb[10].mxu0  ;;  %v4306_v1 = vpop.f32.mrb[10].mxu1 }
 0xf3b   : > { %v4311_v39 = vadd.f32 %v4235_v12, %v4096_v13  ;;  %v4237_v22 = vpop.f32.mrb[11].mxu0  ;;  %v4308_v34 = vpop.f32.mrb[11].mxu1  ;;  %v4313_v21 = vadd.f32 %v4306_v1, %v4098_v11  ;;  %v4660_v13 = vld [vmem:[#allocation8 + $0x1c8] sm:$0xff]  ;;  %v4662_v12 = vld [vmem:[#allocation8 + $0x1d8] sm:$0xff] }
 0xf3c   : > { %v4312_v0 = vadd.f32 %v4237_v22, %v4097_v2  ;;  %v4314_v45 = vadd.f32 %v4308_v34, %v4099_v8  ;;  %v4664_v2 = vld [vmem:[#allocation8 + $0x1e8] sm:$0xff]  ;;  %v4659_v22 = vld [vmem:[#allocation8 + $0x1c0] sm:$0xff]  ;;  %v4346_v8 = vld [vmem:[#allocation2 + $0x20] sm:$0xff] }
 0xf3d   : > { %v4315_v14 = vmul.f32 0.5, %v4311_v39  ;;  %v6200_v1 = vpack.c.bf16 %v4664_v2, %v4660_v13  ;;  %v4666_v39 = vld [vmem:[#allocation8 + $0x1f8] sm:$0xff]  ;;  %v4663_v34 = vld [vmem:[#allocation8 + $0x1e0] sm:$0xff] }
 0xf3e   : > { %v4319_v40 = vmul.f32 0.5, %v4312_v0  ;;  %v4324_v42 = vmul.f32 0.5, %v4314_v45  ;;  %v6232_v11 = vpack.c.bf16 %v4666_v39, %v4662_v12  ;;  %v6202_v0 = vpack.c.bf16 %v4663_v34, %v4659_v22  ;;  %v4347_v45 = vld [vmem:[#allocation2 + $0x28] sm:$0xff]  ;;  %v4834_v22 = vpop.permute.xlu1 %4833 }
 0xf3f   : > { %6458 = vtanh.f32 %v4315_v14  ;;  %v4661_v14 = vld [vmem:[#allocation8 + $0x1d0] sm:$0xff]  ;;  %vm4835_vm15 = vcmp.eq.s32.totalorder %v4834_v22, 1 }
 0xf40   : > { %6460 = vtanh.f32 %v4319_v40  ;;  %v4665_v40 = vld [vmem:[#allocation8 + $0x1f0] sm:$0xff] }
 0xf41   : > { %6462 = vtanh.f32 %v4313_v21  ;;  %v6234_v21 = vpack.c.bf16 %v4665_v40, %v4661_v14 }
 0xf42   : > { %6464 = vtanh.f32 %v4324_v42 }
 0xf49   : > { %v6459_v31 = vpop.eup %6458 }
 0xf4a   : > { %v6461_v33 = vpop.eup %6460  ;;  %v4317_v17 = vmul.f32 0.5, %v6459_v31 }
 0xf4b   : > { %v4321_v10 = vmul.f32 0.5, %v6461_v33  ;;  %v6463_v9 = vpop.eup %6462 }
 0xf4c   : > { %v4318_v56 = vadd.f32 0.5, %v4317_v17  ;;  %v6465_v43 = vpop.eup %6464 }
 0xf4d   : > { %v4322_v38 = vadd.f32 0.5, %v4321_v10  ;;  %v4326_v48 = vmul.f32 0.5, %v6465_v43 }
 0xf4e   : > { %v4329_v37 = vmul.f32 %v6463_v9, %v4318_v56  ;;  %v4348_v56 = vld [vmem:[#allocation2 + $0x30] sm:$0xff] }
 0xf4f   : > { %v4328_v44 = vmul.f32 %v4322_v38, %v7948_v3  ;;  %v4327_v25 = vadd.f32 0.5, %v4326_v48 }
 0xf51   : > { %v4330_v49 = vadd.f32 %v4329_v37, %v4328_v44 }
 0xf53   : > { %6466 = vtanh.f32 %v4330_v49  ;;  %v8030_v19 = vsel %vm4337_vm13, %v4330_v49, %v7948_v3  ;;  %v4639_v3 = vld [vmem:[#allocation8 + $0x120] sm:$0xff] }
 0xf5d   : > { %v6467_v59 = vpop.eup %6466 }
 0xf5e   : > { %v4332_v23 = vmul.f32 %v6467_v59, %v4327_v25 }
 0xf60   : > { %v8033_v28 = vsel %vm4337_vm13, %v4332_v23, %v7951_v6  ;;  %v4342_v62 = vsel %vm4337_vm13, %v4332_v23, 0.0  ;;  %v4637_v6 = vld [vmem:[#allocation8 + $0x110] sm:$0xff] }
 0xf61   : > { %5135 = vst [vmem:[%s7003_s14 + $0x10] sm:$0xff] %v4342_v62  ;;  %4484 = vmatmul.mubr.f32.vlgmr.msra.gmra.mrb[12].mxu0 %v8033_v28  ;;  %4555 = vmatmul.mubr.f32.vlgmr.msra.gmra.mrb[12].mxu1 %v8033_v28 }
 0xf62   : > { %6175 = vmatpush1.bf16.msra.mxu0 %v7962_v53  ;;  %6207 = vmatpush1.bf16.msra.mxu1 %v7965_v36  ;;  %v4641_v36 = vld [vmem:[#allocation8 + $0x130] sm:$0xff] }
 0xf63   : > { %6177 = vmatprep.subr.bf16.mxu0 %v7970_v18  ;;  %6209 = vmatprep.subr.bf16.mxu1 %v7972_v46  ;;  %v6222_v18 = vpack.c.bf16 %v4641_v36, %v4637_v6  ;;  %v4644_v46 = vld [vmem:[#allocation8 + $0x148] sm:$0xff] }
 0xf64   : > { %4731 = vmatprep.mubr.f32.mxu0 %v6703_v20  ;;  %4802 = vmatprep.mubr.f32.mxu1 %v6703_v20  ;;  %v4635_v20 = vld [vmem:[#allocation8 + $0x100] sm:$0xff] }
 0xf65   : > { %v6190_v53 = vpack.c.bf16 %v4639_v3, %v4635_v20 }
 0xf66   : > { %6179 = vmatpush1.bf16.msra.mxu0 %v7974_v50  ;;  %6211 = vmatpush1.bf16.msra.mxu1 %v7977_v58  ;;  %v4648_v50 = vld [vmem:[#allocation8 + $0x168] sm:$0xff]  ;;  %v4646_v58 = vld [vmem:[#allocation8 + $0x158] sm:$0xff] }
 0xf67   : > { %6181 = vmatprep.subr.bf16.mxu0 %v7982_v5  ;;  %6213 = vmatprep.subr.bf16.mxu1 %v7984_v32  ;;  %v6192_v5 = vpack.c.bf16 %v4648_v50, %v4644_v46  ;;  %v4650_v32 = vld [vmem:[#allocation8 + $0x178] sm:$0xff] }
 0xf68   : > { %v6224_v26 = vpack.c.bf16 %v4650_v32, %v4646_v58 }
 0xf6a   : > { %6183 = vmatpush1.bf16.msra.mxu0 %v7986_v57  ;;  %6215 = vmatpush1.bf16.msra.mxu1 %v7989_v61  ;;  %v4643_v57 = vld [vmem:[#allocation8 + $0x140] sm:$0xff] }
 0xf6b   : > { %6185 = vmatprep.subr.bf16.mxu0 %v7994_v16  ;;  %6217 = vmatprep.subr.bf16.mxu1 %v7996_v55  ;;  %v4647_v61 = vld [vmem:[#allocation8 + $0x160] sm:$0xff]  ;;  %v4645_v16 = vld [vmem:[#allocation8 + $0x150] sm:$0xff]  ;;  %v4656_v55 = vld [vmem:[#allocation8 + $0x1a8] sm:$0xff] }
 0xf6c   : > { %v6194_v60 = vpack.c.bf16 %v4647_v61, %v4643_v57  ;;  %v6226_v15 = vpack.c.bf16 %v4649_v63, %v4645_v16  ;;  %v6196_v41 = vpack.c.bf16 %v4656_v55, %v4652_v47  ;;  %v4596_v16 = vld [vmem:[#allocation2 + $0x8] sm:$0xff] }
 0xf6e   : > { %6187 = vmatpush1.bf16.msra.mxu0 %v7998_v54  ;;  %6219 = vmatpush1.bf16.msra.mxu1 %v8001_v29  ;;  %v4654_v54 = vld [vmem:[#allocation8 + $0x198] sm:$0xff]  ;;  %v4651_v29 = vld [vmem:[#allocation8 + $0x180] sm:$0xff] }
 0xf6f   : > { %6189 = vmatprep.subr.bf16.mxu0 %v8006_v27  ;;  %6221 = vmatprep.subr.bf16.mxu1 %v8008_v51  ;;  %v6228_v24 = vpack.c.bf16 %v4658_v30, %v4654_v54  ;;  %v6198_v52 = vpack.c.bf16 %v4655_v35, %v4651_v29  ;;  %v4653_v27 = vld [vmem:[#allocation8 + $0x190] sm:$0xff] }
 0xf70   : > { %v6230_v51 = vpack.c.bf16 %v4657_v7, %v4653_v27 }
 0xf72   : > { %6191 = vmatpush1.bf16.msra.mxu0 %v6190_v53  ;;  %6223 = vmatpush1.bf16.msra.mxu1 %v6222_v18  ;;  %v4586_v53 = vpop.permute.xlu0 %4585 }
 0xf73   : > { %6193 = vmatprep.subr.bf16.mxu0 %v6192_v5  ;;  %6225 = vmatprep.subr.bf16.mxu1 %v6224_v26  ;;  %vm4587_vm14 = vcmp.eq.s32.totalorder %v4586_v53, 1 }
 0xf76   : > { %6195 = vmatpush1.bf16.msra.mxu0 %v6194_v60  ;;  %6227 = vmatpush1.bf16.msra.mxu1 %v6226_v15  ;;  %v4595_v60 = vld [vmem:[#allocation2] sm:$0xff] }
 0xf77   : > { %6197 = vmatprep.subr.bf16.mxu0 %v6196_v41  ;;  %6229 = vmatprep.subr.bf16.mxu1 %v6228_v24  ;;  %v4597_v41 = vld [vmem:[#allocation2 + $0x10] sm:$0xff]  ;;  %v4598_v24 = vld [vmem:[#allocation2 + $0x18] sm:$0xff] }
 0xf7a   : > { %6199 = vmatpush1.bf16.msra.mxu0 %v6198_v52  ;;  %6231 = vmatpush1.bf16.msra.mxu1 %v6230_v51 }
 0xf7b   : > { %6201 = vmatprep.subr.bf16.mxu0 %v6200_v1  ;;  %6233 = vmatprep.subr.bf16.mxu1 %v6232_v11 }
 0xf7e   : > { %6203 = vmatpush1.bf16.msra.mxu0 %v6202_v0  ;;  %6235 = vmatpush1.bf16.msra.mxu1 %v6234_v21 }
0x1034   : > { %v4485_v42 = vpop.f32.mrb[12].mxu0  ;;  %v4556_v31 = vpop.f32.mrb[12].mxu1 }
0x1035   : > { %v4561_v33 = vadd.f32 %v4485_v42, %v4346_v8  ;;  %v4487_v17 = vpop.f32.mrb[13].mxu0  ;;  %v4558_v10 = vpop.f32.mrb[13].mxu1  ;;  %v4563_v44 = vadd.f32 %v4556_v31, %v4348_v56 }
0x1036   : > { %v4562_v9 = vadd.f32 %v4487_v17, %v4347_v45  ;;  %v4564_v49 = vadd.f32 %v4558_v10, %v4349_v4 }
0x1037   : > { %v4565_v38 = vmul.f32 0.5, %v4561_v33 }
0x1038   : > { %v4569_v37 = vmul.f32 0.5, %v4562_v9  ;;  %v4574_v43 = vmul.f32 0.5, %v4564_v49 }
0x1039   : > { %6468 = vtanh.f32 %v4565_v38 }
0x103a   : > { %6470 = vtanh.f32 %v4569_v37 }
0x103b   : > { %6472 = vtanh.f32 %v4563_v44 }
0x103c   : > { %6474 = vtanh.f32 %v4574_v43 }
0x1043   : > { %v6469_v48 = vpop.eup %6468 }
0x1044   : > { %v6471_v25 = vpop.eup %6470  ;;  %v4567_v59 = vmul.f32 0.5, %v6469_v48 }
0x1045   : > { %v4571_v23 = vmul.f32 0.5, %v6471_v25  ;;  %v6473_v20 = vpop.eup %6472 }
0x1046   : > { %v4568_v62 = vadd.f32 0.5, %v4567_v59  ;;  %v6475_v50 = vpop.eup %6474 }
0x1047   : > { %v4572_v3 = vadd.f32 0.5, %v4571_v23  ;;  %v4576_v58 = vmul.f32 0.5, %v6475_v50 }
0x1048   : > { %v4579_v6 = vmul.f32 %v6473_v20, %v4568_v62 }
0x1049   : > { %v4578_v36 = vmul.f32 %v4572_v3, %v8030_v19  ;;  %v4577_v5 = vadd.f32 0.5, %v4576_v58 }
0x104b   : > { %v4580_v18 = vadd.f32 %v4579_v6, %v4578_v36 }
0x104d   : > { %6476 = vtanh.f32 %v4580_v18  ;;  %v4588_v46 = vsel %vm4587_vm14, %v4580_v18, %v8030_v19 }
0x1057   : > { %v6477_v32 = vpop.eup %6476 }
0x1058   : > { %v4582_v57 = vmul.f32 %v6477_v32, %v4577_v5 }
0x105a   : > { %v4590_v61 = vsel %vm4587_vm14, %v4582_v57, %v8033_v28  ;;  %v4592_v26 = vsel %vm4587_vm14, %v4582_v57, 0.0 }
0x105b   : > { %5137 = vst [vmem:[%s7003_s14 + $0x8] sm:$0xff] %v4592_v26  ;;  %4732 = vmatmul.mubr.f32.vlgmr.msra.gmra.mrb[14].mxu0 %v4590_v61  ;;  %4803 = vmatmul.mubr.f32.vlgmr.msra.gmra.mrb[14].mxu1 %v4590_v61 }
0x112e   : > { %v4733_v63 = vpop.f32.mrb[14].mxu0  ;;  %v4804_v15 = vpop.f32.mrb[14].mxu1 }
0x112f   : > { %v4809_v47 = vadd.f32 %v4733_v63, %v4595_v60  ;;  %v4735_v55 = vpop.f32.mrb[15].mxu0  ;;  %v4806_v54 = vpop.f32.mrb[15].mxu1  ;;  %v4811_v35 = vadd.f32 %v4804_v15, %v4597_v41 }
0x1130   : > { %v4810_v19 = vadd.f32 %v4735_v55, %v4596_v16  ;;  %v4812_v28 = vadd.f32 %v4806_v54, %v4598_v24 }
0x1131   : > { %v4813_v30 = vmul.f32 0.5, %v4809_v47 }
0x1132   : > { %v4817_v29 = vmul.f32 0.5, %v4810_v19  ;;  %v4822_v52 = vmul.f32 0.5, %v4812_v28 }
0x1133   : > { %6478 = vtanh.f32 %v4813_v30 }
0x1134   : > { %6480 = vtanh.f32 %v4817_v29 }
0x1135   : > { %6482 = vtanh.f32 %v4811_v35 }
0x1136   : > { %6484 = vtanh.f32 %v4822_v52 }
0x113d   : > { %v6479_v27 = vpop.eup %6478 }
0x113e   : > { %v6481_v7 = vpop.eup %6480  ;;  %v4815_v51 = vmul.f32 0.5, %v6479_v27 }
0x113f   : > { %v4819_v13 = vmul.f32 0.5, %v6481_v7  ;;  %v6483_v12 = vpop.eup %6482 }
0x1140   : > { %v4816_v2 = vadd.f32 0.5, %v4815_v51  ;;  %v6485_v14 = vpop.eup %6484 }
0x1141   : > { %v4820_v1 = vadd.f32 0.5, %v4819_v13  ;;  %v4824_v40 = vmul.f32 0.5, %v6485_v14 }
0x1142   : > { %v4827_v39 = vmul.f32 %v6483_v12, %v4816_v2 }
0x1143   : > { %v4826_v34 = vmul.f32 %v4820_v1, %v4588_v46  ;;  %v4825_v21 = vadd.f32 0.5, %v4824_v40 }
0x1145   : > { %v4828_v11 = vadd.f32 %v4827_v39, %v4826_v34 }
0x1147   : > { %6486 = vtanh.f32 %v4828_v11  ;;  %v4836_v0 = vsel %vm4835_vm15, %v4828_v11, %v4588_v46 }
0x1148   : > { %4837 = vst [vmem:[#allocation4] sm:$0xff] %v4836_v0 }
0x1151   : > { %v6487_v8 = vpop.eup %6486 }
0x1152   : > { %v4830_v45 = vmul.f32 %v6487_v8, %v4825_v21 }
0x1154   : > { %v4838_v42 = vsel %vm4835_vm15, %v4830_v45, %v4590_v61  ;;  %v4840_v31 = vsel %vm4835_vm15, %v4830_v45, 0.0 }
0x1155   : > { %4839 = vst [vmem:[#allocation3] sm:$0xff] %v4838_v42  ;;  %4841 = vst [vmem:[%s7003_s14] sm:$0xff] %v4840_v31 }
0x1156 PF: > { %v4847_v17 = vld [vmem:[#allocation4] sm:$0xff]  ;;  %s4854_s26 = sand.u32 1, %s6782_s30   ;;  %s8063_s28 = sshll.u32 %s6686_s27, 7 }
0x1157   : > { %4848 = vst [vmem:[%s7011_s20] sm:$0xff] %v4847_v17  ;;  %s8071_s23 = scalar_lea.hbm %s8181_s5, %s8063_s28  ;;  %s8077_s19 = scalar_lea.hbm %s8182_s6, %s8063_s28 }
0x1158   : > { %s4896_s16 = sshll.u32 %s7007_s18, 4  ;;  %s8080_s11 = scalar_lea.sflag [#allocation12], %s4854_s26  ;;  %s4897_s16 = int_to_ptr.vmem [resolvable:$true] %s4896_s16 }
0x1159   : > { %s6548_s27 = scalar_lea.vmem %s4897_s16, 128  ;;  %p8203_p1 = scmp.ne.s32.totalorder %s8195_s12, 0 }
0x115a   : > { %p6549_p13 = scmp.ne.s32.totalorder %s4897_s16, %s6548_s27  ;;  %s6705_s30 = smov [#allocation11]  }
0x115b   : > { %s6552_s21 = sshll.u32 %s6705_s30, 4  ;;  %s6553_s21 = int_to_ptr.vmem [resolvable:$false] %s6552_s21 }
0x115c   : > { %v4845_v33 = vld [vmem:[#allocation3] sm:$0xff]  ;;  %p6550_p3 = pnand %p6549_p13, %p8203_p1  ;;  %s6554_s15 = scalar_lea.vmem %s6553_s21, 256 }
0x115d   : > { %4846 = vst [vmem:[%s7007_s18] sm:$0xff] %v4845_v33  ;;  %p6555_p6 = scmp.lt.s32.totalorder %s4897_s16, %s6553_s21  ;;  %p6556_p8 = scmp.lt.s32.totalorder %s6554_s15, %s6548_s27 }
0x115e   : > { %p6551_p5 = pneg %p6550_p3 }
0x115f   : > { %p6557_p4 = por %p6556_p8, %p6555_p6 }
0x1161   : > { %p6558_p7 = pnand %p6557_p4, %p6551_p5 }
0x1163   : > { %6561 = shalt.err (!%p6558_p7)
}
0x1164   : > { %s6562_s18 = scalar_lea.hbm %s8077_s19, 128  ;;  %s6566_s9 = scalar_lea.hbm %s8182_s6, 256 }
0x1165   : > { %p6563_p12 = scmp.ne.s32.totalorder %s8077_s19, %s6562_s18  ;;  %p6567_p0 = scmp.lt.u32.totalorder %s8077_s19, %s8182_s6 }
0x1166   : > { %p6568_p2 = scmp.lt.u32.totalorder %s6566_s9, %s6562_s18  ;;  %p6570_p13 = scmp.lt.u32.totalorder %s6562_s18, %s8077_s19 }
0x1167   : > { %p6564_p11 = pnand %p6563_p12, %p8203_p1 }
0x1168   : > { %p6569_p10 = por %p6568_p2, %p6567_p0 }
0x1169   : > { %p6565_p9 = pneg %p6564_p11 }
0x116a   : > { %p6571_p3 = por %p6570_p13, %p6569_p10 }
0x116c   : > { %p6572_p5 = pnand %p6571_p3, %p6565_p9 }
0x116e   : > { %6575 = shalt.err (!%p6572_p5)
}
0x116f   : > { %6241 = dma.vmem_to_hbm [thread:$0]  (%p8203_p1), %s4897_s16, 128, %s8077_s19, %s8080_s11  }
0x1170   : > { %s4880_s27 = sshll.u32 %s7003_s14, 4  ;;  %s8107_s15 = scalar_lea.hbm %s8183_s7, %s8063_s28  ;;  %s8101_s27 = int_to_ptr.vmem [resolvable:$true] %s4880_s27 }
0x1171   : > { %s4850_s18 = scalar_lea.sflag [#allocation7], %s6910_s22  ;;  %s6576_s26 = scalar_lea.vmem %s8101_s27, 1024 }
0x1172   : > { %p6577_p6 = scmp.ne.s32.totalorder %s8101_s27, %s6576_s26  ;;  %s6706_s8 = smov [#allocation10]  }
0x1173   : > { %s6580_s9 = sshll.u32 %s6706_s8, 4  ;;  %s6581_s9 = int_to_ptr.vmem [resolvable:$false] %s6580_s9 }
0x1174   : > { %p6578_p8 = pnand %p6577_p6, %p8203_p1  ;;  %s6582_s14 = scalar_lea.vmem %s6581_s9, 2048 }
0x1175   : > { %p6583_p7 = scmp.lt.s32.totalorder %s8101_s27, %s6581_s9  ;;  %p6584_p12 = scmp.lt.s32.totalorder %s6582_s14, %s6576_s26 }
0x1176   : > { %p6579_p4 = pneg %p6578_p8 }
0x1177   : > { %p6585_p11 = por %p6584_p12, %p6583_p7 }
0x1179   : > { %p6586_p9 = pnand %p6585_p11, %p6579_p4 }
0x117b   : > { %6589 = shalt.err (!%p6586_p9)
}
0x117c   : > { %s6590_s28 = scalar_lea.hbm %s8071_s23, 1024  ;;  %s6594_s17 = scalar_lea.hbm %s8181_s5, 2048 }
0x117d   : > { %p6591_p0 = scmp.ne.s32.totalorder %s8071_s23, %s6590_s28  ;;  %p6595_p13 = scmp.lt.u32.totalorder %s8071_s23, %s8181_s5 }
0x117e   : > { %p6596_p3 = scmp.lt.u32.totalorder %s6594_s17, %s6590_s28  ;;  %p6598_p6 = scmp.lt.u32.totalorder %s6590_s28, %s8071_s23 }
0x117f   : > { %p6592_p2 = pnand %p6591_p0, %p8203_p1 }
0x1180   : > { %p6597_p5 = por %p6596_p3, %p6595_p13 }
0x1181   : > { %p6593_p10 = pneg %p6592_p2 }
0x1182   : > { %p6599_p8 = por %p6598_p6, %p6597_p5 }
0x1184   : > { %p6600_p4 = pnand %p6599_p8, %p6593_p10 }
0x1186   : > { %6603 = shalt.err (!%p6600_p4)
}
0x1187   : > { %s6707_s21 = smov 128   ;;  %s6708_s26 = smov 256  }
0x1188   : > { %s6709_s8 = smov 8   ;;  %s4909_s9 = sshll.u32 %s7011_s20, 4  ;;  %s4910_s9 = int_to_ptr.vmem [resolvable:$true] %s4909_s9 }
0x1189   : > { %6240 = dma.vmem_to_hbm [thread:$0]  (%p8203_p1), %s8101_s27, 1024, %s8071_s23, %s4850_s18, %s6707_s21, %s6708_s26, %s6709_s8  }
0x118a   : > { %s6604_s14 = scalar_lea.vmem %s4910_s9, 128  ;;  %s6710_s28 = smov [#allocation13]  }
0x118b   : > { %p6605_p7 = scmp.ne.s32.totalorder %s4910_s9, %s6604_s14  ;;  %s6608_s19 = sshll.u32 %s6710_s28, 4  ;;  %s6609_s19 = int_to_ptr.vmem [resolvable:$false] %s6608_s19 }
0x118c   : > { %s6610_s16 = scalar_lea.vmem %s6609_s19, 256  ;;  %p6611_p9 = scmp.lt.s32.totalorder %s4910_s9, %s6609_s19 }
0x118d   : > { %p6606_p12 = pnand %p6605_p7, %p8203_p1  ;;  %p6612_p0 = scmp.lt.s32.totalorder %s6610_s16, %s6604_s14 }
0x118f   : > { %p6607_p11 = pneg %p6606_p12  ;;  %p6613_p2 = por %p6612_p0, %p6611_p9 }
0x1191   : > { %p6614_p10 = pnand %p6613_p2, %p6607_p11 }
0x1193   : > { %6617 = shalt.err (!%p6614_p10)
}
0x1194   : > { %s6618_s22 = scalar_lea.hbm %s8107_s15, 128  ;;  %s6622_s27 = scalar_lea.hbm %s8183_s7, 256 }
0x1195   : > { %p6619_p13 = scmp.ne.s32.totalorder %s8107_s15, %s6618_s22  ;;  %p6623_p6 = scmp.lt.u32.totalorder %s8107_s15, %s8183_s7 }
0x1196   : > { %p6624_p8 = scmp.lt.u32.totalorder %s6622_s27, %s6618_s22  ;;  %p6626_p7 = scmp.lt.u32.totalorder %s6618_s22, %s8107_s15 }
0x1197   : > { %p6620_p3 = pnand %p6619_p13, %p8203_p1 }
0x1198   : > { %p6625_p4 = por %p6624_p8, %p6623_p6 }
0x1199   : > { %p6621_p5 = pneg %p6620_p3 }
0x119a   : > { %p6627_p12 = por %p6626_p7, %p6625_p4 }
0x119c   : > { %p6628_p11 = pnand %p6627_p12, %p6621_p5 }
0x119e   : > { %6631 = shalt.err (!%p6628_p11)
}
0x119f   : > { %6242 = dma.vmem_to_hbm [thread:$0]  (%p8203_p1), %s4910_s9, 128, %s8107_s15, %s8080_s11  }
0x11a0 PF: > { %p6263_p9 = scmp.ge.s32.totalorder %s6694_s29, 2  ;;  %s4921_s10 = sand.u32 1, %s6674_s24  }
0x11a1   : > { %p8204_p0 = scmp.ne.s32.totalorder %s8196_s13, 0  ;;  %s4922_s30 = scalar_lea.sflag [#allocation7], %s4921_s10 }
0x11a3   : > { %p6254_p2 = pnand %p6263_p9, %p8204_p0 }
0x11a5   : > { %6665 = dma.done.wait (!%p6254_p2), %s4922_s30, 1024  }
0x11a6   : > { %6667 = vsyncadd (!%p6254_p2), %s4922_s30, 4294966272  ;;  %s8205_s21 = sadd.s32 4294967294, %s6694_s29  }
0x11a7   : > { %s4930_s26 = sand.u32 1, %s8205_s21  }
0x11a8   : > { %s4931_s8 = scalar_lea.sflag [#allocation12], %s4930_s26 }
0x11a9   : > { %6669 = dma.done.wait (!%p6254_p2), %s4931_s8, 256  }
0x11aa   : > { %6671 = vsyncadd (!%p6254_p2), %s4931_s8, 4294967040  ;;  %s26_s29 = sadd.s32 1, %s6694_s29   ;;  %s8206_s12 = sld [smem:[#allocation18_spill]] }
0x11ab   : > { %p23_p1 = scmp.ge.s32.totalorder %s26_s29, 4   ;;  %s8207_s26 = sld [smem:[#allocation21_spill]] }
0x11ac   : > { %s8208_s27 = sld [smem:[#allocation19_spill]]  ;;  %s8209_s28 = sld [smem:[#allocation20_spill]] }
0x11ad   : > { %s8210_s24 = smov %s6678_s25  ;;  %25 = sbr.rel (!%p23_p1) target bundleno = 8 (0x8), region = 182 }
0x11b0   : > { %s8211_s25 = smov %s8206_s12 }
0x11b4   :  { %4945 = vsyncpa [#allocation6], 1 }
0x11b5   :  { %4947 = vsyncpa [#allocation6 + $0x1], 1 }
0x11b6   :  { %4948 = vsyncpa [#allocation9], 1 }
0x11b7   :  { %4949 = vsyncpa [#allocation7], 1 }
0x11b8   :  { %4951 = vsyncpa [#allocation7 + $0x1], 1 }
0x11b9   :  { %4952 = vsyncpa [#allocation12], 1 }
0x11ba   :  { %4954 = vsyncpa [#allocation12 + $0x1], 1 }

</bundles_post_ra>
